<compile_context>
chip_gen: v5e
topology: v5e:2x2
jax: 0.10.0
libtpu: 0.0.40
codegen_flags: <defaults>
</compile_context>

<pallas_src>
import math
from functools import partial, lru_cache

import jax
import jax.numpy as jnp
from jax import lax
from jax.experimental import pallas as pl
from jax.experimental.pallas import tpu as pltpu


# ----------------------------- small helpers ----------------------------------------


def _round_up(x, m):
    return ((x + m - 1) // m) * m


@lru_cache(maxsize=None)
def _vmem_limit():
    """Generation-aware scoped-VMEM budget: ~75% of physical VMEM, capped at 100 MiB."""
    cap = 64 * 1024 * 1024
    try:
        info = pltpu.get_tpu_info()
        cap = int(getattr(info, "vmem_capacity_bytes", cap))
    except Exception:  # pragma: no cover - conservative fallback off-TPU
        pass
    return max(32 * 1024 * 1024, min((cap * 3) // 4, 100 * 1024 * 1024))


def _cparams(*sem):
    return pltpu.CompilerParams(dimension_semantics=sem, vmem_limit_bytes=_vmem_limit())


def _row_tiling(m, cap=1024):
    """Pick a sublane-aligned row tile <= cap, guarantee >=2 grid steps when m allows
    (v7x megacore), and return (tile, padded_rows).  Rows are padded, never un-tiled."""
    tm = min(cap, max(8, _round_up(m, 8)))
    if m >= 16:
        tm = min(tm, _round_up((m + 1) // 2, 8))   # at least two grid steps
    return tm, _round_up(m, tm)


def _col_tiling(n, cap=2048):
    """Column tile for the output feature axis.  Small n -> full extent; large n ->
    128-aligned tile so a huge vocab head never holds (K, V) in VMEM at once."""
    if n <= cap:
        return n, n
    npad = _round_up(n, 128)
    tn, t = 128, 128
    while t <= cap:
        if npad % t == 0:
            tn = t
        t += 128
    return tn, npad


# ----------------------------- Pallas kernels ---------------------------------------


def _linear_kernel(x_ref, wt_ref, b_ref, o_ref):
    # (tm, K) @ (K, tn) + (1, tn).  Weight is pre-transposed bf16; accumulate f32.
    x = x_ref[...].astype(jnp.bfloat16)
    o_ref[...] = (
        jnp.dot(x, wt_ref[...], preferred_element_type=jnp.float32) + b_ref[...]
    ).astype(o_ref.dtype)


def _ffn_ln_kernel(x_ref, w1t_ref, b1_ref, w2t_ref, b2_ref, g_ref, be_ref, o_ref, *, eps):
    # LayerNorm(x + fc2(relu(fc1(x)))): the (tm, Dff) intermediate and the residual
    # add never touch HBM.  Matmuls in bf16, accumulation/LN in f32.
    # TODO(synk): for very large d_ff (v7x 64 MiB VMEM) chunk the Dff axis.
    x = x_ref[...]
    h = jnp.dot(x.astype(jnp.bfloat16), w1t_ref[...],
                preferred_element_type=jnp.float32) + b1_ref[...]
    h = jnp.maximum(h, 0.0).astype(jnp.bfloat16)
    y = jnp.dot(h, w2t_ref[...], preferred_element_type=jnp.float32) + b2_ref[...]
    z = x + y
    mu = jnp.mean(z, axis=-1, keepdims=True)
    zc = z - mu
    var = jnp.mean(zc * zc, axis=-1, keepdims=True)
    o_ref[...] = (zc * lax.rsqrt(var + eps) * g_ref[...] + be_ref[...]).astype(o_ref.dtype)


def _mha_core_kernel(q_ref, k_ref, v_ref, qm_ref, km_ref, wo_ref, bo_ref,
                     res_ref, g_ref, be_ref, o_ref, *, num_heads, scale, causal, eps):
    # One batch element per grid step.  All heads are processed in-kernel and written
    # as a lane-dense (Sq, D) slab, then fused with the O-projection, residual add and
    # LayerNorm -> no split/combine-head transposes and no separate add+LN HBM pass.
    # TODO(synk): for long sequences switch to Sq/Sk-tiled online-softmax (flash) form.
    sq, d = q_ref.shape
    sk = k_ref.shape[0]
    dk = d // num_heads

    keep = qm_ref[...] * km_ref[...]                       # (Sq, 1) * (1, Sk) -> (Sq, Sk)
    if causal:
        rows = lax.broadcasted_iota(jnp.int32, (sq, sk), 0)
        cols = lax.broadcasted_iota(jnp.int32, (sq, sk), 1)
        keep = jnp.where(rows >= cols, keep, 0.0)

    q = q_ref[...].astype(jnp.bfloat16)
    k = k_ref[...].astype(jnp.bfloat16)
    v = v_ref[...].astype(jnp.bfloat16)

    heads = []
    for h in range(num_heads):
        qh = q[:, h * dk:(h + 1) * dk]
        kh = k[:, h * dk:(h + 1) * dk]
        vh = v[:, h * dk:(h + 1) * dk]
        s = lax.dot_general(qh, kh, (((1,), (1,)), ((), ())),
                            preferred_element_type=jnp.float32) * scale
        s = jnp.where(keep > 0.0, s, -1e9)                 # masked_fill(mask == 0, -1e9)
        s = s - jnp.max(s, axis=-1, keepdims=True)
        p = jnp.exp(s)
        l = jnp.sum(p, axis=-1, keepdims=True)
        oh = jnp.dot(p.astype(jnp.bfloat16), vh, preferred_element_type=jnp.float32)
        heads.append(oh * pl.reciprocal(l, approx=True))   # normalize on (Sq, dk), not (Sq, Sk)

    attn = jnp.concatenate(heads, axis=-1)                 # (Sq, D) lane-dense
    y = jnp.dot(attn.astype(jnp.bfloat16), wo_ref[...],
                preferred_element_type=jnp.float32) + bo_ref[...]
    z = res_ref[...] + y
    mu = jnp.mean(z, axis=-1, keepdims=True)
    zc = z - mu
    var = jnp.mean(zc * zc, axis=-1, keepdims=True)
    o_ref[...] = (zc * lax.rsqrt(var + eps) * g_ref[...] + be_ref[...]).astype(o_ref.dtype)


# ----------------------------- Pallas wrappers --------------------------------------


def linear(x2d, wt, bias):
    """x2d: (M, K) f32; wt: (K, N) bf16 (pre-transposed); bias: (N,) f32 -> (M, N) f32.
    Tiles rows and 128-aligned output columns (so a big vocab head pipelines)."""
    M, K = x2d.shape
    N = wt.shape[1]
    tm, mpad = _row_tiling(M)
    tn, npad = _col_tiling(N)
    x = jnp.pad(x2d, ((0, mpad - M), (0, 0))) if mpad != M else x2d
    w = jnp.pad(wt, ((0, 0), (0, npad - N))) if npad != N else wt
    b = bias.reshape(1, N)
    if npad != N:
        b = jnp.pad(b, ((0, 0), (0, npad - N)))
    out = pl.pallas_call(
        _linear_kernel,
        out_shape=jax.ShapeDtypeStruct((mpad, npad), jnp.float32),
        grid=(mpad // tm, npad // tn),
        in_specs=[
            pl.BlockSpec((tm, K), lambda i, j: (i, 0)),
            pl.BlockSpec((K, tn), lambda i, j: (0, j)),
            pl.BlockSpec((1, tn), lambda i, j: (0, j)),
        ],
        out_specs=pl.BlockSpec((tm, tn), lambda i, j: (i, j)),
        compiler_params=_cparams("parallel", "parallel"),
    )(x, w, b)
    if mpad != M or npad != N:
        out = out[:M, :N]
    return out


def feed_forward_ln(p, x, gamma, beta, eps=1e-5):
    """LayerNorm(x + fc2(relu(fc1(x)))).  x: (B, S, D) f32."""
    B, S, D = x.shape
    M = B * S
    Dff = p["w1_t"].shape[1]
    tm, mpad = _row_tiling(M)
    x2 = x.reshape(M, D)
    if mpad != M:
        x2 = jnp.pad(x2, ((0, mpad - M), (0, 0)))
    out = pl.pallas_call(
        partial(_ffn_ln_kernel, eps=eps),
        out_shape=jax.ShapeDtypeStruct((mpad, D), jnp.float32),
        grid=(mpad // tm,),
        in_specs=[
            pl.BlockSpec((tm, D), lambda i: (i, 0)),
            pl.BlockSpec((D, Dff), lambda i: (0, 0)),   # constant index_map: resident
            pl.BlockSpec((1, Dff), lambda i: (0, 0)),
            pl.BlockSpec((Dff, D), lambda i: (0, 0)),
            pl.BlockSpec((1, D), lambda i: (0, 0)),
            pl.BlockSpec((1, D), lambda i: (0, 0)),
            pl.BlockSpec((1, D), lambda i: (0, 0)),
        ],
        out_specs=pl.BlockSpec((tm, D), lambda i: (i, 0)),
        compiler_params=_cparams("parallel"),
    )(x2, p["w1_t"], p["b1"].reshape(1, Dff), p["w2_t"], p["b2"].reshape(1, D),
      gamma.reshape(1, D), beta.reshape(1, D))
    return out[:M].reshape(B, S, D)


def multi_head_attention_ln(p, q_in, k_in, v_in, qkeep, kkeep, causal,
                            gamma, beta, num_heads, eps=1e-5):
    """Returns LayerNorm(q_in + W_o(MHA(q_in, k_in, v_in, mask))).
    qkeep: (B, Sq), kkeep: (B, Sk) float {0,1}; causal adds the no-peek triangle."""
    B, Sq, D = q_in.shape
    Sk = k_in.shape[1]
    dk = D // num_heads

    Q = linear(q_in.reshape(B * Sq, D), p["wq_t"], p["bq"]).reshape(B, Sq, D)
    K = linear(k_in.reshape(B * Sk, D), p["wk_t"], p["bk"]).reshape(B, Sk, D)
    V = linear(v_in.reshape(B * Sk, D), p["wv_t"], p["bv"]).reshape(B, Sk, D)

    qm = qkeep.astype(jnp.float32).reshape(B, Sq, 1)
    km = kkeep.astype(jnp.float32).reshape(B, 1, Sk)

    kernel = partial(_mha_core_kernel, num_heads=num_heads,
                     scale=1.0 / math.sqrt(dk), causal=bool(causal), eps=eps)
    return pl.pallas_call(
        kernel,
        out_shape=jax.ShapeDtypeStruct((B, Sq, D), jnp.float32),
        grid=(B,),
        in_specs=[
            pl.BlockSpec((None, Sq, D), lambda b: (b, 0, 0)),   # Q
            pl.BlockSpec((None, Sk, D), lambda b: (b, 0, 0)),   # K
            pl.BlockSpec((None, Sk, D), lambda b: (b, 0, 0)),   # V
            pl.BlockSpec((None, Sq, 1), lambda b: (b, 0, 0)),   # query keep
            pl.BlockSpec((None, 1, Sk), lambda b: (b, 0, 0)),   # key keep
            pl.BlockSpec((D, D), lambda b: (0, 0)),             # W_o^T (resident)
            pl.BlockSpec((1, D), lambda b: (0, 0)),             # b_o
            pl.BlockSpec((None, Sq, D), lambda b: (b, 0, 0)),   # residual (= q_in)
            pl.BlockSpec((1, D), lambda b: (0, 0)),             # LN gamma
            pl.BlockSpec((1, D), lambda b: (0, 0)),             # LN beta
        ],
        out_specs=pl.BlockSpec((None, Sq, D), lambda b: (b, 0, 0)),
        compiler_params=_cparams("parallel"),
    )(Q, K, V, qm, km, p["wo_t"], p["bo"].reshape(1, D), q_in,
      gamma.reshape(1, D), beta.reshape(1, D))


# ----------------------------- Model (Pallas-backed) --------------------------------


def _build_pe(d_model, max_seq_length):
    assert d_model % 2 == 0, "d_model must be even for the sin/cos interleave"
    position = jnp.arange(0, max_seq_length, dtype=jnp.float32)[:, None]
    div_term = jnp.exp(
        jnp.arange(0, d_model, 2, dtype=jnp.float32) * -(math.log(10000.0) / d_model)
    )
    angles = position * div_term
    pe = jnp.zeros((max_seq_length, d_model), dtype=jnp.float32)
    pe = pe.at[:, 0::2].set(jnp.sin(angles))
    pe = pe.at[:, 1::2].set(jnp.cos(angles))
    return pe


def transformer_forward(params, src, tgt, cfg):
    D, H = cfg["d_model"], cfg["num_heads"]
    assert D % H == 0
    B, Ss = src.shape
    St = tgt.shape[1]

    # Tiny keep-vectors replace the materialized (B,1,Sq,Sk) float mask.
    src_keep = (src != 0).astype(jnp.float32)            # key padding (encoder & cross)
    tgt_keep = (tgt != 0).astype(jnp.float32)            # query padding (decoder self)
    ones_src = jnp.ones((B, Ss), jnp.float32)
    ones_tgt = jnp.ones((B, St), jnp.float32)

    pe = params["pe"]
    # Embedding gather + positional-encoding add in plain JAX (XLA fuses the add).
    enc = params["src_emb"][src] + pe[None, :Ss, :]
    dec = params["tgt_emb"][tgt] + pe[None, :St, :]
    # TODO(synk): dropout layers are identity here (inference/eval semantics).

    for p in params["enc_layers"]:
        enc = multi_head_attention_ln(p["attn"], enc, enc, enc, ones_src, src_keep,
                                      False, p["g1"], p["b1"], H)
        enc = feed_forward_ln(p["ffn"], enc, p["g2"], p["b2"])

    for p in params["dec_layers"]:
        dec = multi_head_attention_ln(p["self_attn"], dec, dec, dec, tgt_keep, ones_tgt,
                                      True, p["g1"], p["b1"], H)
        dec = multi_head_attention_ln(p["cross_attn"], dec, enc, enc, ones_tgt, src_keep,
                                      False, p["g2"], p["b2"], H)
        dec = feed_forward_ln(p["ffn"], dec, p["g3"], p["b3"])

    logits = linear(dec.reshape(B * St, D), params["fc_w_t"], params["fc_b"])
    return logits.reshape(B, St, -1)


# ----------------------------- Parameter init ---------------------------------------


def _init_linear_t(key, in_dim, out_dim):
    """Returns weight pre-transposed to (in_dim, out_dim) in bf16 and f32 bias."""
    kw, kb = jax.random.split(key)
    w = jax.random.normal(kw, (out_dim, in_dim), jnp.float32) * (1.0 / math.sqrt(in_dim))
    b = jax.random.normal(kb, (out_dim,), jnp.float32) * 0.02
    return w.T.astype(jnp.bfloat16), b


def _init_mha(key, d_model):
    p = {}
    for name, k in zip(("q", "k", "v", "o"), jax.random.split(key, 4)):
        wt, b = _init_linear_t(k, d_model, d_model)
        p["w" + name + "_t"], p["b" + name] = wt, b
    return p


def _init_ffn(key, d_model, d_ff):
    k1, k2 = jax.random.split(key)
    w1t, b1 = _init_linear_t(k1, d_model, d_ff)
    w2t, b2 = _init_linear_t(k2, d_ff, d_model)
    return dict(w1_t=w1t, b1=b1, w2_t=w2t, b2=b2)


def _ln_params(d):
    return jnp.ones((d,), jnp.float32), jnp.zeros((d,), jnp.float32)


def _init_encoder_layer(key, d_model, d_ff):
    k1, k2 = jax.random.split(key)
    g1, b1 = _ln_params(d_model)
    g2, b2 = _ln_params(d_model)
    return dict(attn=_init_mha(k1, d_model), ffn=_init_ffn(k2, d_model, d_ff),
                g1=g1, b1=b1, g2=g2, b2=b2)


def _init_decoder_layer(key, d_model, d_ff):
    k1, k2, k3 = jax.random.split(key, 3)
    g1, b1 = _ln_params(d_model)
    g2, b2 = _ln_params(d_model)
    g3, b3 = _ln_params(d_model)
    return dict(self_attn=_init_mha(k1, d_model), cross_attn=_init_mha(k2, d_model),
                ffn=_init_ffn(k3, d_model, d_ff),
                g1=g1, b1=b1, g2=g2, b2=b2, g3=g3, b3=b3)


def init_transformer(key, cfg):
    D, Dff, L = cfg["d_model"], cfg["d_ff"], cfg["num_layers"]
    keys = jax.random.split(key, 3 + 2 * L)
    src_emb = jax.random.normal(keys[0], (cfg["src_vocab_size"], D), jnp.float32)
    tgt_emb = jax.random.normal(keys[1], (cfg["tgt_vocab_size"], D), jnp.float32)
    fc_w_t, fc_b = _init_linear_t(keys[2], D, cfg["tgt_vocab_size"])
    enc_layers = [_init_encoder_layer(keys[3 + i], D, Dff) for i in range(L)]
    dec_layers = [_init_decoder_layer(keys[3 + L + i], D, Dff) for i in range(L)]
    pe = _build_pe(D, cfg["max_seq_length"])
    return dict(src_emb=src_emb, tgt_emb=tgt_emb, fc_w_t=fc_w_t, fc_b=fc_b,
                enc_layers=enc_layers, dec_layers=dec_layers, pe=pe)


# ----------------------------- Plain-JAX reference ----------------------------------


def _rl(x, w_t, b):
    return jnp.einsum("...d,dn->...n", x, w_t.astype(jnp.float32)) + b


def _ref_masks(src, tgt):
    src_mask = (src != 0)[:, None, None, :]                              # (B,1,1,Ss)
    St = tgt.shape[1]
    nopeak = jnp.tril(jnp.ones((St, St), dtype=jnp.bool_))
    tgt_mask = (tgt != 0)[:, None, :, None] & nopeak[None, None, :, :]   # (B,1,St,St)
    return src_mask, tgt_mask


def _ref_mha(p, q_in, k_in, v_in, mask, H):
    B, Sq, D = q_in.shape
    Sk = k_in.shape[1]
    Dk = D // H

    def split(x, S):
        return x.reshape(B, S, H, Dk).transpose(0, 2, 1, 3)

    Q = split(_rl(q_in, p["wq_t"], p["bq"]), Sq)
    K = split(_rl(k_in, p["wk_t"], p["bk"]), Sk)
    V = split(_rl(v_in, p["wv_t"], p["bv"]), Sk)
    s = jnp.einsum("bhqd,bhkd->bhqk", Q, K) / math.sqrt(Dk)
    s = jnp.where(mask == 0, -1e9, s)
    a = jax.nn.softmax(s, axis=-1)
    o = jnp.einsum("bhqk,bhkd->bhqd", a, V).transpose(0, 2, 1, 3).reshape(B, Sq, D)
    return _rl(o, p["wo_t"], p["bo"])


def _ref_ln(x, g, b, eps=1e-5):
    mu = x.mean(-1, keepdims=True)
    var = ((x - mu) ** 2).mean(-1, keepdims=True)
    return (x - mu) * lax.rsqrt(var + eps) * g + b


def _ref_ffn(p, x):
    h = jnp.maximum(_rl(x, p["w1_t"], p["b1"]), 0.0)
    return _rl(h, p["w2_t"], p["b2"])


def transformer_reference(params, src, tgt, cfg):
    H = cfg["num_heads"]
    Ss, St = src.shape[1], tgt.shape[1]
    src_mask, tgt_mask = _ref_masks(src, tgt)
    pe = params["pe"]
    enc = params["src_emb"][src] + pe[None, :Ss, :]
    dec = params["tgt_emb"][tgt] + pe[None, :St, :]
    for p in params["enc_layers"]:
        enc = _ref_ln(enc + _ref_mha(p["attn"], enc, enc, enc, src_mask, H), p["g1"], p["b1"])
        enc = _ref_ln(enc + _ref_ffn(p["ffn"], enc), p["g2"], p["b2"])
    for p in params["dec_layers"]:
        dec = _ref_ln(dec + _ref_mha(p["self_attn"], dec, dec, dec, tgt_mask, H), p["g1"], p["b1"])
        dec = _ref_ln(dec + _ref_mha(p["cross_attn"], dec, enc, enc, src_mask, H), p["g2"], p["b2"])
        dec = _ref_ln(dec + _ref_ffn(p["ffn"], dec), p["g3"], p["b3"])
    return _rl(dec, params["fc_w_t"], params["fc_b"])


# ----------------------------- Demo / correctness check -----------------------------

if __name__ == "__main__":
    cfg = dict(src_vocab_size=64, tgt_vocab_size=64, d_model=32, num_heads=2,
               num_layers=2, d_ff=64, max_seq_length=16, dropout=0.0)
    B, Ss, St = 2, 8, 8

    key = jax.random.PRNGKey(0)
    kp, ks, kt = jax.random.split(key, 3)
    params = init_transformer(kp, cfg)

    src = jax.random.randint(ks, (B, Ss), 1, cfg["src_vocab_size"], dtype=jnp.int32)
    tgt = jax.random.randint(kt, (B, St), 1, cfg["tgt_vocab_size"], dtype=jnp.int32)
    src = src.at[:, -2:].set(0)   # padding tokens -> exercises the src key mask
    tgt = tgt.at[:, -1:].set(0)   # padding token  -> exercises the tgt query mask

    fwd = jax.jit(lambda p, s, t: transformer_forward(p, s, t, cfg))
    out = jax.block_until_ready(fwd(params, src, tgt))

    with jax.default_matmul_precision("highest"):
        ref = jax.block_until_ready(transformer_reference(params, src, tgt, cfg))

    assert out.shape == (B, St, cfg["tgt_vocab_size"])
    max_err = float(jnp.max(jnp.abs(out - ref)))
    # bf16 MXU inputs (kernel) vs f32 "highest" reference -> loose absolute tolerance.
    assert max_err < 1.5e-1, f"mismatch vs reference: max abs err = {max_err}"

    print("KERNEL_OK")
</pallas_src>

<mosaic_0001>
module attributes {stable_mosaic.version = 11 : i64} {
  func.func @_mha_core_kernel(%arg0: i32, %arg1: memref<1x8x32xf32, #tpu.memory_space<vmem>>, %arg2: memref<1x8x32xf32, #tpu.memory_space<vmem>>, %arg3: memref<1x8x32xf32, #tpu.memory_space<vmem>>, %arg4: memref<1x8x1xf32, #tpu.memory_space<vmem>>, %arg5: memref<1x1x8xf32, #tpu.memory_space<vmem>>, %arg6: memref<32x32xbf16, #tpu.memory_space<vmem>>, %arg7: memref<1x32xf32, #tpu.memory_space<vmem>>, %arg8: memref<1x8x32xf32, #tpu.memory_space<vmem>>, %arg9: memref<1x32xf32, #tpu.memory_space<vmem>>, %arg10: memref<1x32xf32, #tpu.memory_space<vmem>>, %arg11: memref<1x8x32xf32, #tpu.memory_space<vmem>>) attributes {dimension_semantics = [#tpu.dimension_semantics<parallel>], iteration_bounds = array<i64: 2>, scalar_prefetch = 0 : i64, scratch_operands = 0 : i64, tpu.core_type = #tpu.core_type<tc>, window_params = [{transform_indices = @transform_0, window_bounds = array<i64: 1, 8, 32>}, {transform_indices = @transform_1, window_bounds = array<i64: 1, 8, 32>}, {transform_indices = @transform_2, window_bounds = array<i64: 1, 8, 32>}, {transform_indices = @transform_3, window_bounds = array<i64: 1, 8, 1>}, {transform_indices = @transform_4, window_bounds = array<i64: 1, 1, 8>}, {pipeline_mode = #tpu.pipeline_mode<synchronous>, transform_indices = @transform_5, window_bounds = array<i64: 32, 32>}, {pipeline_mode = #tpu.pipeline_mode<synchronous>, transform_indices = @transform_6, window_bounds = array<i64: 1, 32>}, {transform_indices = @transform_7, window_bounds = array<i64: 1, 8, 32>}, {pipeline_mode = #tpu.pipeline_mode<synchronous>, transform_indices = @transform_8, window_bounds = array<i64: 1, 32>}, {pipeline_mode = #tpu.pipeline_mode<synchronous>, transform_indices = @transform_9, window_bounds = array<i64: 1, 32>}, {transform_indices = @transform_10, window_bounds = array<i64: 1, 8, 32>}]} {
    %c0 = arith.constant 0 : index
    %c0_0 = arith.constant 0 : index
    %c0_1 = arith.constant 0 : index
    %0 = vector.load %arg4[%c0, %c0_0, %c0_1] : memref<1x8x1xf32, #tpu.memory_space<vmem>>, vector<1x8x1xf32>
    %1 = vector.shape_cast %0 : vector<1x8x1xf32> to vector<8x1xf32>
    %c0_2 = arith.constant 0 : index
    %c0_3 = arith.constant 0 : index
    %c0_4 = arith.constant 0 : index
    %2 = vector.load %arg5[%c0_2, %c0_3, %c0_4] : memref<1x1x8xf32, #tpu.memory_space<vmem>>, vector<1x1x8xf32>
    %3 = vector.shape_cast %2 : vector<1x1x8xf32> to vector<1x8xf32>
    %4 = vector.broadcast %1 : vector<8x1xf32> to vector<8x8xf32>
    %5 = vector.broadcast %3 : vector<1x8xf32> to vector<8x8xf32>
    %6 = arith.mulf %4, %5 : vector<8x8xf32>
    %7 = tpu.iota {dimensions = array<i32: 0>} : vector<8x8xi32>
    %8 = tpu.iota {dimensions = array<i32: 1>} : vector<8x8xi32>
    %9 = arith.cmpi sge, %7, %8 : vector<8x8xi32>
    %cst = arith.constant 0.000000e+00 : f32
    %10 = vector.broadcast %cst : f32 to vector<8x8xf32>
    %11 = arith.select %9, %6, %10 : vector<8x8xi1>, vector<8x8xf32>
    %c0_5 = arith.constant 0 : index
    %c0_6 = arith.constant 0 : index
    %c0_7 = arith.constant 0 : index
    %12 = vector.load %arg1[%c0_5, %c0_6, %c0_7] : memref<1x8x32xf32, #tpu.memory_space<vmem>>, vector<1x8x32xf32>
    %13 = vector.shape_cast %12 : vector<1x8x32xf32> to vector<8x32xf32>
    %14 = arith.truncf %13 : vector<8x32xf32> to vector<8x32xbf16>
    %c0_8 = arith.constant 0 : index
    %c0_9 = arith.constant 0 : index
    %c0_10 = arith.constant 0 : index
    %15 = vector.load %arg2[%c0_8, %c0_9, %c0_10] : memref<1x8x32xf32, #tpu.memory_space<vmem>>, vector<1x8x32xf32>
    %16 = vector.shape_cast %15 : vector<1x8x32xf32> to vector<8x32xf32>
    %17 = arith.truncf %16 : vector<8x32xf32> to vector<8x32xbf16>
    %c0_11 = arith.constant 0 : index
    %c0_12 = arith.constant 0 : index
    %c0_13 = arith.constant 0 : index
    %18 = vector.load %arg3[%c0_11, %c0_12, %c0_13] : memref<1x8x32xf32, #tpu.memory_space<vmem>>, vector<1x8x32xf32>
    %19 = vector.shape_cast %18 : vector<1x8x32xf32> to vector<8x32xf32>
    %20 = arith.truncf %19 : vector<8x32xf32> to vector<8x32xbf16>
    %21 = vector.extract_strided_slice %14 {offsets = [0, 0], sizes = [8, 16], strides = [1, 1]} : vector<8x32xbf16> to vector<8x16xbf16>
    %22 = vector.extract_strided_slice %17 {offsets = [0, 0], sizes = [8, 16], strides = [1, 1]} : vector<8x32xbf16> to vector<8x16xbf16>
    %23 = vector.extract_strided_slice %20 {offsets = [0, 0], sizes = [8, 16], strides = [1, 1]} : vector<8x32xbf16> to vector<8x16xbf16>
    %cst_14 = arith.constant dense<0.000000e+00> : vector<8x8xf32>
    %24 = tpu.matmul %21, %22, %cst_14 {dimension_numbers = #tpu.dot_dimension_numbers<[1], [1], [0], [0], [0, 0, 1, 0], [], []>} : vector<8x16xbf16>, vector<8x16xbf16>, vector<8x8xf32> -> vector<8x8xf32>
    %cst_15 = arith.constant 2.500000e-01 : f32
    %25 = vector.broadcast %cst_15 : f32 to vector<8x8xf32>
    %26 = arith.mulf %24, %25 : vector<8x8xf32>
    %cst_16 = arith.constant 0.000000e+00 : f32
    %27 = vector.broadcast %cst_16 : f32 to vector<8x8xf32>
    %28 = arith.cmpf ogt, %11, %27 : vector<8x8xf32>
    %cst_17 = arith.constant -1.000000e+09 : f32
    %29 = vector.broadcast %cst_17 : f32 to vector<8x8xf32>
    %30 = arith.select %28, %26, %29 : vector<8x8xi1>, vector<8x8xf32>
    %cst_18 = arith.constant dense<0xFF800000> : vector<8xf32>
    %31 = vector.multi_reduction <maximumf>, %30, %cst_18 [1] : vector<8x8xf32> to vector<8xf32>
    %32 = vector.shape_cast %31 : vector<8xf32> to vector<8x1xf32>
    %33 = vector.broadcast %32 : vector<8x1xf32> to vector<8x8xf32>
    %34 = arith.subf %30, %33 : vector<8x8xf32>
    %35 = math.exp %34 : vector<8x8xf32>
    %cst_19 = arith.constant dense<0.000000e+00> : vector<8xf32>
    %36 = vector.multi_reduction <add>, %35, %cst_19 [1] : vector<8x8xf32> to vector<8xf32>
    %37 = vector.shape_cast %36 : vector<8xf32> to vector<8x1xf32>
    %38 = arith.truncf %35 : vector<8x8xf32> to vector<8x8xbf16>
    %cst_20 = arith.constant dense<0.000000e+00> : vector<8x16xf32>
    %39 = tpu.matmul %38, %23, %cst_20 {dimension_numbers = #tpu.dot_dimension_numbers<[1], [0], [0], [1], [0, 0, 1, 1], [], []>} : vector<8x8xbf16>, vector<8x16xbf16>, vector<8x16xf32> -> vector<8x16xf32>
    %40 = tpu.reciprocal %37 {approx = true} : vector<8x1xf32> -> vector<8x1xf32>
    %41 = vector.broadcast %40 : vector<8x1xf32> to vector<8x16xf32>
    %42 = arith.mulf %39, %41 : vector<8x16xf32>
    %43 = vector.extract_strided_slice %14 {offsets = [0, 16], sizes = [8, 16], strides = [1, 1]} : vector<8x32xbf16> to vector<8x16xbf16>
    %44 = vector.extract_strided_slice %17 {offsets = [0, 16], sizes = [8, 16], strides = [1, 1]} : vector<8x32xbf16> to vector<8x16xbf16>
    %45 = vector.extract_strided_slice %20 {offsets = [0, 16], sizes = [8, 16], strides = [1, 1]} : vector<8x32xbf16> to vector<8x16xbf16>
    %cst_21 = arith.constant dense<0.000000e+00> : vector<8x8xf32>
    %46 = tpu.matmul %43, %44, %cst_21 {dimension_numbers = #tpu.dot_dimension_numbers<[1], [1], [0], [0], [0, 0, 1, 0], [], []>} : vector<8x16xbf16>, vector<8x16xbf16>, vector<8x8xf32> -> vector<8x8xf32>
    %cst_22 = arith.constant 2.500000e-01 : f32
    %47 = vector.broadcast %cst_22 : f32 to vector<8x8xf32>
    %48 = arith.mulf %46, %47 : vector<8x8xf32>
    %cst_23 = arith.constant 0.000000e+00 : f32
    %49 = vector.broadcast %cst_23 : f32 to vector<8x8xf32>
    %50 = arith.cmpf ogt, %11, %49 : vector<8x8xf32>
    %cst_24 = arith.constant -1.000000e+09 : f32
    %51 = vector.broadcast %cst_24 : f32 to vector<8x8xf32>
    %52 = arith.select %50, %48, %51 : vector<8x8xi1>, vector<8x8xf32>
    %cst_25 = arith.constant dense<0xFF800000> : vector<8xf32>
    %53 = vector.multi_reduction <maximumf>, %52, %cst_25 [1] : vector<8x8xf32> to vector<8xf32>
    %54 = vector.shape_cast %53 : vector<8xf32> to vector<8x1xf32>
    %55 = vector.broadcast %54 : vector<8x1xf32> to vector<8x8xf32>
    %56 = arith.subf %52, %55 : vector<8x8xf32>
    %57 = math.exp %56 : vector<8x8xf32>
    %cst_26 = arith.constant dense<0.000000e+00> : vector<8xf32>
    %58 = vector.multi_reduction <add>, %57, %cst_26 [1] : vector<8x8xf32> to vector<8xf32>
    %59 = vector.shape_cast %58 : vector<8xf32> to vector<8x1xf32>
    %60 = arith.truncf %57 : vector<8x8xf32> to vector<8x8xbf16>
    %cst_27 = arith.constant dense<0.000000e+00> : vector<8x16xf32>
    %61 = tpu.matmul %60, %45, %cst_27 {dimension_numbers = #tpu.dot_dimension_numbers<[1], [0], [0], [1], [0, 0, 1, 1], [], []>} : vector<8x8xbf16>, vector<8x16xbf16>, vector<8x16xf32> -> vector<8x16xf32>
    %62 = tpu.reciprocal %59 {approx = true} : vector<8x1xf32> -> vector<8x1xf32>
    %63 = vector.broadcast %62 : vector<8x1xf32> to vector<8x16xf32>
    %64 = arith.mulf %61, %63 : vector<8x16xf32>
    %65 = tpu.concatenate %42, %64 in 1 : vector<8x16xf32>, vector<8x16xf32> -> vector<8x32xf32>
    %66 = arith.truncf %65 : vector<8x32xf32> to vector<8x32xbf16>
    %c0_28 = arith.constant 0 : index
    %c0_29 = arith.constant 0 : index
    %67 = vector.load %arg6[%c0_28, %c0_29] : memref<32x32xbf16, #tpu.memory_space<vmem>>, vector<32x32xbf16>
    %cst_30 = arith.constant dense<0.000000e+00> : vector<8x32xf32>
    %68 = tpu.matmul %66, %67, %cst_30 {dimension_numbers = #tpu.dot_dimension_numbers<[1], [0], [0], [1], [0, 0, 1, 1], [], []>} : vector<8x32xbf16>, vector<32x32xbf16>, vector<8x32xf32> -> vector<8x32xf32>
    %c0_31 = arith.constant 0 : index
    %c0_32 = arith.constant 0 : index
    %69 = vector.load %arg7[%c0_31, %c0_32] : memref<1x32xf32, #tpu.memory_space<vmem>>, vector<1x32xf32>
    %70 = vector.broadcast %69 : vector<1x32xf32> to vector<8x32xf32>
    %71 = arith.addf %68, %70 : vector<8x32xf32>
    %c0_33 = arith.constant 0 : index
    %c0_34 = arith.constant 0 : index
    %c0_35 = arith.constant 0 : index
    %72 = vector.load %arg8[%c0_33, %c0_34, %c0_35] : memref<1x8x32xf32, #tpu.memory_space<vmem>>, vector<1x8x32xf32>
    %73 = vector.shape_cast %72 : vector<1x8x32xf32> to vector<8x32xf32>
    %74 = arith.addf %73, %71 : vector<8x32xf32>
    %cst_36 = arith.constant dense<0.000000e+00> : vector<8xf32>
    %75 = vector.multi_reduction <add>, %74, %cst_36 [1] : vector<8x32xf32> to vector<8xf32>
    %76 = vector.shape_cast %75 : vector<8xf32> to vector<8x1xf32>
    %cst_37 = arith.constant 3.200000e+01 : f32
    %77 = vector.broadcast %cst_37 : f32 to vector<8x1xf32>
    %78 = arith.divf %76, %77 : vector<8x1xf32>
    %79 = vector.broadcast %78 : vector<8x1xf32> to vector<8x32xf32>
    %80 = arith.subf %74, %79 : vector<8x32xf32>
    %81 = arith.mulf %80, %80 : vector<8x32xf32>
    %cst_38 = arith.constant dense<0.000000e+00> : vector<8xf32>
    %82 = vector.multi_reduction <add>, %81, %cst_38 [1] : vector<8x32xf32> to vector<8xf32>
    %83 = vector.shape_cast %82 : vector<8xf32> to vector<8x1xf32>
    %cst_39 = arith.constant 3.200000e+01 : f32
    %84 = vector.broadcast %cst_39 : f32 to vector<8x1xf32>
    %85 = arith.divf %83, %84 : vector<8x1xf32>
    %cst_40 = arith.constant 9.99999974E-6 : f32
    %86 = vector.broadcast %cst_40 : f32 to vector<8x1xf32>
    %87 = arith.addf %85, %86 : vector<8x1xf32>
    %88 = math.rsqrt %87 : vector<8x1xf32>
    %89 = vector.broadcast %88 : vector<8x1xf32> to vector<8x32xf32>
    %90 = arith.mulf %80, %89 : vector<8x32xf32>
    %c0_41 = arith.constant 0 : index
    %c0_42 = arith.constant 0 : index
    %91 = vector.load %arg9[%c0_41, %c0_42] : memref<1x32xf32, #tpu.memory_space<vmem>>, vector<1x32xf32>
    %92 = vector.broadcast %91 : vector<1x32xf32> to vector<8x32xf32>
    %93 = arith.mulf %90, %92 : vector<8x32xf32>
    %c0_43 = arith.constant 0 : index
    %c0_44 = arith.constant 0 : index
    %94 = vector.load %arg10[%c0_43, %c0_44] : memref<1x32xf32, #tpu.memory_space<vmem>>, vector<1x32xf32>
    %95 = vector.broadcast %94 : vector<1x32xf32> to vector<8x32xf32>
    %96 = arith.addf %93, %95 : vector<8x32xf32>
    %c0_45 = arith.constant 0 : index
    %c0_46 = arith.constant 0 : index
    %c0_47 = arith.constant 0 : index
    %97 = vector.load %arg11[%c0_45, %c0_46, %c0_47] : memref<1x8x32xf32, #tpu.memory_space<vmem>>, vector<1x8x32xf32>
    %98 = vector.shape_cast %97 : vector<1x8x32xf32> to vector<8x32xf32>
    %99 = vector.shape_cast %96 : vector<8x32xf32> to vector<1x8x32xf32>
    tpu.vector_store %arg11[%c0_45, %c0_46, %c0_47], %99 {strides = array<i32>} : memref<1x8x32xf32, #tpu.memory_space<vmem>>, vector<1x8x32xf32>,
    return
  }
  func.func @transform_0(%arg0: i32) -> (i32, i32, i32) {
    %c0_i32 = arith.constant 0 : i32
    %c0_i32_0 = arith.constant 0 : i32
    %c0_i32_1 = arith.constant 0 : i32
    return %arg0, %c0_i32, %c0_i32_0 : i32, i32, i32
  }
  func.func @transform_1(%arg0: i32) -> (i32, i32, i32) {
    %c0_i32 = arith.constant 0 : i32
    %c0_i32_0 = arith.constant 0 : i32
    %c0_i32_1 = arith.constant 0 : i32
    return %arg0, %c0_i32, %c0_i32_0 : i32, i32, i32
  }
  func.func @transform_2(%arg0: i32) -> (i32, i32, i32) {
    %c0_i32 = arith.constant 0 : i32
    %c0_i32_0 = arith.constant 0 : i32
    %c0_i32_1 = arith.constant 0 : i32
    return %arg0, %c0_i32, %c0_i32_0 : i32, i32, i32
  }
  func.func @transform_3(%arg0: i32) -> (i32, i32, i32) {
    %c0_i32 = arith.constant 0 : i32
    %c0_i32_0 = arith.constant 0 : i32
    %c0_i32_1 = arith.constant 0 : i32
    return %arg0, %c0_i32, %c0_i32_0 : i32, i32, i32
  }
  func.func @transform_4(%arg0: i32) -> (i32, i32, i32) {
    %c0_i32 = arith.constant 0 : i32
    %c0_i32_0 = arith.constant 0 : i32
    %c0_i32_1 = arith.constant 0 : i32
    return %arg0, %c0_i32, %c0_i32_0 : i32, i32, i32
  }
  func.func @transform_5(%arg0: i32) -> (i32, i32) {
    %c0_i32 = arith.constant 0 : i32
    %c0_i32_0 = arith.constant 0 : i32
    %c0_i32_1 = arith.constant 0 : i32
    return %c0_i32, %c0_i32_0 : i32, i32
  }
  func.func @transform_6(%arg0: i32) -> (i32, i32) {
    %c0_i32 = arith.constant 0 : i32
    %c0_i32_0 = arith.constant 0 : i32
    %c0_i32_1 = arith.constant 0 : i32
    return %c0_i32, %c0_i32_0 : i32, i32
  }
  func.func @transform_7(%arg0: i32) -> (i32, i32, i32) {
    %c0_i32 = arith.constant 0 : i32
    %c0_i32_0 = arith.constant 0 : i32
    %c0_i32_1 = arith.constant 0 : i32
    return %arg0, %c0_i32, %c0_i32_0 : i32, i32, i32
  }
  func.func @transform_8(%arg0: i32) -> (i32, i32) {
    %c0_i32 = arith.constant 0 : i32
    %c0_i32_0 = arith.constant 0 : i32
    %c0_i32_1 = arith.constant 0 : i32
    return %c0_i32, %c0_i32_0 : i32, i32
  }
  func.func @transform_9(%arg0: i32) -> (i32, i32) {
    %c0_i32 = arith.constant 0 : i32
    %c0_i32_0 = arith.constant 0 : i32
    %c0_i32_1 = arith.constant 0 : i32
    return %c0_i32, %c0_i32_0 : i32, i32
  }
  func.func @transform_10(%arg0: i32) -> (i32, i32, i32) {
    %c0_i32 = arith.constant 0 : i32
    %c0_i32_0 = arith.constant 0 : i32
    %c0_i32_1 = arith.constant 0 : i32
    return %arg0, %c0_i32, %c0_i32_0 : i32, i32, i32
  }
}

module attributes {stable_mosaic.version = 11 : i64} {
  func.func @_linear_kernel(%arg0: i32, %arg1: i32, %arg2: memref<8x32xf32, #tpu.memory_space<vmem>>, %arg3: memref<32x32xbf16, #tpu.memory_space<vmem>>, %arg4: memref<1x32xf32, #tpu.memory_space<vmem>>, %arg5: memref<8x32xf32, #tpu.memory_space<vmem>>) attributes {dimension_semantics = [#tpu.dimension_semantics<parallel>, #tpu.dimension_semantics<parallel>], iteration_bounds = array<i64: 2, 1>, scalar_prefetch = 0 : i64, scratch_operands = 0 : i64, tpu.core_type = #tpu.core_type<tc>, window_params = [{transform_indices = @transform_0, window_bounds = array<i64: 8, 32>}, {transform_indices = @transform_1, window_bounds = array<i64: 32, 32>}, {transform_indices = @transform_2, window_bounds = array<i64: 1, 32>}, {transform_indices = @transform_3, window_bounds = array<i64: 8, 32>}]} {
    %c0 = arith.constant 0 : index
    %c0_0 = arith.constant 0 : index
    %0 = vector.load %arg2[%c0, %c0_0] : memref<8x32xf32, #tpu.memory_space<vmem>>, vector<8x32xf32>
    %1 = arith.truncf %0 : vector<8x32xf32> to vector<8x32xbf16>
    %c0_1 = arith.constant 0 : index
    %c0_2 = arith.constant 0 : index
    %2 = vector.load %arg3[%c0_1, %c0_2] : memref<32x32xbf16, #tpu.memory_space<vmem>>, vector<32x32xbf16>
    %cst = arith.constant dense<0.000000e+00> : vector<8x32xf32>
    %3 = tpu.matmul %1, %2, %cst {dimension_numbers = #tpu.dot_dimension_numbers<[1], [0], [0], [1], [0, 0, 1, 1], [], []>} : vector<8x32xbf16>, vector<32x32xbf16>, vector<8x32xf32> -> vector<8x32xf32>
    %c0_3 = arith.constant 0 : index
    %c0_4 = arith.constant 0 : index
    %4 = vector.load %arg4[%c0_3, %c0_4] : memref<1x32xf32, #tpu.memory_space<vmem>>, vector<1x32xf32>
    %5 = vector.broadcast %4 : vector<1x32xf32> to vector<8x32xf32>
    %6 = arith.addf %3, %5 : vector<8x32xf32>
    %c0_5 = arith.constant 0 : index
    %c0_6 = arith.constant 0 : index
    %7 = vector.load %arg5[%c0_5, %c0_6] : memref<8x32xf32, #tpu.memory_space<vmem>>, vector<8x32xf32>
    tpu.vector_store %arg5[%c0_5, %c0_6], %6 {strides = array<i32>} : memref<8x32xf32, #tpu.memory_space<vmem>>, vector<8x32xf32>,
    return
  }
  func.func @transform_0(%arg0: i32, %arg1: i32) -> (i32, i32) {
    %c0_i32 = arith.constant 0 : i32
    %c0_i32_0 = arith.constant 0 : i32
    return %arg0, %c0_i32 : i32, i32
  }
  func.func @transform_1(%arg0: i32, %arg1: i32) -> (i32, i32) {
    %c0_i32 = arith.constant 0 : i32
    %c0_i32_0 = arith.constant 0 : i32
    return %c0_i32, %arg1 : i32, i32
  }
  func.func @transform_2(%arg0: i32, %arg1: i32) -> (i32, i32) {
    %c0_i32 = arith.constant 0 : i32
    %c0_i32_0 = arith.constant 0 : i32
    return %c0_i32, %arg1 : i32, i32
  }
  func.func @transform_3(%arg0: i32, %arg1: i32) -> (i32, i32) {
    %c0_i32 = arith.constant 0 : i32
    return %arg0, %arg1 : i32, i32
  }
}

module attributes {stable_mosaic.version = 11 : i64} {
  func.func @_ffn_ln_kernel(%arg0: i32, %arg1: memref<8x32xf32, #tpu.memory_space<vmem>>, %arg2: memref<32x64xbf16, #tpu.memory_space<vmem>>, %arg3: memref<1x64xf32, #tpu.memory_space<vmem>>, %arg4: memref<64x32xbf16, #tpu.memory_space<vmem>>, %arg5: memref<1x32xf32, #tpu.memory_space<vmem>>, %arg6: memref<1x32xf32, #tpu.memory_space<vmem>>, %arg7: memref<1x32xf32, #tpu.memory_space<vmem>>, %arg8: memref<8x32xf32, #tpu.memory_space<vmem>>) attributes {dimension_semantics = [#tpu.dimension_semantics<parallel>], iteration_bounds = array<i64: 2>, scalar_prefetch = 0 : i64, scratch_operands = 0 : i64, tpu.core_type = #tpu.core_type<tc>, window_params = [{transform_indices = @transform_0, window_bounds = array<i64: 8, 32>}, {pipeline_mode = #tpu.pipeline_mode<synchronous>, transform_indices = @transform_1, window_bounds = array<i64: 32, 64>}, {pipeline_mode = #tpu.pipeline_mode<synchronous>, transform_indices = @transform_2, window_bounds = array<i64: 1, 64>}, {pipeline_mode = #tpu.pipeline_mode<synchronous>, transform_indices = @transform_3, window_bounds = array<i64: 64, 32>}, {pipeline_mode = #tpu.pipeline_mode<synchronous>, transform_indices = @transform_4, window_bounds = array<i64: 1, 32>}, {pipeline_mode = #tpu.pipeline_mode<synchronous>, transform_indices = @transform_5, window_bounds = array<i64: 1, 32>}, {pipeline_mode = #tpu.pipeline_mode<synchronous>, transform_indices = @transform_6, window_bounds = array<i64: 1, 32>}, {transform_indices = @transform_7, window_bounds = array<i64: 8, 32>}]} {
    %c0 = arith.constant 0 : index
    %c0_0 = arith.constant 0 : index
    %0 = vector.load %arg1[%c0, %c0_0] : memref<8x32xf32, #tpu.memory_space<vmem>>, vector<8x32xf32>
    %1 = arith.truncf %0 : vector<8x32xf32> to vector<8x32xbf16>
    %c0_1 = arith.constant 0 : index
    %c0_2 = arith.constant 0 : index
    %2 = vector.load %arg2[%c0_1, %c0_2] : memref<32x64xbf16, #tpu.memory_space<vmem>>, vector<32x64xbf16>
    %cst = arith.constant dense<0.000000e+00> : vector<8x64xf32>
    %3 = tpu.matmul %1, %2, %cst {dimension_numbers = #tpu.dot_dimension_numbers<[1], [0], [0], [1], [0, 0, 1, 1], [], []>} : vector<8x32xbf16>, vector<32x64xbf16>, vector<8x64xf32> -> vector<8x64xf32>
    %c0_3 = arith.constant 0 : index
    %c0_4 = arith.constant 0 : index
    %4 = vector.load %arg3[%c0_3, %c0_4] : memref<1x64xf32, #tpu.memory_space<vmem>>, vector<1x64xf32>
    %5 = vector.broadcast %4 : vector<1x64xf32> to vector<8x64xf32>
    %6 = arith.addf %3, %5 : vector<8x64xf32>
    %cst_5 = arith.constant 0.000000e+00 : f32
    %7 = vector.broadcast %cst_5 : f32 to vector<8x64xf32>
    %8 = arith.maximumf %6, %7 : vector<8x64xf32>
    %9 = arith.truncf %8 : vector<8x64xf32> to vector<8x64xbf16>
    %c0_6 = arith.constant 0 : index
    %c0_7 = arith.constant 0 : index
    %10 = vector.load %arg4[%c0_6, %c0_7] : memref<64x32xbf16, #tpu.memory_space<vmem>>, vector<64x32xbf16>
    %cst_8 = arith.constant dense<0.000000e+00> : vector<8x32xf32>
    %11 = tpu.matmul %9, %10, %cst_8 {dimension_numbers = #tpu.dot_dimension_numbers<[1], [0], [0], [1], [0, 0, 1, 1], [], []>} : vector<8x64xbf16>, vector<64x32xbf16>, vector<8x32xf32> -> vector<8x32xf32>
    %c0_9 = arith.constant 0 : index
    %c0_10 = arith.constant 0 : index
    %12 = vector.load %arg5[%c0_9, %c0_10] : memref<1x32xf32, #tpu.memory_space<vmem>>, vector<1x32xf32>
    %13 = vector.broadcast %12 : vector<1x32xf32> to vector<8x32xf32>
    %14 = arith.addf %11, %13 : vector<8x32xf32>
    %15 = arith.addf %0, %14 : vector<8x32xf32>
    %cst_11 = arith.constant dense<0.000000e+00> : vector<8xf32>
    %16 = vector.multi_reduction <add>, %15, %cst_11 [1] : vector<8x32xf32> to vector<8xf32>
    %17 = vector.shape_cast %16 : vector<8xf32> to vector<8x1xf32>
    %cst_12 = arith.constant 3.200000e+01 : f32
    %18 = vector.broadcast %cst_12 : f32 to vector<8x1xf32>
    %19 = arith.divf %17, %18 : vector<8x1xf32>
    %20 = vector.broadcast %19 : vector<8x1xf32> to vector<8x32xf32>
    %21 = arith.subf %15, %20 : vector<8x32xf32>
    %22 = arith.mulf %21, %21 : vector<8x32xf32>
    %cst_13 = arith.constant dense<0.000000e+00> : vector<8xf32>
    %23 = vector.multi_reduction <add>, %22, %cst_13 [1] : vector<8x32xf32> to vector<8xf32>
    %24 = vector.shape_cast %23 : vector<8xf32> to vector<8x1xf32>
    %cst_14 = arith.constant 3.200000e+01 : f32
    %25 = vector.broadcast %cst_14 : f32 to vector<8x1xf32>
    %26 = arith.divf %24, %25 : vector<8x1xf32>
    %cst_15 = arith.constant 9.99999974E-6 : f32
    %27 = vector.broadcast %cst_15 : f32 to vector<8x1xf32>
    %28 = arith.addf %26, %27 : vector<8x1xf32>
    %29 = math.rsqrt %28 : vector<8x1xf32>
    %30 = vector.broadcast %29 : vector<8x1xf32> to vector<8x32xf32>
    %31 = arith.mulf %21, %30 : vector<8x32xf32>
    %c0_16 = arith.constant 0 : index
    %c0_17 = arith.constant 0 : index
    %32 = vector.load %arg6[%c0_16, %c0_17] : memref<1x32xf32, #tpu.memory_space<vmem>>, vector<1x32xf32>
    %33 = vector.broadcast %32 : vector<1x32xf32> to vector<8x32xf32>
    %34 = arith.mulf %31, %33 : vector<8x32xf32>
    %c0_18 = arith.constant 0 : index
    %c0_19 = arith.constant 0 : index
    %35 = vector.load %arg7[%c0_18, %c0_19] : memref<1x32xf32, #tpu.memory_space<vmem>>, vector<1x32xf32>
    %36 = vector.broadcast %35 : vector<1x32xf32> to vector<8x32xf32>
    %37 = arith.addf %34, %36 : vector<8x32xf32>
    %c0_20 = arith.constant 0 : index
    %c0_21 = arith.constant 0 : index
    %38 = vector.load %arg8[%c0_20, %c0_21] : memref<8x32xf32, #tpu.memory_space<vmem>>, vector<8x32xf32>
    tpu.vector_store %arg8[%c0_20, %c0_21], %37 {strides = array<i32>} : memref<8x32xf32, #tpu.memory_space<vmem>>, vector<8x32xf32>,
    return
  }
  func.func @transform_0(%arg0: i32) -> (i32, i32) {
    %c0_i32 = arith.constant 0 : i32
    %c0_i32_0 = arith.constant 0 : i32
    return %arg0, %c0_i32 : i32, i32
  }
  func.func @transform_1(%arg0: i32) -> (i32, i32) {
    %c0_i32 = arith.constant 0 : i32
    %c0_i32_0 = arith.constant 0 : i32
    %c0_i32_1 = arith.constant 0 : i32
    return %c0_i32, %c0_i32_0 : i32, i32
  }
  func.func @transform_2(%arg0: i32) -> (i32, i32) {
    %c0_i32 = arith.constant 0 : i32
    %c0_i32_0 = arith.constant 0 : i32
    %c0_i32_1 = arith.constant 0 : i32
    return %c0_i32, %c0_i32_0 : i32, i32
  }
  func.func @transform_3(%arg0: i32) -> (i32, i32) {
    %c0_i32 = arith.constant 0 : i32
    %c0_i32_0 = arith.constant 0 : i32
    %c0_i32_1 = arith.constant 0 : i32
    return %c0_i32, %c0_i32_0 : i32, i32
  }
  func.func @transform_4(%arg0: i32) -> (i32, i32) {
    %c0_i32 = arith.constant 0 : i32
    %c0_i32_0 = arith.constant 0 : i32
    %c0_i32_1 = arith.constant 0 : i32
    return %c0_i32, %c0_i32_0 : i32, i32
  }
  func.func @transform_5(%arg0: i32) -> (i32, i32) {
    %c0_i32 = arith.constant 0 : i32
    %c0_i32_0 = arith.constant 0 : i32
    %c0_i32_1 = arith.constant 0 : i32
    return %c0_i32, %c0_i32_0 : i32, i32
  }
  func.func @transform_6(%arg0: i32) -> (i32, i32) {
    %c0_i32 = arith.constant 0 : i32
    %c0_i32_0 = arith.constant 0 : i32
    %c0_i32_1 = arith.constant 0 : i32
    return %c0_i32, %c0_i32_0 : i32, i32
  }
  func.func @transform_7(%arg0: i32) -> (i32, i32) {
    %c0_i32 = arith.constant 0 : i32
    %c0_i32_0 = arith.constant 0 : i32
    return %arg0, %c0_i32 : i32, i32
  }
}

module attributes {stable_mosaic.version = 11 : i64} {
  func.func @_mha_core_kernel(%arg0: i32, %arg1: memref<1x8x32xf32, #tpu.memory_space<vmem>>, %arg2: memref<1x8x32xf32, #tpu.memory_space<vmem>>, %arg3: memref<1x8x32xf32, #tpu.memory_space<vmem>>, %arg4: memref<1x8x1xf32, #tpu.memory_space<vmem>>, %arg5: memref<1x1x8xf32, #tpu.memory_space<vmem>>, %arg6: memref<32x32xbf16, #tpu.memory_space<vmem>>, %arg7: memref<1x32xf32, #tpu.memory_space<vmem>>, %arg8: memref<1x8x32xf32, #tpu.memory_space<vmem>>, %arg9: memref<1x32xf32, #tpu.memory_space<vmem>>, %arg10: memref<1x32xf32, #tpu.memory_space<vmem>>, %arg11: memref<1x8x32xf32, #tpu.memory_space<vmem>>) attributes {dimension_semantics = [#tpu.dimension_semantics<parallel>], iteration_bounds = array<i64: 2>, scalar_prefetch = 0 : i64, scratch_operands = 0 : i64, tpu.core_type = #tpu.core_type<tc>, window_params = [{transform_indices = @transform_0, window_bounds = array<i64: 1, 8, 32>}, {transform_indices = @transform_1, window_bounds = array<i64: 1, 8, 32>}, {transform_indices = @transform_2, window_bounds = array<i64: 1, 8, 32>}, {transform_indices = @transform_3, window_bounds = array<i64: 1, 8, 1>}, {transform_indices = @transform_4, window_bounds = array<i64: 1, 1, 8>}, {pipeline_mode = #tpu.pipeline_mode<synchronous>, transform_indices = @transform_5, window_bounds = array<i64: 32, 32>}, {pipeline_mode = #tpu.pipeline_mode<synchronous>, transform_indices = @transform_6, window_bounds = array<i64: 1, 32>}, {transform_indices = @transform_7, window_bounds = array<i64: 1, 8, 32>}, {pipeline_mode = #tpu.pipeline_mode<synchronous>, transform_indices = @transform_8, window_bounds = array<i64: 1, 32>}, {pipeline_mode = #tpu.pipeline_mode<synchronous>, transform_indices = @transform_9, window_bounds = array<i64: 1, 32>}, {transform_indices = @transform_10, window_bounds = array<i64: 1, 8, 32>}]} {
    %c0 = arith.constant 0 : index
    %c0_0 = arith.constant 0 : index
    %c0_1 = arith.constant 0 : index
    %0 = vector.load %arg4[%c0, %c0_0, %c0_1] : memref<1x8x1xf32, #tpu.memory_space<vmem>>, vector<1x8x1xf32>
    %1 = vector.shape_cast %0 : vector<1x8x1xf32> to vector<8x1xf32>
    %c0_2 = arith.constant 0 : index
    %c0_3 = arith.constant 0 : index
    %c0_4 = arith.constant 0 : index
    %2 = vector.load %arg5[%c0_2, %c0_3, %c0_4] : memref<1x1x8xf32, #tpu.memory_space<vmem>>, vector<1x1x8xf32>
    %3 = vector.shape_cast %2 : vector<1x1x8xf32> to vector<1x8xf32>
    %4 = vector.broadcast %1 : vector<8x1xf32> to vector<8x8xf32>
    %5 = vector.broadcast %3 : vector<1x8xf32> to vector<8x8xf32>
    %6 = arith.mulf %4, %5 : vector<8x8xf32>
    %c0_5 = arith.constant 0 : index
    %c0_6 = arith.constant 0 : index
    %c0_7 = arith.constant 0 : index
    %7 = vector.load %arg1[%c0_5, %c0_6, %c0_7] : memref<1x8x32xf32, #tpu.memory_space<vmem>>, vector<1x8x32xf32>
    %8 = vector.shape_cast %7 : vector<1x8x32xf32> to vector<8x32xf32>
    %9 = arith.truncf %8 : vector<8x32xf32> to vector<8x32xbf16>
    %c0_8 = arith.constant 0 : index
    %c0_9 = arith.constant 0 : index
    %c0_10 = arith.constant 0 : index
    %10 = vector.load %arg2[%c0_8, %c0_9, %c0_10] : memref<1x8x32xf32, #tpu.memory_space<vmem>>, vector<1x8x32xf32>
    %11 = vector.shape_cast %10 : vector<1x8x32xf32> to vector<8x32xf32>
    %12 = arith.truncf %11 : vector<8x32xf32> to vector<8x32xbf16>
    %c0_11 = arith.constant 0 : index
    %c0_12 = arith.constant 0 : index
    %c0_13 = arith.constant 0 : index
    %13 = vector.load %arg3[%c0_11, %c0_12, %c0_13] : memref<1x8x32xf32, #tpu.memory_space<vmem>>, vector<1x8x32xf32>
    %14 = vector.shape_cast %13 : vector<1x8x32xf32> to vector<8x32xf32>
    %15 = arith.truncf %14 : vector<8x32xf32> to vector<8x32xbf16>
    %16 = vector.extract_strided_slice %9 {offsets = [0, 0], sizes = [8, 16], strides = [1, 1]} : vector<8x32xbf16> to vector<8x16xbf16>
    %17 = vector.extract_strided_slice %12 {offsets = [0, 0], sizes = [8, 16], strides = [1, 1]} : vector<8x32xbf16> to vector<8x16xbf16>
    %18 = vector.extract_strided_slice %15 {offsets = [0, 0], sizes = [8, 16], strides = [1, 1]} : vector<8x32xbf16> to vector<8x16xbf16>
    %cst = arith.constant dense<0.000000e+00> : vector<8x8xf32>
    %19 = tpu.matmul %16, %17, %cst {dimension_numbers = #tpu.dot_dimension_numbers<[1], [1], [0], [0], [0, 0, 1, 0], [], []>} : vector<8x16xbf16>, vector<8x16xbf16>, vector<8x8xf32> -> vector<8x8xf32>
    %cst_14 = arith.constant 2.500000e-01 : f32
    %20 = vector.broadcast %cst_14 : f32 to vector<8x8xf32>
    %21 = arith.mulf %19, %20 : vector<8x8xf32>
    %cst_15 = arith.constant 0.000000e+00 : f32
    %22 = vector.broadcast %cst_15 : f32 to vector<8x8xf32>
    %23 = arith.cmpf ogt, %6, %22 : vector<8x8xf32>
    %cst_16 = arith.constant -1.000000e+09 : f32
    %24 = vector.broadcast %cst_16 : f32 to vector<8x8xf32>
    %25 = arith.select %23, %21, %24 : vector<8x8xi1>, vector<8x8xf32>
    %cst_17 = arith.constant dense<0xFF800000> : vector<8xf32>
    %26 = vector.multi_reduction <maximumf>, %25, %cst_17 [1] : vector<8x8xf32> to vector<8xf32>
    %27 = vector.shape_cast %26 : vector<8xf32> to vector<8x1xf32>
    %28 = vector.broadcast %27 : vector<8x1xf32> to vector<8x8xf32>
    %29 = arith.subf %25, %28 : vector<8x8xf32>
    %30 = math.exp %29 : vector<8x8xf32>
    %cst_18 = arith.constant dense<0.000000e+00> : vector<8xf32>
    %31 = vector.multi_reduction <add>, %30, %cst_18 [1] : vector<8x8xf32> to vector<8xf32>
    %32 = vector.shape_cast %31 : vector<8xf32> to vector<8x1xf32>
    %33 = arith.truncf %30 : vector<8x8xf32> to vector<8x8xbf16>
    %cst_19 = arith.constant dense<0.000000e+00> : vector<8x16xf32>
    %34 = tpu.matmul %33, %18, %cst_19 {dimension_numbers = #tpu.dot_dimension_numbers<[1], [0], [0], [1], [0, 0, 1, 1], [], []>} : vector<8x8xbf16>, vector<8x16xbf16>, vector<8x16xf32> -> vector<8x16xf32>
    %35 = tpu.reciprocal %32 {approx = true} : vector<8x1xf32> -> vector<8x1xf32>
    %36 = vector.broadcast %35 : vector<8x1xf32> to vector<8x16xf32>
    %37 = arith.mulf %34, %36 : vector<8x16xf32>
    %38 = vector.extract_strided_slice %9 {offsets = [0, 16], sizes = [8, 16], strides = [1, 1]} : vector<8x32xbf16> to vector<8x16xbf16>
    %39 = vector.extract_strided_slice %12 {offsets = [0, 16], sizes = [8, 16], strides = [1, 1]} : vector<8x32xbf16> to vector<8x16xbf16>
    %40 = vector.extract_strided_slice %15 {offsets = [0, 16], sizes = [8, 16], strides = [1, 1]} : vector<8x32xbf16> to vector<8x16xbf16>
    %cst_20 = arith.constant dense<0.000000e+00> : vector<8x8xf32>
    %41 = tpu.matmul %38, %39, %cst_20 {dimension_numbers = #tpu.dot_dimension_numbers<[1], [1], [0], [0], [0, 0, 1, 0], [], []>} : vector<8x16xbf16>, vector<8x16xbf16>, vector<8x8xf32> -> vector<8x8xf32>
    %cst_21 = arith.constant 2.500000e-01 : f32
    %42 = vector.broadcast %cst_21 : f32 to vector<8x8xf32>
    %43 = arith.mulf %41, %42 : vector<8x8xf32>
    %cst_22 = arith.constant 0.000000e+00 : f32
    %44 = vector.broadcast %cst_22 : f32 to vector<8x8xf32>
    %45 = arith.cmpf ogt, %6, %44 : vector<8x8xf32>
    %cst_23 = arith.constant -1.000000e+09 : f32
    %46 = vector.broadcast %cst_23 : f32 to vector<8x8xf32>
    %47 = arith.select %45, %43, %46 : vector<8x8xi1>, vector<8x8xf32>
    %cst_24 = arith.constant dense<0xFF800000> : vector<8xf32>
    %48 = vector.multi_reduction <maximumf>, %47, %cst_24 [1] : vector<8x8xf32> to vector<8xf32>
    %49 = vector.shape_cast %48 : vector<8xf32> to vector<8x1xf32>
    %50 = vector.broadcast %49 : vector<8x1xf32> to vector<8x8xf32>
    %51 = arith.subf %47, %50 : vector<8x8xf32>
    %52 = math.exp %51 : vector<8x8xf32>
    %cst_25 = arith.constant dense<0.000000e+00> : vector<8xf32>
    %53 = vector.multi_reduction <add>, %52, %cst_25 [1] : vector<8x8xf32> to vector<8xf32>
    %54 = vector.shape_cast %53 : vector<8xf32> to vector<8x1xf32>
    %55 = arith.truncf %52 : vector<8x8xf32> to vector<8x8xbf16>
    %cst_26 = arith.constant dense<0.000000e+00> : vector<8x16xf32>
    %56 = tpu.matmul %55, %40, %cst_26 {dimension_numbers = #tpu.dot_dimension_numbers<[1], [0], [0], [1], [0, 0, 1, 1], [], []>} : vector<8x8xbf16>, vector<8x16xbf16>, vector<8x16xf32> -> vector<8x16xf32>
    %57 = tpu.reciprocal %54 {approx = true} : vector<8x1xf32> -> vector<8x1xf32>
    %58 = vector.broadcast %57 : vector<8x1xf32> to vector<8x16xf32>
    %59 = arith.mulf %56, %58 : vector<8x16xf32>
    %60 = tpu.concatenate %37, %59 in 1 : vector<8x16xf32>, vector<8x16xf32> -> vector<8x32xf32>
    %61 = arith.truncf %60 : vector<8x32xf32> to vector<8x32xbf16>
    %c0_27 = arith.constant 0 : index
    %c0_28 = arith.constant 0 : index
    %62 = vector.load %arg6[%c0_27, %c0_28] : memref<32x32xbf16, #tpu.memory_space<vmem>>, vector<32x32xbf16>
    %cst_29 = arith.constant dense<0.000000e+00> : vector<8x32xf32>
    %63 = tpu.matmul %61, %62, %cst_29 {dimension_numbers = #tpu.dot_dimension_numbers<[1], [0], [0], [1], [0, 0, 1, 1], [], []>} : vector<8x32xbf16>, vector<32x32xbf16>, vector<8x32xf32> -> vector<8x32xf32>
    %c0_30 = arith.constant 0 : index
    %c0_31 = arith.constant 0 : index
    %64 = vector.load %arg7[%c0_30, %c0_31] : memref<1x32xf32, #tpu.memory_space<vmem>>, vector<1x32xf32>
    %65 = vector.broadcast %64 : vector<1x32xf32> to vector<8x32xf32>
    %66 = arith.addf %63, %65 : vector<8x32xf32>
    %c0_32 = arith.constant 0 : index
    %c0_33 = arith.constant 0 : index
    %c0_34 = arith.constant 0 : index
    %67 = vector.load %arg8[%c0_32, %c0_33, %c0_34] : memref<1x8x32xf32, #tpu.memory_space<vmem>>, vector<1x8x32xf32>
    %68 = vector.shape_cast %67 : vector<1x8x32xf32> to vector<8x32xf32>
    %69 = arith.addf %68, %66 : vector<8x32xf32>
    %cst_35 = arith.constant dense<0.000000e+00> : vector<8xf32>
    %70 = vector.multi_reduction <add>, %69, %cst_35 [1] : vector<8x32xf32> to vector<8xf32>
    %71 = vector.shape_cast %70 : vector<8xf32> to vector<8x1xf32>
    %cst_36 = arith.constant 3.200000e+01 : f32
    %72 = vector.broadcast %cst_36 : f32 to vector<8x1xf32>
    %73 = arith.divf %71, %72 : vector<8x1xf32>
    %74 = vector.broadcast %73 : vector<8x1xf32> to vector<8x32xf32>
    %75 = arith.subf %69, %74 : vector<8x32xf32>
    %76 = arith.mulf %75, %75 : vector<8x32xf32>
    %cst_37 = arith.constant dense<0.000000e+00> : vector<8xf32>
    %77 = vector.multi_reduction <add>, %76, %cst_37 [1] : vector<8x32xf32> to vector<8xf32>
    %78 = vector.shape_cast %77 : vector<8xf32> to vector<8x1xf32>
    %cst_38 = arith.constant 3.200000e+01 : f32
    %79 = vector.broadcast %cst_38 : f32 to vector<8x1xf32>
    %80 = arith.divf %78, %79 : vector<8x1xf32>
    %cst_39 = arith.constant 9.99999974E-6 : f32
    %81 = vector.broadcast %cst_39 : f32 to vector<8x1xf32>
    %82 = arith.addf %80, %81 : vector<8x1xf32>
    %83 = math.rsqrt %82 : vector<8x1xf32>
    %84 = vector.broadcast %83 : vector<8x1xf32> to vector<8x32xf32>
    %85 = arith.mulf %75, %84 : vector<8x32xf32>
    %c0_40 = arith.constant 0 : index
    %c0_41 = arith.constant 0 : index
    %86 = vector.load %arg9[%c0_40, %c0_41] : memref<1x32xf32, #tpu.memory_space<vmem>>, vector<1x32xf32>
    %87 = vector.broadcast %86 : vector<1x32xf32> to vector<8x32xf32>
    %88 = arith.mulf %85, %87 : vector<8x32xf32>
    %c0_42 = arith.constant 0 : index
    %c0_43 = arith.constant 0 : index
    %89 = vector.load %arg10[%c0_42, %c0_43] : memref<1x32xf32, #tpu.memory_space<vmem>>, vector<1x32xf32>
    %90 = vector.broadcast %89 : vector<1x32xf32> to vector<8x32xf32>
    %91 = arith.addf %88, %90 : vector<8x32xf32>
    %c0_44 = arith.constant 0 : index
    %c0_45 = arith.constant 0 : index
    %c0_46 = arith.constant 0 : index
    %92 = vector.load %arg11[%c0_44, %c0_45, %c0_46] : memref<1x8x32xf32, #tpu.memory_space<vmem>>, vector<1x8x32xf32>
    %93 = vector.shape_cast %92 : vector<1x8x32xf32> to vector<8x32xf32>
    %94 = vector.shape_cast %91 : vector<8x32xf32> to vector<1x8x32xf32>
    tpu.vector_store %arg11[%c0_44, %c0_45, %c0_46], %94 {strides = array<i32>} : memref<1x8x32xf32, #tpu.memory_space<vmem>>, vector<1x8x32xf32>,
    return
  }
  func.func @transform_0(%arg0: i32) -> (i32, i32, i32) {
    %c0_i32 = arith.constant 0 : i32
    %c0_i32_0 = arith.constant 0 : i32
    %c0_i32_1 = arith.constant 0 : i32
    return %arg0, %c0_i32, %c0_i32_0 : i32, i32, i32
  }
  func.func @transform_1(%arg0: i32) -> (i32, i32, i32) {
    %c0_i32 = arith.constant 0 : i32
    %c0_i32_0 = arith.constant 0 : i32
    %c0_i32_1 = arith.constant 0 : i32
    return %arg0, %c0_i32, %c0_i32_0 : i32, i32, i32
  }
  func.func @transform_2(%arg0: i32) -> (i32, i32, i32) {
    %c0_i32 = arith.constant 0 : i32
    %c0_i32_0 = arith.constant 0 : i32
    %c0_i32_1 = arith.constant 0 : i32
    return %arg0, %c0_i32, %c0_i32_0 : i32, i32, i32
  }
  func.func @transform_3(%arg0: i32) -> (i32, i32, i32) {
    %c0_i32 = arith.constant 0 : i32
    %c0_i32_0 = arith.constant 0 : i32
    %c0_i32_1 = arith.constant 0 : i32
    return %arg0, %c0_i32, %c0_i32_0 : i32, i32, i32
  }
  func.func @transform_4(%arg0: i32) -> (i32, i32, i32) {
    %c0_i32 = arith.constant 0 : i32
    %c0_i32_0 = arith.constant 0 : i32
    %c0_i32_1 = arith.constant 0 : i32
    return %arg0, %c0_i32, %c0_i32_0 : i32, i32, i32
  }
  func.func @transform_5(%arg0: i32) -> (i32, i32) {
    %c0_i32 = arith.constant 0 : i32
    %c0_i32_0 = arith.constant 0 : i32
    %c0_i32_1 = arith.constant 0 : i32
    return %c0_i32, %c0_i32_0 : i32, i32
  }
  func.func @transform_6(%arg0: i32) -> (i32, i32) {
    %c0_i32 = arith.constant 0 : i32
    %c0_i32_0 = arith.constant 0 : i32
    %c0_i32_1 = arith.constant 0 : i32
    return %c0_i32, %c0_i32_0 : i32, i32
  }
  func.func @transform_7(%arg0: i32) -> (i32, i32, i32) {
    %c0_i32 = arith.constant 0 : i32
    %c0_i32_0 = arith.constant 0 : i32
    %c0_i32_1 = arith.constant 0 : i32
    return %arg0, %c0_i32, %c0_i32_0 : i32, i32, i32
  }
  func.func @transform_8(%arg0: i32) -> (i32, i32) {
    %c0_i32 = arith.constant 0 : i32
    %c0_i32_0 = arith.constant 0 : i32
    %c0_i32_1 = arith.constant 0 : i32
    return %c0_i32, %c0_i32_0 : i32, i32
  }
  func.func @transform_9(%arg0: i32) -> (i32, i32) {
    %c0_i32 = arith.constant 0 : i32
    %c0_i32_0 = arith.constant 0 : i32
    %c0_i32_1 = arith.constant 0 : i32
    return %c0_i32, %c0_i32_0 : i32, i32
  }
  func.func @transform_10(%arg0: i32) -> (i32, i32, i32) {
    %c0_i32 = arith.constant 0 : i32
    %c0_i32_0 = arith.constant 0 : i32
    %c0_i32_1 = arith.constant 0 : i32
    return %arg0, %c0_i32, %c0_i32_0 : i32, i32, i32
  }
}

module attributes {stable_mosaic.version = 11 : i64} {
  func.func @_linear_kernel(%arg0: i32, %arg1: i32, %arg2: memref<8x32xf32, #tpu.memory_space<vmem>>, %arg3: memref<32x32xbf16, #tpu.memory_space<vmem>>, %arg4: memref<1x32xf32, #tpu.memory_space<vmem>>, %arg5: memref<8x32xf32, #tpu.memory_space<vmem>>) attributes {dimension_semantics = [#tpu.dimension_semantics<parallel>, #tpu.dimension_semantics<parallel>], iteration_bounds = array<i64: 2, 1>, scalar_prefetch = 0 : i64, scratch_operands = 0 : i64, tpu.core_type = #tpu.core_type<tc>, window_params = [{transform_indices = @transform_0, window_bounds = array<i64: 8, 32>}, {transform_indices = @transform_1, window_bounds = array<i64: 32, 32>}, {transform_indices = @transform_2, window_bounds = array<i64: 1, 32>}, {transform_indices = @transform_3, window_bounds = array<i64: 8, 32>}]} {
    %c0 = arith.constant 0 : index
    %c0_0 = arith.constant 0 : index
    %0 = vector.load %arg2[%c0, %c0_0] : memref<8x32xf32, #tpu.memory_space<vmem>>, vector<8x32xf32>
    %1 = arith.truncf %0 : vector<8x32xf32> to vector<8x32xbf16>
    %c0_1 = arith.constant 0 : index
    %c0_2 = arith.constant 0 : index
    %2 = vector.load %arg3[%c0_1, %c0_2] : memref<32x32xbf16, #tpu.memory_space<vmem>>, vector<32x32xbf16>
    %cst = arith.constant dense<0.000000e+00> : vector<8x32xf32>
    %3 = tpu.matmul %1, %2, %cst {dimension_numbers = #tpu.dot_dimension_numbers<[1], [0], [0], [1], [0, 0, 1, 1], [], []>} : vector<8x32xbf16>, vector<32x32xbf16>, vector<8x32xf32> -> vector<8x32xf32>
    %c0_3 = arith.constant 0 : index
    %c0_4 = arith.constant 0 : index
    %4 = vector.load %arg4[%c0_3, %c0_4] : memref<1x32xf32, #tpu.memory_space<vmem>>, vector<1x32xf32>
    %5 = vector.broadcast %4 : vector<1x32xf32> to vector<8x32xf32>
    %6 = arith.addf %3, %5 : vector<8x32xf32>
    %c0_5 = arith.constant 0 : index
    %c0_6 = arith.constant 0 : index
    %7 = vector.load %arg5[%c0_5, %c0_6] : memref<8x32xf32, #tpu.memory_space<vmem>>, vector<8x32xf32>
    tpu.vector_store %arg5[%c0_5, %c0_6], %6 {strides = array<i32>} : memref<8x32xf32, #tpu.memory_space<vmem>>, vector<8x32xf32>,
    return
  }
  func.func @transform_0(%arg0: i32, %arg1: i32) -> (i32, i32) {
    %c0_i32 = arith.constant 0 : i32
    %c0_i32_0 = arith.constant 0 : i32
    return %arg0, %c0_i32 : i32, i32
  }
  func.func @transform_1(%arg0: i32, %arg1: i32) -> (i32, i32) {
    %c0_i32 = arith.constant 0 : i32
    %c0_i32_0 = arith.constant 0 : i32
    return %c0_i32, %arg1 : i32, i32
  }
  func.func @transform_2(%arg0: i32, %arg1: i32) -> (i32, i32) {
    %c0_i32 = arith.constant 0 : i32
    %c0_i32_0 = arith.constant 0 : i32
    return %c0_i32, %arg1 : i32, i32
  }
  func.func @transform_3(%arg0: i32, %arg1: i32) -> (i32, i32) {
    %c0_i32 = arith.constant 0 : i32
    return %arg0, %arg1 : i32, i32
  }
}

module attributes {stable_mosaic.version = 11 : i64} {
  func.func @_mha_core_kernel(%arg0: i32, %arg1: memref<1x8x32xf32, #tpu.memory_space<vmem>>, %arg2: memref<1x8x32xf32, #tpu.memory_space<vmem>>, %arg3: memref<1x8x32xf32, #tpu.memory_space<vmem>>, %arg4: memref<1x8x1xf32, #tpu.memory_space<vmem>>, %arg5: memref<1x1x8xf32, #tpu.memory_space<vmem>>, %arg6: memref<32x32xbf16, #tpu.memory_space<vmem>>, %arg7: memref<1x32xf32, #tpu.memory_space<vmem>>, %arg8: memref<1x8x32xf32, #tpu.memory_space<vmem>>, %arg9: memref<1x32xf32, #tpu.memory_space<vmem>>, %arg10: memref<1x32xf32, #tpu.memory_space<vmem>>, %arg11: memref<1x8x32xf32, #tpu.memory_space<vmem>>) attributes {dimension_semantics = [#tpu.dimension_semantics<parallel>], iteration_bounds = array<i64: 2>, scalar_prefetch = 0 : i64, scratch_operands = 0 : i64, tpu.core_type = #tpu.core_type<tc>, window_params = [{transform_indices = @transform_0, window_bounds = array<i64: 1, 8, 32>}, {transform_indices = @transform_1, window_bounds = array<i64: 1, 8, 32>}, {transform_indices = @transform_2, window_bounds = array<i64: 1, 8, 32>}, {transform_indices = @transform_3, window_bounds = array<i64: 1, 8, 1>}, {transform_indices = @transform_4, window_bounds = array<i64: 1, 1, 8>}, {pipeline_mode = #tpu.pipeline_mode<synchronous>, transform_indices = @transform_5, window_bounds = array<i64: 32, 32>}, {pipeline_mode = #tpu.pipeline_mode<synchronous>, transform_indices = @transform_6, window_bounds = array<i64: 1, 32>}, {transform_indices = @transform_7, window_bounds = array<i64: 1, 8, 32>}, {pipeline_mode = #tpu.pipeline_mode<synchronous>, transform_indices = @transform_8, window_bounds = array<i64: 1, 32>}, {pipeline_mode = #tpu.pipeline_mode<synchronous>, transform_indices = @transform_9, window_bounds = array<i64: 1, 32>}, {transform_indices = @transform_10, window_bounds = array<i64: 1, 8, 32>}]} {
    %c0 = arith.constant 0 : index
    %c0_0 = arith.constant 0 : index
    %c0_1 = arith.constant 0 : index
    %0 = vector.load %arg4[%c0, %c0_0, %c0_1] : memref<1x8x1xf32, #tpu.memory_space<vmem>>, vector<1x8x1xf32>
    %1 = vector.shape_cast %0 : vector<1x8x1xf32> to vector<8x1xf32>
    %c0_2 = arith.constant 0 : index
    %c0_3 = arith.constant 0 : index
    %c0_4 = arith.constant 0 : index
    %2 = vector.load %arg5[%c0_2, %c0_3, %c0_4] : memref<1x1x8xf32, #tpu.memory_space<vmem>>, vector<1x1x8xf32>
    %3 = vector.shape_cast %2 : vector<1x1x8xf32> to vector<1x8xf32>
    %4 = vector.broadcast %1 : vector<8x1xf32> to vector<8x8xf32>
    %5 = vector.broadcast %3 : vector<1x8xf32> to vector<8x8xf32>
    %6 = arith.mulf %4, %5 : vector<8x8xf32>
    %c0_5 = arith.constant 0 : index
    %c0_6 = arith.constant 0 : index
    %c0_7 = arith.constant 0 : index
    %7 = vector.load %arg1[%c0_5, %c0_6, %c0_7] : memref<1x8x32xf32, #tpu.memory_space<vmem>>, vector<1x8x32xf32>
    %8 = vector.shape_cast %7 : vector<1x8x32xf32> to vector<8x32xf32>
    %9 = arith.truncf %8 : vector<8x32xf32> to vector<8x32xbf16>
    %c0_8 = arith.constant 0 : index
    %c0_9 = arith.constant 0 : index
    %c0_10 = arith.constant 0 : index
    %10 = vector.load %arg2[%c0_8, %c0_9, %c0_10] : memref<1x8x32xf32, #tpu.memory_space<vmem>>, vector<1x8x32xf32>
    %11 = vector.shape_cast %10 : vector<1x8x32xf32> to vector<8x32xf32>
    %12 = arith.truncf %11 : vector<8x32xf32> to vector<8x32xbf16>
    %c0_11 = arith.constant 0 : index
    %c0_12 = arith.constant 0 : index
    %c0_13 = arith.constant 0 : index
    %13 = vector.load %arg3[%c0_11, %c0_12, %c0_13] : memref<1x8x32xf32, #tpu.memory_space<vmem>>, vector<1x8x32xf32>
    %14 = vector.shape_cast %13 : vector<1x8x32xf32> to vector<8x32xf32>
    %15 = arith.truncf %14 : vector<8x32xf32> to vector<8x32xbf16>
    %16 = vector.extract_strided_slice %9 {offsets = [0, 0], sizes = [8, 16], strides = [1, 1]} : vector<8x32xbf16> to vector<8x16xbf16>
    %17 = vector.extract_strided_slice %12 {offsets = [0, 0], sizes = [8, 16], strides = [1, 1]} : vector<8x32xbf16> to vector<8x16xbf16>
    %18 = vector.extract_strided_slice %15 {offsets = [0, 0], sizes = [8, 16], strides = [1, 1]} : vector<8x32xbf16> to vector<8x16xbf16>
    %cst = arith.constant dense<0.000000e+00> : vector<8x8xf32>
    %19 = tpu.matmul %16, %17, %cst {dimension_numbers = #tpu.dot_dimension_numbers<[1], [1], [0], [0], [0, 0, 1, 0], [], []>} : vector<8x16xbf16>, vector<8x16xbf16>, vector<8x8xf32> -> vector<8x8xf32>
    %cst_14 = arith.constant 2.500000e-01 : f32
    %20 = vector.broadcast %cst_14 : f32 to vector<8x8xf32>
    %21 = arith.mulf %19, %20 : vector<8x8xf32>
    %cst_15 = arith.constant 0.000000e+00 : f32
    %22 = vector.broadcast %cst_15 : f32 to vector<8x8xf32>
    %23 = arith.cmpf ogt, %6, %22 : vector<8x8xf32>
    %cst_16 = arith.constant -1.000000e+09 : f32
    %24 = vector.broadcast %cst_16 : f32 to vector<8x8xf32>
    %25 = arith.select %23, %21, %24 : vector<8x8xi1>, vector<8x8xf32>
    %cst_17 = arith.constant dense<0xFF800000> : vector<8xf32>
    %26 = vector.multi_reduction <maximumf>, %25, %cst_17 [1] : vector<8x8xf32> to vector<8xf32>
    %27 = vector.shape_cast %26 : vector<8xf32> to vector<8x1xf32>
    %28 = vector.broadcast %27 : vector<8x1xf32> to vector<8x8xf32>
    %29 = arith.subf %25, %28 : vector<8x8xf32>
    %30 = math.exp %29 : vector<8x8xf32>
    %cst_18 = arith.constant dense<0.000000e+00> : vector<8xf32>
    %31 = vector.multi_reduction <add>, %30, %cst_18 [1] : vector<8x8xf32> to vector<8xf32>
    %32 = vector.shape_cast %31 : vector<8xf32> to vector<8x1xf32>
    %33 = arith.truncf %30 : vector<8x8xf32> to vector<8x8xbf16>
    %cst_19 = arith.constant dense<0.000000e+00> : vector<8x16xf32>
    %34 = tpu.matmul %33, %18, %cst_19 {dimension_numbers = #tpu.dot_dimension_numbers<[1], [0], [0], [1], [0, 0, 1, 1], [], []>} : vector<8x8xbf16>, vector<8x16xbf16>, vector<8x16xf32> -> vector<8x16xf32>
    %35 = tpu.reciprocal %32 {approx = true} : vector<8x1xf32> -> vector<8x1xf32>
    %36 = vector.broadcast %35 : vector<8x1xf32> to vector<8x16xf32>
    %37 = arith.mulf %34, %36 : vector<8x16xf32>
    %38 = vector.extract_strided_slice %9 {offsets = [0, 16], sizes = [8, 16], strides = [1, 1]} : vector<8x32xbf16> to vector<8x16xbf16>
    %39 = vector.extract_strided_slice %12 {offsets = [0, 16], sizes = [8, 16], strides = [1, 1]} : vector<8x32xbf16> to vector<8x16xbf16>
    %40 = vector.extract_strided_slice %15 {offsets = [0, 16], sizes = [8, 16], strides = [1, 1]} : vector<8x32xbf16> to vector<8x16xbf16>
    %cst_20 = arith.constant dense<0.000000e+00> : vector<8x8xf32>
    %41 = tpu.matmul %38, %39, %cst_20 {dimension_numbers = #tpu.dot_dimension_numbers<[1], [1], [0], [0], [0, 0, 1, 0], [], []>} : vector<8x16xbf16>, vector<8x16xbf16>, vector<8x8xf32> -> vector<8x8xf32>
    %cst_21 = arith.constant 2.500000e-01 : f32
    %42 = vector.broadcast %cst_21 : f32 to vector<8x8xf32>
    %43 = arith.mulf %41, %42 : vector<8x8xf32>
    %cst_22 = arith.constant 0.000000e+00 : f32
    %44 = vector.broadcast %cst_22 : f32 to vector<8x8xf32>
    %45 = arith.cmpf ogt, %6, %44 : vector<8x8xf32>
    %cst_23 = arith.constant -1.000000e+09 : f32
    %46 = vector.broadcast %cst_23 : f32 to vector<8x8xf32>
    %47 = arith.select %45, %43, %46 : vector<8x8xi1>, vector<8x8xf32>
    %cst_24 = arith.constant dense<0xFF800000> : vector<8xf32>
    %48 = vector.multi_reduction <maximumf>, %47, %cst_24 [1] : vector<8x8xf32> to vector<8xf32>
    %49 = vector.shape_cast %48 : vector<8xf32> to vector<8x1xf32>
    %50 = vector.broadcast %49 : vector<8x1xf32> to vector<8x8xf32>
    %51 = arith.subf %47, %50 : vector<8x8xf32>
    %52 = math.exp %51 : vector<8x8xf32>
    %cst_25 = arith.constant dense<0.000000e+00> : vector<8xf32>
    %53 = vector.multi_reduction <add>, %52, %cst_25 [1] : vector<8x8xf32> to vector<8xf32>
    %54 = vector.shape_cast %53 : vector<8xf32> to vector<8x1xf32>
    %55 = arith.truncf %52 : vector<8x8xf32> to vector<8x8xbf16>
    %cst_26 = arith.constant dense<0.000000e+00> : vector<8x16xf32>
    %56 = tpu.matmul %55, %40, %cst_26 {dimension_numbers = #tpu.dot_dimension_numbers<[1], [0], [0], [1], [0, 0, 1, 1], [], []>} : vector<8x8xbf16>, vector<8x16xbf16>, vector<8x16xf32> -> vector<8x16xf32>
    %57 = tpu.reciprocal %54 {approx = true} : vector<8x1xf32> -> vector<8x1xf32>
    %58 = vector.broadcast %57 : vector<8x1xf32> to vector<8x16xf32>
    %59 = arith.mulf %56, %58 : vector<8x16xf32>
    %60 = tpu.concatenate %37, %59 in 1 : vector<8x16xf32>, vector<8x16xf32> -> vector<8x32xf32>
    %61 = arith.truncf %60 : vector<8x32xf32> to vector<8x32xbf16>
    %c0_27 = arith.constant 0 : index
    %c0_28 = arith.constant 0 : index
    %62 = vector.load %arg6[%c0_27, %c0_28] : memref<32x32xbf16, #tpu.memory_space<vmem>>, vector<32x32xbf16>
    %cst_29 = arith.constant dense<0.000000e+00> : vector<8x32xf32>
    %63 = tpu.matmul %61, %62, %cst_29 {dimension_numbers = #tpu.dot_dimension_numbers<[1], [0], [0], [1], [0, 0, 1, 1], [], []>} : vector<8x32xbf16>, vector<32x32xbf16>, vector<8x32xf32> -> vector<8x32xf32>
    %c0_30 = arith.constant 0 : index
    %c0_31 = arith.constant 0 : index
    %64 = vector.load %arg7[%c0_30, %c0_31] : memref<1x32xf32, #tpu.memory_space<vmem>>, vector<1x32xf32>
    %65 = vector.broadcast %64 : vector<1x32xf32> to vector<8x32xf32>
    %66 = arith.addf %63, %65 : vector<8x32xf32>
    %c0_32 = arith.constant 0 : index
    %c0_33 = arith.constant 0 : index
    %c0_34 = arith.constant 0 : index
    %67 = vector.load %arg8[%c0_32, %c0_33, %c0_34] : memref<1x8x32xf32, #tpu.memory_space<vmem>>, vector<1x8x32xf32>
    %68 = vector.shape_cast %67 : vector<1x8x32xf32> to vector<8x32xf32>
    %69 = arith.addf %68, %66 : vector<8x32xf32>
    %cst_35 = arith.constant dense<0.000000e+00> : vector<8xf32>
    %70 = vector.multi_reduction <add>, %69, %cst_35 [1] : vector<8x32xf32> to vector<8xf32>
    %71 = vector.shape_cast %70 : vector<8xf32> to vector<8x1xf32>
    %cst_36 = arith.constant 3.200000e+01 : f32
    %72 = vector.broadcast %cst_36 : f32 to vector<8x1xf32>
    %73 = arith.divf %71, %72 : vector<8x1xf32>
    %74 = vector.broadcast %73 : vector<8x1xf32> to vector<8x32xf32>
    %75 = arith.subf %69, %74 : vector<8x32xf32>
    %76 = arith.mulf %75, %75 : vector<8x32xf32>
    %cst_37 = arith.constant dense<0.000000e+00> : vector<8xf32>
    %77 = vector.multi_reduction <add>, %76, %cst_37 [1] : vector<8x32xf32> to vector<8xf32>
    %78 = vector.shape_cast %77 : vector<8xf32> to vector<8x1xf32>
    %cst_38 = arith.constant 3.200000e+01 : f32
    %79 = vector.broadcast %cst_38 : f32 to vector<8x1xf32>
    %80 = arith.divf %78, %79 : vector<8x1xf32>
    %cst_39 = arith.constant 9.99999974E-6 : f32
    %81 = vector.broadcast %cst_39 : f32 to vector<8x1xf32>
    %82 = arith.addf %80, %81 : vector<8x1xf32>
    %83 = math.rsqrt %82 : vector<8x1xf32>
    %84 = vector.broadcast %83 : vector<8x1xf32> to vector<8x32xf32>
    %85 = arith.mulf %75, %84 : vector<8x32xf32>
    %c0_40 = arith.constant 0 : index
    %c0_41 = arith.constant 0 : index
    %86 = vector.load %arg9[%c0_40, %c0_41] : memref<1x32xf32, #tpu.memory_space<vmem>>, vector<1x32xf32>
    %87 = vector.broadcast %86 : vector<1x32xf32> to vector<8x32xf32>
    %88 = arith.mulf %85, %87 : vector<8x32xf32>
    %c0_42 = arith.constant 0 : index
    %c0_43 = arith.constant 0 : index
    %89 = vector.load %arg10[%c0_42, %c0_43] : memref<1x32xf32, #tpu.memory_space<vmem>>, vector<1x32xf32>
    %90 = vector.broadcast %89 : vector<1x32xf32> to vector<8x32xf32>
    %91 = arith.addf %88, %90 : vector<8x32xf32>
    %c0_44 = arith.constant 0 : index
    %c0_45 = arith.constant 0 : index
    %c0_46 = arith.constant 0 : index
    %92 = vector.load %arg11[%c0_44, %c0_45, %c0_46] : memref<1x8x32xf32, #tpu.memory_space<vmem>>, vector<1x8x32xf32>
    %93 = vector.shape_cast %92 : vector<1x8x32xf32> to vector<8x32xf32>
    %94 = vector.shape_cast %91 : vector<8x32xf32> to vector<1x8x32xf32>
    tpu.vector_store %arg11[%c0_44, %c0_45, %c0_46], %94 {strides = array<i32>} : memref<1x8x32xf32, #tpu.memory_space<vmem>>, vector<1x8x32xf32>,
    return
  }
  func.func @transform_0(%arg0: i32) -> (i32, i32, i32) {
    %c0_i32 = arith.constant 0 : i32
    %c0_i32_0 = arith.constant 0 : i32
    %c0_i32_1 = arith.constant 0 : i32
    return %arg0, %c0_i32, %c0_i32_0 : i32, i32, i32
  }
  func.func @transform_1(%arg0: i32) -> (i32, i32, i32) {
    %c0_i32 = arith.constant 0 : i32
    %c0_i32_0 = arith.constant 0 : i32
    %c0_i32_1 = arith.constant 0 : i32
    return %arg0, %c0_i32, %c0_i32_0 : i32, i32, i32
  }
  func.func @transform_2(%arg0: i32) -> (i32, i32, i32) {
    %c0_i32 = arith.constant 0 : i32
    %c0_i32_0 = arith.constant 0 : i32
    %c0_i32_1 = arith.constant 0 : i32
    return %arg0, %c0_i32, %c0_i32_0 : i32, i32, i32
  }
  func.func @transform_3(%arg0: i32) -> (i32, i32, i32) {
    %c0_i32 = arith.constant 0 : i32
    %c0_i32_0 = arith.constant 0 : i32
    %c0_i32_1 = arith.constant 0 : i32
    return %arg0, %c0_i32, %c0_i32_0 : i32, i32, i32
  }
  func.func @transform_4(%arg0: i32) -> (i32, i32, i32) {
    %c0_i32 = arith.constant 0 : i32
    %c0_i32_0 = arith.constant 0 : i32
    %c0_i32_1 = arith.constant 0 : i32
    return %arg0, %c0_i32, %c0_i32_0 : i32, i32, i32
  }
  func.func @transform_5(%arg0: i32) -> (i32, i32) {
    %c0_i32 = arith.constant 0 : i32
    %c0_i32_0 = arith.constant 0 : i32
    %c0_i32_1 = arith.constant 0 : i32
    return %c0_i32, %c0_i32_0 : i32, i32
  }
  func.func @transform_6(%arg0: i32) -> (i32, i32) {
    %c0_i32 = arith.constant 0 : i32
    %c0_i32_0 = arith.constant 0 : i32
    %c0_i32_1 = arith.constant 0 : i32
    return %c0_i32, %c0_i32_0 : i32, i32
  }
  func.func @transform_7(%arg0: i32) -> (i32, i32, i32) {
    %c0_i32 = arith.constant 0 : i32
    %c0_i32_0 = arith.constant 0 : i32
    %c0_i32_1 = arith.constant 0 : i32
    return %arg0, %c0_i32, %c0_i32_0 : i32, i32, i32
  }
  func.func @transform_8(%arg0: i32) -> (i32, i32) {
    %c0_i32 = arith.constant 0 : i32
    %c0_i32_0 = arith.constant 0 : i32
    %c0_i32_1 = arith.constant 0 : i32
    return %c0_i32, %c0_i32_0 : i32, i32
  }
  func.func @transform_9(%arg0: i32) -> (i32, i32) {
    %c0_i32 = arith.constant 0 : i32
    %c0_i32_0 = arith.constant 0 : i32
    %c0_i32_1 = arith.constant 0 : i32
    return %c0_i32, %c0_i32_0 : i32, i32
  }
  func.func @transform_10(%arg0: i32) -> (i32, i32, i32) {
    %c0_i32 = arith.constant 0 : i32
    %c0_i32_0 = arith.constant 0 : i32
    %c0_i32_1 = arith.constant 0 : i32
    return %arg0, %c0_i32, %c0_i32_0 : i32, i32, i32
  }
}

module attributes {stable_mosaic.version = 11 : i64} {
  func.func @_ffn_ln_kernel(%arg0: i32, %arg1: memref<8x32xf32, #tpu.memory_space<vmem>>, %arg2: memref<32x64xbf16, #tpu.memory_space<vmem>>, %arg3: memref<1x64xf32, #tpu.memory_space<vmem>>, %arg4: memref<64x32xbf16, #tpu.memory_space<vmem>>, %arg5: memref<1x32xf32, #tpu.memory_space<vmem>>, %arg6: memref<1x32xf32, #tpu.memory_space<vmem>>, %arg7: memref<1x32xf32, #tpu.memory_space<vmem>>, %arg8: memref<8x32xf32, #tpu.memory_space<vmem>>) attributes {dimension_semantics = [#tpu.dimension_semantics<parallel>], iteration_bounds = array<i64: 2>, scalar_prefetch = 0 : i64, scratch_operands = 0 : i64, tpu.core_type = #tpu.core_type<tc>, window_params = [{transform_indices = @transform_0, window_bounds = array<i64: 8, 32>}, {pipeline_mode = #tpu.pipeline_mode<synchronous>, transform_indices = @transform_1, window_bounds = array<i64: 32, 64>}, {pipeline_mode = #tpu.pipeline_mode<synchronous>, transform_indices = @transform_2, window_bounds = array<i64: 1, 64>}, {pipeline_mode = #tpu.pipeline_mode<synchronous>, transform_indices = @transform_3, window_bounds = array<i64: 64, 32>}, {pipeline_mode = #tpu.pipeline_mode<synchronous>, transform_indices = @transform_4, window_bounds = array<i64: 1, 32>}, {pipeline_mode = #tpu.pipeline_mode<synchronous>, transform_indices = @transform_5, window_bounds = array<i64: 1, 32>}, {pipeline_mode = #tpu.pipeline_mode<synchronous>, transform_indices = @transform_6, window_bounds = array<i64: 1, 32>}, {transform_indices = @transform_7, window_bounds = array<i64: 8, 32>}]} {
    %c0 = arith.constant 0 : index
    %c0_0 = arith.constant 0 : index
    %0 = vector.load %arg1[%c0, %c0_0] : memref<8x32xf32, #tpu.memory_space<vmem>>, vector<8x32xf32>
    %1 = arith.truncf %0 : vector<8x32xf32> to vector<8x32xbf16>
    %c0_1 = arith.constant 0 : index
    %c0_2 = arith.constant 0 : index
    %2 = vector.load %arg2[%c0_1, %c0_2] : memref<32x64xbf16, #tpu.memory_space<vmem>>, vector<32x64xbf16>
    %cst = arith.constant dense<0.000000e+00> : vector<8x64xf32>
    %3 = tpu.matmul %1, %2, %cst {dimension_numbers = #tpu.dot_dimension_numbers<[1], [0], [0], [1], [0, 0, 1, 1], [], []>} : vector<8x32xbf16>, vector<32x64xbf16>, vector<8x64xf32> -> vector<8x64xf32>
    %c0_3 = arith.constant 0 : index
    %c0_4 = arith.constant 0 : index
    %4 = vector.load %arg3[%c0_3, %c0_4] : memref<1x64xf32, #tpu.memory_space<vmem>>, vector<1x64xf32>
    %5 = vector.broadcast %4 : vector<1x64xf32> to vector<8x64xf32>
    %6 = arith.addf %3, %5 : vector<8x64xf32>
    %cst_5 = arith.constant 0.000000e+00 : f32
    %7 = vector.broadcast %cst_5 : f32 to vector<8x64xf32>
    %8 = arith.maximumf %6, %7 : vector<8x64xf32>
    %9 = arith.truncf %8 : vector<8x64xf32> to vector<8x64xbf16>
    %c0_6 = arith.constant 0 : index
    %c0_7 = arith.constant 0 : index
    %10 = vector.load %arg4[%c0_6, %c0_7] : memref<64x32xbf16, #tpu.memory_space<vmem>>, vector<64x32xbf16>
    %cst_8 = arith.constant dense<0.000000e+00> : vector<8x32xf32>
    %11 = tpu.matmul %9, %10, %cst_8 {dimension_numbers = #tpu.dot_dimension_numbers<[1], [0], [0], [1], [0, 0, 1, 1], [], []>} : vector<8x64xbf16>, vector<64x32xbf16>, vector<8x32xf32> -> vector<8x32xf32>
    %c0_9 = arith.constant 0 : index
    %c0_10 = arith.constant 0 : index
    %12 = vector.load %arg5[%c0_9, %c0_10] : memref<1x32xf32, #tpu.memory_space<vmem>>, vector<1x32xf32>
    %13 = vector.broadcast %12 : vector<1x32xf32> to vector<8x32xf32>
    %14 = arith.addf %11, %13 : vector<8x32xf32>
    %15 = arith.addf %0, %14 : vector<8x32xf32>
    %cst_11 = arith.constant dense<0.000000e+00> : vector<8xf32>
    %16 = vector.multi_reduction <add>, %15, %cst_11 [1] : vector<8x32xf32> to vector<8xf32>
    %17 = vector.shape_cast %16 : vector<8xf32> to vector<8x1xf32>
    %cst_12 = arith.constant 3.200000e+01 : f32
    %18 = vector.broadcast %cst_12 : f32 to vector<8x1xf32>
    %19 = arith.divf %17, %18 : vector<8x1xf32>
    %20 = vector.broadcast %19 : vector<8x1xf32> to vector<8x32xf32>
    %21 = arith.subf %15, %20 : vector<8x32xf32>
    %22 = arith.mulf %21, %21 : vector<8x32xf32>
    %cst_13 = arith.constant dense<0.000000e+00> : vector<8xf32>
    %23 = vector.multi_reduction <add>, %22, %cst_13 [1] : vector<8x32xf32> to vector<8xf32>
    %24 = vector.shape_cast %23 : vector<8xf32> to vector<8x1xf32>
    %cst_14 = arith.constant 3.200000e+01 : f32
    %25 = vector.broadcast %cst_14 : f32 to vector<8x1xf32>
    %26 = arith.divf %24, %25 : vector<8x1xf32>
    %cst_15 = arith.constant 9.99999974E-6 : f32
    %27 = vector.broadcast %cst_15 : f32 to vector<8x1xf32>
    %28 = arith.addf %26, %27 : vector<8x1xf32>
    %29 = math.rsqrt %28 : vector<8x1xf32>
    %30 = vector.broadcast %29 : vector<8x1xf32> to vector<8x32xf32>
    %31 = arith.mulf %21, %30 : vector<8x32xf32>
    %c0_16 = arith.constant 0 : index
    %c0_17 = arith.constant 0 : index
    %32 = vector.load %arg6[%c0_16, %c0_17] : memref<1x32xf32, #tpu.memory_space<vmem>>, vector<1x32xf32>
    %33 = vector.broadcast %32 : vector<1x32xf32> to vector<8x32xf32>
    %34 = arith.mulf %31, %33 : vector<8x32xf32>
    %c0_18 = arith.constant 0 : index
    %c0_19 = arith.constant 0 : index
    %35 = vector.load %arg7[%c0_18, %c0_19] : memref<1x32xf32, #tpu.memory_space<vmem>>, vector<1x32xf32>
    %36 = vector.broadcast %35 : vector<1x32xf32> to vector<8x32xf32>
    %37 = arith.addf %34, %36 : vector<8x32xf32>
    %c0_20 = arith.constant 0 : index
    %c0_21 = arith.constant 0 : index
    %38 = vector.load %arg8[%c0_20, %c0_21] : memref<8x32xf32, #tpu.memory_space<vmem>>, vector<8x32xf32>
    tpu.vector_store %arg8[%c0_20, %c0_21], %37 {strides = array<i32>} : memref<8x32xf32, #tpu.memory_space<vmem>>, vector<8x32xf32>,
    return
  }
  func.func @transform_0(%arg0: i32) -> (i32, i32) {
    %c0_i32 = arith.constant 0 : i32
    %c0_i32_0 = arith.constant 0 : i32
    return %arg0, %c0_i32 : i32, i32
  }
  func.func @transform_1(%arg0: i32) -> (i32, i32) {
    %c0_i32 = arith.constant 0 : i32
    %c0_i32_0 = arith.constant 0 : i32
    %c0_i32_1 = arith.constant 0 : i32
    return %c0_i32, %c0_i32_0 : i32, i32
  }
  func.func @transform_2(%arg0: i32) -> (i32, i32) {
    %c0_i32 = arith.constant 0 : i32
    %c0_i32_0 = arith.constant 0 : i32
    %c0_i32_1 = arith.constant 0 : i32
    return %c0_i32, %c0_i32_0 : i32, i32
  }
  func.func @transform_3(%arg0: i32) -> (i32, i32) {
    %c0_i32 = arith.constant 0 : i32
    %c0_i32_0 = arith.constant 0 : i32
    %c0_i32_1 = arith.constant 0 : i32
    return %c0_i32, %c0_i32_0 : i32, i32
  }
  func.func @transform_4(%arg0: i32) -> (i32, i32) {
    %c0_i32 = arith.constant 0 : i32
    %c0_i32_0 = arith.constant 0 : i32
    %c0_i32_1 = arith.constant 0 : i32
    return %c0_i32, %c0_i32_0 : i32, i32
  }
  func.func @transform_5(%arg0: i32) -> (i32, i32) {
    %c0_i32 = arith.constant 0 : i32
    %c0_i32_0 = arith.constant 0 : i32
    %c0_i32_1 = arith.constant 0 : i32
    return %c0_i32, %c0_i32_0 : i32, i32
  }
  func.func @transform_6(%arg0: i32) -> (i32, i32) {
    %c0_i32 = arith.constant 0 : i32
    %c0_i32_0 = arith.constant 0 : i32
    %c0_i32_1 = arith.constant 0 : i32
    return %c0_i32, %c0_i32_0 : i32, i32
  }
  func.func @transform_7(%arg0: i32) -> (i32, i32) {
    %c0_i32 = arith.constant 0 : i32
    %c0_i32_0 = arith.constant 0 : i32
    return %arg0, %c0_i32 : i32, i32
  }
}

module attributes {stable_mosaic.version = 11 : i64} {
  func.func @_mha_core_kernel(%arg0: i32, %arg1: memref<1x8x32xf32, #tpu.memory_space<vmem>>, %arg2: memref<1x8x32xf32, #tpu.memory_space<vmem>>, %arg3: memref<1x8x32xf32, #tpu.memory_space<vmem>>, %arg4: memref<1x8x1xf32, #tpu.memory_space<vmem>>, %arg5: memref<1x1x8xf32, #tpu.memory_space<vmem>>, %arg6: memref<32x32xbf16, #tpu.memory_space<vmem>>, %arg7: memref<1x32xf32, #tpu.memory_space<vmem>>, %arg8: memref<1x8x32xf32, #tpu.memory_space<vmem>>, %arg9: memref<1x32xf32, #tpu.memory_space<vmem>>, %arg10: memref<1x32xf32, #tpu.memory_space<vmem>>, %arg11: memref<1x8x32xf32, #tpu.memory_space<vmem>>) attributes {dimension_semantics = [#tpu.dimension_semantics<parallel>], iteration_bounds = array<i64: 2>, scalar_prefetch = 0 : i64, scratch_operands = 0 : i64, tpu.core_type = #tpu.core_type<tc>, window_params = [{transform_indices = @transform_0, window_bounds = array<i64: 1, 8, 32>}, {transform_indices = @transform_1, window_bounds = array<i64: 1, 8, 32>}, {transform_indices = @transform_2, window_bounds = array<i64: 1, 8, 32>}, {transform_indices = @transform_3, window_bounds = array<i64: 1, 8, 1>}, {transform_indices = @transform_4, window_bounds = array<i64: 1, 1, 8>}, {pipeline_mode = #tpu.pipeline_mode<synchronous>, transform_indices = @transform_5, window_bounds = array<i64: 32, 32>}, {pipeline_mode = #tpu.pipeline_mode<synchronous>, transform_indices = @transform_6, window_bounds = array<i64: 1, 32>}, {transform_indices = @transform_7, window_bounds = array<i64: 1, 8, 32>}, {pipeline_mode = #tpu.pipeline_mode<synchronous>, transform_indices = @transform_8, window_bounds = array<i64: 1, 32>}, {pipeline_mode = #tpu.pipeline_mode<synchronous>, transform_indices = @transform_9, window_bounds = array<i64: 1, 32>}, {transform_indices = @transform_10, window_bounds = array<i64: 1, 8, 32>}]} {
    %c0 = arith.constant 0 : index
    %c0_0 = arith.constant 0 : index
    %c0_1 = arith.constant 0 : index
    %0 = vector.load %arg4[%c0, %c0_0, %c0_1] : memref<1x8x1xf32, #tpu.memory_space<vmem>>, vector<1x8x1xf32>
    %1 = vector.shape_cast %0 : vector<1x8x1xf32> to vector<8x1xf32>
    %c0_2 = arith.constant 0 : index
    %c0_3 = arith.constant 0 : index
    %c0_4 = arith.constant 0 : index
    %2 = vector.load %arg5[%c0_2, %c0_3, %c0_4] : memref<1x1x8xf32, #tpu.memory_space<vmem>>, vector<1x1x8xf32>
    %3 = vector.shape_cast %2 : vector<1x1x8xf32> to vector<1x8xf32>
    %4 = vector.broadcast %1 : vector<8x1xf32> to vector<8x8xf32>
    %5 = vector.broadcast %3 : vector<1x8xf32> to vector<8x8xf32>
    %6 = arith.mulf %4, %5 : vector<8x8xf32>
    %c0_5 = arith.constant 0 : index
    %c0_6 = arith.constant 0 : index
    %c0_7 = arith.constant 0 : index
    %7 = vector.load %arg1[%c0_5, %c0_6, %c0_7] : memref<1x8x32xf32, #tpu.memory_space<vmem>>, vector<1x8x32xf32>
    %8 = vector.shape_cast %7 : vector<1x8x32xf32> to vector<8x32xf32>
    %9 = arith.truncf %8 : vector<8x32xf32> to vector<8x32xbf16>
    %c0_8 = arith.constant 0 : index
    %c0_9 = arith.constant 0 : index
    %c0_10 = arith.constant 0 : index
    %10 = vector.load %arg2[%c0_8, %c0_9, %c0_10] : memref<1x8x32xf32, #tpu.memory_space<vmem>>, vector<1x8x32xf32>
    %11 = vector.shape_cast %10 : vector<1x8x32xf32> to vector<8x32xf32>
    %12 = arith.truncf %11 : vector<8x32xf32> to vector<8x32xbf16>
    %c0_11 = arith.constant 0 : index
    %c0_12 = arith.constant 0 : index
    %c0_13 = arith.constant 0 : index
    %13 = vector.load %arg3[%c0_11, %c0_12, %c0_13] : memref<1x8x32xf32, #tpu.memory_space<vmem>>, vector<1x8x32xf32>
    %14 = vector.shape_cast %13 : vector<1x8x32xf32> to vector<8x32xf32>
    %15 = arith.truncf %14 : vector<8x32xf32> to vector<8x32xbf16>
    %16 = vector.extract_strided_slice %9 {offsets = [0, 0], sizes = [8, 16], strides = [1, 1]} : vector<8x32xbf16> to vector<8x16xbf16>
    %17 = vector.extract_strided_slice %12 {offsets = [0, 0], sizes = [8, 16], strides = [1, 1]} : vector<8x32xbf16> to vector<8x16xbf16>
    %18 = vector.extract_strided_slice %15 {offsets = [0, 0], sizes = [8, 16], strides = [1, 1]} : vector<8x32xbf16> to vector<8x16xbf16>
    %cst = arith.constant dense<0.000000e+00> : vector<8x8xf32>
    %19 = tpu.matmul %16, %17, %cst {dimension_numbers = #tpu.dot_dimension_numbers<[1], [1], [0], [0], [0, 0, 1, 0], [], []>} : vector<8x16xbf16>, vector<8x16xbf16>, vector<8x8xf32> -> vector<8x8xf32>
    %cst_14 = arith.constant 2.500000e-01 : f32
    %20 = vector.broadcast %cst_14 : f32 to vector<8x8xf32>
    %21 = arith.mulf %19, %20 : vector<8x8xf32>
    %cst_15 = arith.constant 0.000000e+00 : f32
    %22 = vector.broadcast %cst_15 : f32 to vector<8x8xf32>
    %23 = arith.cmpf ogt, %6, %22 : vector<8x8xf32>
    %cst_16 = arith.constant -1.000000e+09 : f32
    %24 = vector.broadcast %cst_16 : f32 to vector<8x8xf32>
    %25 = arith.select %23, %21, %24 : vector<8x8xi1>, vector<8x8xf32>
    %cst_17 = arith.constant dense<0xFF800000> : vector<8xf32>
    %26 = vector.multi_reduction <maximumf>, %25, %cst_17 [1] : vector<8x8xf32> to vector<8xf32>
    %27 = vector.shape_cast %26 : vector<8xf32> to vector<8x1xf32>
    %28 = vector.broadcast %27 : vector<8x1xf32> to vector<8x8xf32>
    %29 = arith.subf %25, %28 : vector<8x8xf32>
    %30 = math.exp %29 : vector<8x8xf32>
    %cst_18 = arith.constant dense<0.000000e+00> : vector<8xf32>
    %31 = vector.multi_reduction <add>, %30, %cst_18 [1] : vector<8x8xf32> to vector<8xf32>
    %32 = vector.shape_cast %31 : vector<8xf32> to vector<8x1xf32>
    %33 = arith.truncf %30 : vector<8x8xf32> to vector<8x8xbf16>
    %cst_19 = arith.constant dense<0.000000e+00> : vector<8x16xf32>
    %34 = tpu.matmul %33, %18, %cst_19 {dimension_numbers = #tpu.dot_dimension_numbers<[1], [0], [0], [1], [0, 0, 1, 1], [], []>} : vector<8x8xbf16>, vector<8x16xbf16>, vector<8x16xf32> -> vector<8x16xf32>
    %35 = tpu.reciprocal %32 {approx = true} : vector<8x1xf32> -> vector<8x1xf32>
    %36 = vector.broadcast %35 : vector<8x1xf32> to vector<8x16xf32>
    %37 = arith.mulf %34, %36 : vector<8x16xf32>
    %38 = vector.extract_strided_slice %9 {offsets = [0, 16], sizes = [8, 16], strides = [1, 1]} : vector<8x32xbf16> to vector<8x16xbf16>
    %39 = vector.extract_strided_slice %12 {offsets = [0, 16], sizes = [8, 16], strides = [1, 1]} : vector<8x32xbf16> to vector<8x16xbf16>
    %40 = vector.extract_strided_slice %15 {offsets = [0, 16], sizes = [8, 16], strides = [1, 1]} : vector<8x32xbf16> to vector<8x16xbf16>
    %cst_20 = arith.constant dense<0.000000e+00> : vector<8x8xf32>
    %41 = tpu.matmul %38, %39, %cst_20 {dimension_numbers = #tpu.dot_dimension_numbers<[1], [1], [0], [0], [0, 0, 1, 0], [], []>} : vector<8x16xbf16>, vector<8x16xbf16>, vector<8x8xf32> -> vector<8x8xf32>
    %cst_21 = arith.constant 2.500000e-01 : f32
    %42 = vector.broadcast %cst_21 : f32 to vector<8x8xf32>
    %43 = arith.mulf %41, %42 : vector<8x8xf32>
    %cst_22 = arith.constant 0.000000e+00 : f32
    %44 = vector.broadcast %cst_22 : f32 to vector<8x8xf32>
    %45 = arith.cmpf ogt, %6, %44 : vector<8x8xf32>
    %cst_23 = arith.constant -1.000000e+09 : f32
    %46 = vector.broadcast %cst_23 : f32 to vector<8x8xf32>
    %47 = arith.select %45, %43, %46 : vector<8x8xi1>, vector<8x8xf32>
    %cst_24 = arith.constant dense<0xFF800000> : vector<8xf32>
    %48 = vector.multi_reduction <maximumf>, %47, %cst_24 [1] : vector<8x8xf32> to vector<8xf32>
    %49 = vector.shape_cast %48 : vector<8xf32> to vector<8x1xf32>
    %50 = vector.broadcast %49 : vector<8x1xf32> to vector<8x8xf32>
    %51 = arith.subf %47, %50 : vector<8x8xf32>
    %52 = math.exp %51 : vector<8x8xf32>
    %cst_25 = arith.constant dense<0.000000e+00> : vector<8xf32>
    %53 = vector.multi_reduction <add>, %52, %cst_25 [1] : vector<8x8xf32> to vector<8xf32>
    %54 = vector.shape_cast %53 : vector<8xf32> to vector<8x1xf32>
    %55 = arith.truncf %52 : vector<8x8xf32> to vector<8x8xbf16>
    %cst_26 = arith.constant dense<0.000000e+00> : vector<8x16xf32>
    %56 = tpu.matmul %55, %40, %cst_26 {dimension_numbers = #tpu.dot_dimension_numbers<[1], [0], [0], [1], [0, 0, 1, 1], [], []>} : vector<8x8xbf16>, vector<8x16xbf16>, vector<8x16xf32> -> vector<8x16xf32>
    %57 = tpu.reciprocal %54 {approx = true} : vector<8x1xf32> -> vector<8x1xf32>
    %58 = vector.broadcast %57 : vector<8x1xf32> to vector<8x16xf32>
    %59 = arith.mulf %56, %58 : vector<8x16xf32>
    %60 = tpu.concatenate %37, %59 in 1 : vector<8x16xf32>, vector<8x16xf32> -> vector<8x32xf32>
    %61 = arith.truncf %60 : vector<8x32xf32> to vector<8x32xbf16>
    %c0_27 = arith.constant 0 : index
    %c0_28 = arith.constant 0 : index
    %62 = vector.load %arg6[%c0_27, %c0_28] : memref<32x32xbf16, #tpu.memory_space<vmem>>, vector<32x32xbf16>
    %cst_29 = arith.constant dense<0.000000e+00> : vector<8x32xf32>
    %63 = tpu.matmul %61, %62, %cst_29 {dimension_numbers = #tpu.dot_dimension_numbers<[1], [0], [0], [1], [0, 0, 1, 1], [], []>} : vector<8x32xbf16>, vector<32x32xbf16>, vector<8x32xf32> -> vector<8x32xf32>
    %c0_30 = arith.constant 0 : index
    %c0_31 = arith.constant 0 : index
    %64 = vector.load %arg7[%c0_30, %c0_31] : memref<1x32xf32, #tpu.memory_space<vmem>>, vector<1x32xf32>
    %65 = vector.broadcast %64 : vector<1x32xf32> to vector<8x32xf32>
    %66 = arith.addf %63, %65 : vector<8x32xf32>
    %c0_32 = arith.constant 0 : index
    %c0_33 = arith.constant 0 : index
    %c0_34 = arith.constant 0 : index
    %67 = vector.load %arg8[%c0_32, %c0_33, %c0_34] : memref<1x8x32xf32, #tpu.memory_space<vmem>>, vector<1x8x32xf32>
    %68 = vector.shape_cast %67 : vector<1x8x32xf32> to vector<8x32xf32>
    %69 = arith.addf %68, %66 : vector<8x32xf32>
    %cst_35 = arith.constant dense<0.000000e+00> : vector<8xf32>
    %70 = vector.multi_reduction <add>, %69, %cst_35 [1] : vector<8x32xf32> to vector<8xf32>
    %71 = vector.shape_cast %70 : vector<8xf32> to vector<8x1xf32>
    %cst_36 = arith.constant 3.200000e+01 : f32
    %72 = vector.broadcast %cst_36 : f32 to vector<8x1xf32>
    %73 = arith.divf %71, %72 : vector<8x1xf32>
    %74 = vector.broadcast %73 : vector<8x1xf32> to vector<8x32xf32>
    %75 = arith.subf %69, %74 : vector<8x32xf32>
    %76 = arith.mulf %75, %75 : vector<8x32xf32>
    %cst_37 = arith.constant dense<0.000000e+00> : vector<8xf32>
    %77 = vector.multi_reduction <add>, %76, %cst_37 [1] : vector<8x32xf32> to vector<8xf32>
    %78 = vector.shape_cast %77 : vector<8xf32> to vector<8x1xf32>
    %cst_38 = arith.constant 3.200000e+01 : f32
    %79 = vector.broadcast %cst_38 : f32 to vector<8x1xf32>
    %80 = arith.divf %78, %79 : vector<8x1xf32>
    %cst_39 = arith.constant 9.99999974E-6 : f32
    %81 = vector.broadcast %cst_39 : f32 to vector<8x1xf32>
    %82 = arith.addf %80, %81 : vector<8x1xf32>
    %83 = math.rsqrt %82 : vector<8x1xf32>
    %84 = vector.broadcast %83 : vector<8x1xf32> to vector<8x32xf32>
    %85 = arith.mulf %75, %84 : vector<8x32xf32>
    %c0_40 = arith.constant 0 : index
    %c0_41 = arith.constant 0 : index
    %86 = vector.load %arg9[%c0_40, %c0_41] : memref<1x32xf32, #tpu.memory_space<vmem>>, vector<1x32xf32>
    %87 = vector.broadcast %86 : vector<1x32xf32> to vector<8x32xf32>
    %88 = arith.mulf %85, %87 : vector<8x32xf32>
    %c0_42 = arith.constant 0 : index
    %c0_43 = arith.constant 0 : index
    %89 = vector.load %arg10[%c0_42, %c0_43] : memref<1x32xf32, #tpu.memory_space<vmem>>, vector<1x32xf32>
    %90 = vector.broadcast %89 : vector<1x32xf32> to vector<8x32xf32>
    %91 = arith.addf %88, %90 : vector<8x32xf32>
    %c0_44 = arith.constant 0 : index
    %c0_45 = arith.constant 0 : index
    %c0_46 = arith.constant 0 : index
    %92 = vector.load %arg11[%c0_44, %c0_45, %c0_46] : memref<1x8x32xf32, #tpu.memory_space<vmem>>, vector<1x8x32xf32>
    %93 = vector.shape_cast %92 : vector<1x8x32xf32> to vector<8x32xf32>
    %94 = vector.shape_cast %91 : vector<8x32xf32> to vector<1x8x32xf32>
    tpu.vector_store %arg11[%c0_44, %c0_45, %c0_46], %94 {strides = array<i32>} : memref<1x8x32xf32, #tpu.memory_space<vmem>>, vector<1x8x32xf32>,
    return
  }
  func.func @transform_0(%arg0: i32) -> (i32, i32, i32) {
    %c0_i32 = arith.constant 0 : i32
    %c0_i32_0 = arith.constant 0 : i32
    %c0_i32_1 = arith.constant 0 : i32
    return %arg0, %c0_i32, %c0_i32_0 : i32, i32, i32
  }
  func.func @transform_1(%arg0: i32) -> (i32, i32, i32) {
    %c0_i32 = arith.constant 0 : i32
    %c0_i32_0 = arith.constant 0 : i32
    %c0_i32_1 = arith.constant 0 : i32
    return %arg0, %c0_i32, %c0_i32_0 : i32, i32, i32
  }
  func.func @transform_2(%arg0: i32) -> (i32, i32, i32) {
    %c0_i32 = arith.constant 0 : i32
    %c0_i32_0 = arith.constant 0 : i32
    %c0_i32_1 = arith.constant 0 : i32
    return %arg0, %c0_i32, %c0_i32_0 : i32, i32, i32
  }
  func.func @transform_3(%arg0: i32) -> (i32, i32, i32) {
    %c0_i32 = arith.constant 0 : i32
    %c0_i32_0 = arith.constant 0 : i32
    %c0_i32_1 = arith.constant 0 : i32
    return %arg0, %c0_i32, %c0_i32_0 : i32, i32, i32
  }
  func.func @transform_4(%arg0: i32) -> (i32, i32, i32) {
    %c0_i32 = arith.constant 0 : i32
    %c0_i32_0 = arith.constant 0 : i32
    %c0_i32_1 = arith.constant 0 : i32
    return %arg0, %c0_i32, %c0_i32_0 : i32, i32, i32
  }
  func.func @transform_5(%arg0: i32) -> (i32, i32) {
    %c0_i32 = arith.constant 0 : i32
    %c0_i32_0 = arith.constant 0 : i32
    %c0_i32_1 = arith.constant 0 : i32
    return %c0_i32, %c0_i32_0 : i32, i32
  }
  func.func @transform_6(%arg0: i32) -> (i32, i32) {
    %c0_i32 = arith.constant 0 : i32
    %c0_i32_0 = arith.constant 0 : i32
    %c0_i32_1 = arith.constant 0 : i32
    return %c0_i32, %c0_i32_0 : i32, i32
  }
  func.func @transform_7(%arg0: i32) -> (i32, i32, i32) {
    %c0_i32 = arith.constant 0 : i32
    %c0_i32_0 = arith.constant 0 : i32
    %c0_i32_1 = arith.constant 0 : i32
    return %arg0, %c0_i32, %c0_i32_0 : i32, i32, i32
  }
  func.func @transform_8(%arg0: i32) -> (i32, i32) {
    %c0_i32 = arith.constant 0 : i32
    %c0_i32_0 = arith.constant 0 : i32
    %c0_i32_1 = arith.constant 0 : i32
    return %c0_i32, %c0_i32_0 : i32, i32
  }
  func.func @transform_9(%arg0: i32) -> (i32, i32) {
    %c0_i32 = arith.constant 0 : i32
    %c0_i32_0 = arith.constant 0 : i32
    %c0_i32_1 = arith.constant 0 : i32
    return %c0_i32, %c0_i32_0 : i32, i32
  }
  func.func @transform_10(%arg0: i32) -> (i32, i32, i32) {
    %c0_i32 = arith.constant 0 : i32
    %c0_i32_0 = arith.constant 0 : i32
    %c0_i32_1 = arith.constant 0 : i32
    return %arg0, %c0_i32, %c0_i32_0 : i32, i32, i32
  }
}

module attributes {stable_mosaic.version = 11 : i64} {
  func.func @_ffn_ln_kernel(%arg0: i32, %arg1: memref<8x32xf32, #tpu.memory_space<vmem>>, %arg2: memref<32x64xbf16, #tpu.memory_space<vmem>>, %arg3: memref<1x64xf32, #tpu.memory_space<vmem>>, %arg4: memref<64x32xbf16, #tpu.memory_space<vmem>>, %arg5: memref<1x32xf32, #tpu.memory_space<vmem>>, %arg6: memref<1x32xf32, #tpu.memory_space<vmem>>, %arg7: memref<1x32xf32, #tpu.memory_space<vmem>>, %arg8: memref<8x32xf32, #tpu.memory_space<vmem>>) attributes {dimension_semantics = [#tpu.dimension_semantics<parallel>], iteration_bounds = array<i64: 2>, scalar_prefetch = 0 : i64, scratch_operands = 0 : i64, tpu.core_type = #tpu.core_type<tc>, window_params = [{transform_indices = @transform_0, window_bounds = array<i64: 8, 32>}, {pipeline_mode = #tpu.pipeline_mode<synchronous>, transform_indices = @transform_1, window_bounds = array<i64: 32, 64>}, {pipeline_mode = #tpu.pipeline_mode<synchronous>, transform_indices = @transform_2, window_bounds = array<i64: 1, 64>}, {pipeline_mode = #tpu.pipeline_mode<synchronous>, transform_indices = @transform_3, window_bounds = array<i64: 64, 32>}, {pipeline_mode = #tpu.pipeline_mode<synchronous>, transform_indices = @transform_4, window_bounds = array<i64: 1, 32>}, {pipeline_mode = #tpu.pipeline_mode<synchronous>, transform_indices = @transform_5, window_bounds = array<i64: 1, 32>}, {pipeline_mode = #tpu.pipeline_mode<synchronous>, transform_indices = @transform_6, window_bounds = array<i64: 1, 32>}, {transform_indices = @transform_7, window_bounds = array<i64: 8, 32>}]} {
    %c0 = arith.constant 0 : index
    %c0_0 = arith.constant 0 : index
    %0 = vector.load %arg1[%c0, %c0_0] : memref<8x32xf32, #tpu.memory_space<vmem>>, vector<8x32xf32>
    %1 = arith.truncf %0 : vector<8x32xf32> to vector<8x32xbf16>
    %c0_1 = arith.constant 0 : index
    %c0_2 = arith.constant 0 : index
    %2 = vector.load %arg2[%c0_1, %c0_2] : memref<32x64xbf16, #tpu.memory_space<vmem>>, vector<32x64xbf16>
    %cst = arith.constant dense<0.000000e+00> : vector<8x64xf32>
    %3 = tpu.matmul %1, %2, %cst {dimension_numbers = #tpu.dot_dimension_numbers<[1], [0], [0], [1], [0, 0, 1, 1], [], []>} : vector<8x32xbf16>, vector<32x64xbf16>, vector<8x64xf32> -> vector<8x64xf32>
    %c0_3 = arith.constant 0 : index
    %c0_4 = arith.constant 0 : index
    %4 = vector.load %arg3[%c0_3, %c0_4] : memref<1x64xf32, #tpu.memory_space<vmem>>, vector<1x64xf32>
    %5 = vector.broadcast %4 : vector<1x64xf32> to vector<8x64xf32>
    %6 = arith.addf %3, %5 : vector<8x64xf32>
    %cst_5 = arith.constant 0.000000e+00 : f32
    %7 = vector.broadcast %cst_5 : f32 to vector<8x64xf32>
    %8 = arith.maximumf %6, %7 : vector<8x64xf32>
    %9 = arith.truncf %8 : vector<8x64xf32> to vector<8x64xbf16>
    %c0_6 = arith.constant 0 : index
    %c0_7 = arith.constant 0 : index
    %10 = vector.load %arg4[%c0_6, %c0_7] : memref<64x32xbf16, #tpu.memory_space<vmem>>, vector<64x32xbf16>
    %cst_8 = arith.constant dense<0.000000e+00> : vector<8x32xf32>
    %11 = tpu.matmul %9, %10, %cst_8 {dimension_numbers = #tpu.dot_dimension_numbers<[1], [0], [0], [1], [0, 0, 1, 1], [], []>} : vector<8x64xbf16>, vector<64x32xbf16>, vector<8x32xf32> -> vector<8x32xf32>
    %c0_9 = arith.constant 0 : index
    %c0_10 = arith.constant 0 : index
    %12 = vector.load %arg5[%c0_9, %c0_10] : memref<1x32xf32, #tpu.memory_space<vmem>>, vector<1x32xf32>
    %13 = vector.broadcast %12 : vector<1x32xf32> to vector<8x32xf32>
    %14 = arith.addf %11, %13 : vector<8x32xf32>
    %15 = arith.addf %0, %14 : vector<8x32xf32>
    %cst_11 = arith.constant dense<0.000000e+00> : vector<8xf32>
    %16 = vector.multi_reduction <add>, %15, %cst_11 [1] : vector<8x32xf32> to vector<8xf32>
    %17 = vector.shape_cast %16 : vector<8xf32> to vector<8x1xf32>
    %cst_12 = arith.constant 3.200000e+01 : f32
    %18 = vector.broadcast %cst_12 : f32 to vector<8x1xf32>
    %19 = arith.divf %17, %18 : vector<8x1xf32>
    %20 = vector.broadcast %19 : vector<8x1xf32> to vector<8x32xf32>
    %21 = arith.subf %15, %20 : vector<8x32xf32>
    %22 = arith.mulf %21, %21 : vector<8x32xf32>
    %cst_13 = arith.constant dense<0.000000e+00> : vector<8xf32>
    %23 = vector.multi_reduction <add>, %22, %cst_13 [1] : vector<8x32xf32> to vector<8xf32>
    %24 = vector.shape_cast %23 : vector<8xf32> to vector<8x1xf32>
    %cst_14 = arith.constant 3.200000e+01 : f32
    %25 = vector.broadcast %cst_14 : f32 to vector<8x1xf32>
    %26 = arith.divf %24, %25 : vector<8x1xf32>
    %cst_15 = arith.constant 9.99999974E-6 : f32
    %27 = vector.broadcast %cst_15 : f32 to vector<8x1xf32>
    %28 = arith.addf %26, %27 : vector<8x1xf32>
    %29 = math.rsqrt %28 : vector<8x1xf32>
    %30 = vector.broadcast %29 : vector<8x1xf32> to vector<8x32xf32>
    %31 = arith.mulf %21, %30 : vector<8x32xf32>
    %c0_16 = arith.constant 0 : index
    %c0_17 = arith.constant 0 : index
    %32 = vector.load %arg6[%c0_16, %c0_17] : memref<1x32xf32, #tpu.memory_space<vmem>>, vector<1x32xf32>
    %33 = vector.broadcast %32 : vector<1x32xf32> to vector<8x32xf32>
    %34 = arith.mulf %31, %33 : vector<8x32xf32>
    %c0_18 = arith.constant 0 : index
    %c0_19 = arith.constant 0 : index
    %35 = vector.load %arg7[%c0_18, %c0_19] : memref<1x32xf32, #tpu.memory_space<vmem>>, vector<1x32xf32>
    %36 = vector.broadcast %35 : vector<1x32xf32> to vector<8x32xf32>
    %37 = arith.addf %34, %36 : vector<8x32xf32>
    %c0_20 = arith.constant 0 : index
    %c0_21 = arith.constant 0 : index
    %38 = vector.load %arg8[%c0_20, %c0_21] : memref<8x32xf32, #tpu.memory_space<vmem>>, vector<8x32xf32>
    tpu.vector_store %arg8[%c0_20, %c0_21], %37 {strides = array<i32>} : memref<8x32xf32, #tpu.memory_space<vmem>>, vector<8x32xf32>,
    return
  }
  func.func @transform_0(%arg0: i32) -> (i32, i32) {
    %c0_i32 = arith.constant 0 : i32
    %c0_i32_0 = arith.constant 0 : i32
    return %arg0, %c0_i32 : i32, i32
  }
  func.func @transform_1(%arg0: i32) -> (i32, i32) {
    %c0_i32 = arith.constant 0 : i32
    %c0_i32_0 = arith.constant 0 : i32
    %c0_i32_1 = arith.constant 0 : i32
    return %c0_i32, %c0_i32_0 : i32, i32
  }
  func.func @transform_2(%arg0: i32) -> (i32, i32) {
    %c0_i32 = arith.constant 0 : i32
    %c0_i32_0 = arith.constant 0 : i32
    %c0_i32_1 = arith.constant 0 : i32
    return %c0_i32, %c0_i32_0 : i32, i32
  }
  func.func @transform_3(%arg0: i32) -> (i32, i32) {
    %c0_i32 = arith.constant 0 : i32
    %c0_i32_0 = arith.constant 0 : i32
    %c0_i32_1 = arith.constant 0 : i32
    return %c0_i32, %c0_i32_0 : i32, i32
  }
  func.func @transform_4(%arg0: i32) -> (i32, i32) {
    %c0_i32 = arith.constant 0 : i32
    %c0_i32_0 = arith.constant 0 : i32
    %c0_i32_1 = arith.constant 0 : i32
    return %c0_i32, %c0_i32_0 : i32, i32
  }
  func.func @transform_5(%arg0: i32) -> (i32, i32) {
    %c0_i32 = arith.constant 0 : i32
    %c0_i32_0 = arith.constant 0 : i32
    %c0_i32_1 = arith.constant 0 : i32
    return %c0_i32, %c0_i32_0 : i32, i32
  }
  func.func @transform_6(%arg0: i32) -> (i32, i32) {
    %c0_i32 = arith.constant 0 : i32
    %c0_i32_0 = arith.constant 0 : i32
    %c0_i32_1 = arith.constant 0 : i32
    return %c0_i32, %c0_i32_0 : i32, i32
  }
  func.func @transform_7(%arg0: i32) -> (i32, i32) {
    %c0_i32 = arith.constant 0 : i32
    %c0_i32_0 = arith.constant 0 : i32
    return %arg0, %c0_i32 : i32, i32
  }
}

module attributes {stable_mosaic.version = 11 : i64} {
  func.func @_mha_core_kernel(%arg0: i32, %arg1: memref<1x8x32xf32, #tpu.memory_space<vmem>>, %arg2: memref<1x8x32xf32, #tpu.memory_space<vmem>>, %arg3: memref<1x8x32xf32, #tpu.memory_space<vmem>>, %arg4: memref<1x8x1xf32, #tpu.memory_space<vmem>>, %arg5: memref<1x1x8xf32, #tpu.memory_space<vmem>>, %arg6: memref<32x32xbf16, #tpu.memory_space<vmem>>, %arg7: memref<1x32xf32, #tpu.memory_space<vmem>>, %arg8: memref<1x8x32xf32, #tpu.memory_space<vmem>>, %arg9: memref<1x32xf32, #tpu.memory_space<vmem>>, %arg10: memref<1x32xf32, #tpu.memory_space<vmem>>, %arg11: memref<1x8x32xf32, #tpu.memory_space<vmem>>) attributes {dimension_semantics = [#tpu.dimension_semantics<parallel>], iteration_bounds = array<i64: 2>, scalar_prefetch = 0 : i64, scratch_operands = 0 : i64, tpu.core_type = #tpu.core_type<tc>, window_params = [{transform_indices = @transform_0, window_bounds = array<i64: 1, 8, 32>}, {transform_indices = @transform_1, window_bounds = array<i64: 1, 8, 32>}, {transform_indices = @transform_2, window_bounds = array<i64: 1, 8, 32>}, {transform_indices = @transform_3, window_bounds = array<i64: 1, 8, 1>}, {transform_indices = @transform_4, window_bounds = array<i64: 1, 1, 8>}, {pipeline_mode = #tpu.pipeline_mode<synchronous>, transform_indices = @transform_5, window_bounds = array<i64: 32, 32>}, {pipeline_mode = #tpu.pipeline_mode<synchronous>, transform_indices = @transform_6, window_bounds = array<i64: 1, 32>}, {transform_indices = @transform_7, window_bounds = array<i64: 1, 8, 32>}, {pipeline_mode = #tpu.pipeline_mode<synchronous>, transform_indices = @transform_8, window_bounds = array<i64: 1, 32>}, {pipeline_mode = #tpu.pipeline_mode<synchronous>, transform_indices = @transform_9, window_bounds = array<i64: 1, 32>}, {transform_indices = @transform_10, window_bounds = array<i64: 1, 8, 32>}]} {
    %c0 = arith.constant 0 : index
    %c0_0 = arith.constant 0 : index
    %c0_1 = arith.constant 0 : index
    %0 = vector.load %arg4[%c0, %c0_0, %c0_1] : memref<1x8x1xf32, #tpu.memory_space<vmem>>, vector<1x8x1xf32>
    %1 = vector.shape_cast %0 : vector<1x8x1xf32> to vector<8x1xf32>
    %c0_2 = arith.constant 0 : index
    %c0_3 = arith.constant 0 : index
    %c0_4 = arith.constant 0 : index
    %2 = vector.load %arg5[%c0_2, %c0_3, %c0_4] : memref<1x1x8xf32, #tpu.memory_space<vmem>>, vector<1x1x8xf32>
    %3 = vector.shape_cast %2 : vector<1x1x8xf32> to vector<1x8xf32>
    %4 = vector.broadcast %1 : vector<8x1xf32> to vector<8x8xf32>
    %5 = vector.broadcast %3 : vector<1x8xf32> to vector<8x8xf32>
    %6 = arith.mulf %4, %5 : vector<8x8xf32>
    %c0_5 = arith.constant 0 : index
    %c0_6 = arith.constant 0 : index
    %c0_7 = arith.constant 0 : index
    %7 = vector.load %arg1[%c0_5, %c0_6, %c0_7] : memref<1x8x32xf32, #tpu.memory_space<vmem>>, vector<1x8x32xf32>
    %8 = vector.shape_cast %7 : vector<1x8x32xf32> to vector<8x32xf32>
    %9 = arith.truncf %8 : vector<8x32xf32> to vector<8x32xbf16>
    %c0_8 = arith.constant 0 : index
    %c0_9 = arith.constant 0 : index
    %c0_10 = arith.constant 0 : index
    %10 = vector.load %arg2[%c0_8, %c0_9, %c0_10] : memref<1x8x32xf32, #tpu.memory_space<vmem>>, vector<1x8x32xf32>
    %11 = vector.shape_cast %10 : vector<1x8x32xf32> to vector<8x32xf32>
    %12 = arith.truncf %11 : vector<8x32xf32> to vector<8x32xbf16>
    %c0_11 = arith.constant 0 : index
    %c0_12 = arith.constant 0 : index
    %c0_13 = arith.constant 0 : index
    %13 = vector.load %arg3[%c0_11, %c0_12, %c0_13] : memref<1x8x32xf32, #tpu.memory_space<vmem>>, vector<1x8x32xf32>
    %14 = vector.shape_cast %13 : vector<1x8x32xf32> to vector<8x32xf32>
    %15 = arith.truncf %14 : vector<8x32xf32> to vector<8x32xbf16>
    %16 = vector.extract_strided_slice %9 {offsets = [0, 0], sizes = [8, 16], strides = [1, 1]} : vector<8x32xbf16> to vector<8x16xbf16>
    %17 = vector.extract_strided_slice %12 {offsets = [0, 0], sizes = [8, 16], strides = [1, 1]} : vector<8x32xbf16> to vector<8x16xbf16>
    %18 = vector.extract_strided_slice %15 {offsets = [0, 0], sizes = [8, 16], strides = [1, 1]} : vector<8x32xbf16> to vector<8x16xbf16>
    %cst = arith.constant dense<0.000000e+00> : vector<8x8xf32>
    %19 = tpu.matmul %16, %17, %cst {dimension_numbers = #tpu.dot_dimension_numbers<[1], [1], [0], [0], [0, 0, 1, 0], [], []>} : vector<8x16xbf16>, vector<8x16xbf16>, vector<8x8xf32> -> vector<8x8xf32>
    %cst_14 = arith.constant 2.500000e-01 : f32
    %20 = vector.broadcast %cst_14 : f32 to vector<8x8xf32>
    %21 = arith.mulf %19, %20 : vector<8x8xf32>
    %cst_15 = arith.constant 0.000000e+00 : f32
    %22 = vector.broadcast %cst_15 : f32 to vector<8x8xf32>
    %23 = arith.cmpf ogt, %6, %22 : vector<8x8xf32>
    %cst_16 = arith.constant -1.000000e+09 : f32
    %24 = vector.broadcast %cst_16 : f32 to vector<8x8xf32>
    %25 = arith.select %23, %21, %24 : vector<8x8xi1>, vector<8x8xf32>
    %cst_17 = arith.constant dense<0xFF800000> : vector<8xf32>
    %26 = vector.multi_reduction <maximumf>, %25, %cst_17 [1] : vector<8x8xf32> to vector<8xf32>
    %27 = vector.shape_cast %26 : vector<8xf32> to vector<8x1xf32>
    %28 = vector.broadcast %27 : vector<8x1xf32> to vector<8x8xf32>
    %29 = arith.subf %25, %28 : vector<8x8xf32>
    %30 = math.exp %29 : vector<8x8xf32>
    %cst_18 = arith.constant dense<0.000000e+00> : vector<8xf32>
    %31 = vector.multi_reduction <add>, %30, %cst_18 [1] : vector<8x8xf32> to vector<8xf32>
    %32 = vector.shape_cast %31 : vector<8xf32> to vector<8x1xf32>
    %33 = arith.truncf %30 : vector<8x8xf32> to vector<8x8xbf16>
    %cst_19 = arith.constant dense<0.000000e+00> : vector<8x16xf32>
    %34 = tpu.matmul %33, %18, %cst_19 {dimension_numbers = #tpu.dot_dimension_numbers<[1], [0], [0], [1], [0, 0, 1, 1], [], []>} : vector<8x8xbf16>, vector<8x16xbf16>, vector<8x16xf32> -> vector<8x16xf32>
    %35 = tpu.reciprocal %32 {approx = true} : vector<8x1xf32> -> vector<8x1xf32>
    %36 = vector.broadcast %35 : vector<8x1xf32> to vector<8x16xf32>
    %37 = arith.mulf %34, %36 : vector<8x16xf32>
    %38 = vector.extract_strided_slice %9 {offsets = [0, 16], sizes = [8, 16], strides = [1, 1]} : vector<8x32xbf16> to vector<8x16xbf16>
    %39 = vector.extract_strided_slice %12 {offsets = [0, 16], sizes = [8, 16], strides = [1, 1]} : vector<8x32xbf16> to vector<8x16xbf16>
    %40 = vector.extract_strided_slice %15 {offsets = [0, 16], sizes = [8, 16], strides = [1, 1]} : vector<8x32xbf16> to vector<8x16xbf16>
    %cst_20 = arith.constant dense<0.000000e+00> : vector<8x8xf32>
    %41 = tpu.matmul %38, %39, %cst_20 {dimension_numbers = #tpu.dot_dimension_numbers<[1], [1], [0], [0], [0, 0, 1, 0], [], []>} : vector<8x16xbf16>, vector<8x16xbf16>, vector<8x8xf32> -> vector<8x8xf32>
    %cst_21 = arith.constant 2.500000e-01 : f32
    %42 = vector.broadcast %cst_21 : f32 to vector<8x8xf32>
    %43 = arith.mulf %41, %42 : vector<8x8xf32>
    %cst_22 = arith.constant 0.000000e+00 : f32
    %44 = vector.broadcast %cst_22 : f32 to vector<8x8xf32>
    %45 = arith.cmpf ogt, %6, %44 : vector<8x8xf32>
    %cst_23 = arith.constant -1.000000e+09 : f32
    %46 = vector.broadcast %cst_23 : f32 to vector<8x8xf32>
    %47 = arith.select %45, %43, %46 : vector<8x8xi1>, vector<8x8xf32>
    %cst_24 = arith.constant dense<0xFF800000> : vector<8xf32>
    %48 = vector.multi_reduction <maximumf>, %47, %cst_24 [1] : vector<8x8xf32> to vector<8xf32>
    %49 = vector.shape_cast %48 : vector<8xf32> to vector<8x1xf32>
    %50 = vector.broadcast %49 : vector<8x1xf32> to vector<8x8xf32>
    %51 = arith.subf %47, %50 : vector<8x8xf32>
    %52 = math.exp %51 : vector<8x8xf32>
    %cst_25 = arith.constant dense<0.000000e+00> : vector<8xf32>
    %53 = vector.multi_reduction <add>, %52, %cst_25 [1] : vector<8x8xf32> to vector<8xf32>
    %54 = vector.shape_cast %53 : vector<8xf32> to vector<8x1xf32>
    %55 = arith.truncf %52 : vector<8x8xf32> to vector<8x8xbf16>
    %cst_26 = arith.constant dense<0.000000e+00> : vector<8x16xf32>
    %56 = tpu.matmul %55, %40, %cst_26 {dimension_numbers = #tpu.dot_dimension_numbers<[1], [0], [0], [1], [0, 0, 1, 1], [], []>} : vector<8x8xbf16>, vector<8x16xbf16>, vector<8x16xf32> -> vector<8x16xf32>
    %57 = tpu.reciprocal %54 {approx = true} : vector<8x1xf32> -> vector<8x1xf32>
    %58 = vector.broadcast %57 : vector<8x1xf32> to vector<8x16xf32>
    %59 = arith.mulf %56, %58 : vector<8x16xf32>
    %60 = tpu.concatenate %37, %59 in 1 : vector<8x16xf32>, vector<8x16xf32> -> vector<8x32xf32>
    %61 = arith.truncf %60 : vector<8x32xf32> to vector<8x32xbf16>
    %c0_27 = arith.constant 0 : index
    %c0_28 = arith.constant 0 : index
    %62 = vector.load %arg6[%c0_27, %c0_28] : memref<32x32xbf16, #tpu.memory_space<vmem>>, vector<32x32xbf16>
    %cst_29 = arith.constant dense<0.000000e+00> : vector<8x32xf32>
    %63 = tpu.matmul %61, %62, %cst_29 {dimension_numbers = #tpu.dot_dimension_numbers<[1], [0], [0], [1], [0, 0, 1, 1], [], []>} : vector<8x32xbf16>, vector<32x32xbf16>, vector<8x32xf32> -> vector<8x32xf32>
    %c0_30 = arith.constant 0 : index
    %c0_31 = arith.constant 0 : index
    %64 = vector.load %arg7[%c0_30, %c0_31] : memref<1x32xf32, #tpu.memory_space<vmem>>, vector<1x32xf32>
    %65 = vector.broadcast %64 : vector<1x32xf32> to vector<8x32xf32>
    %66 = arith.addf %63, %65 : vector<8x32xf32>
    %c0_32 = arith.constant 0 : index
    %c0_33 = arith.constant 0 : index
    %c0_34 = arith.constant 0 : index
    %67 = vector.load %arg8[%c0_32, %c0_33, %c0_34] : memref<1x8x32xf32, #tpu.memory_space<vmem>>, vector<1x8x32xf32>
    %68 = vector.shape_cast %67 : vector<1x8x32xf32> to vector<8x32xf32>
    %69 = arith.addf %68, %66 : vector<8x32xf32>
    %cst_35 = arith.constant dense<0.000000e+00> : vector<8xf32>
    %70 = vector.multi_reduction <add>, %69, %cst_35 [1] : vector<8x32xf32> to vector<8xf32>
    %71 = vector.shape_cast %70 : vector<8xf32> to vector<8x1xf32>
    %cst_36 = arith.constant 3.200000e+01 : f32
    %72 = vector.broadcast %cst_36 : f32 to vector<8x1xf32>
    %73 = arith.divf %71, %72 : vector<8x1xf32>
    %74 = vector.broadcast %73 : vector<8x1xf32> to vector<8x32xf32>
    %75 = arith.subf %69, %74 : vector<8x32xf32>
    %76 = arith.mulf %75, %75 : vector<8x32xf32>
    %cst_37 = arith.constant dense<0.000000e+00> : vector<8xf32>
    %77 = vector.multi_reduction <add>, %76, %cst_37 [1] : vector<8x32xf32> to vector<8xf32>
    %78 = vector.shape_cast %77 : vector<8xf32> to vector<8x1xf32>
    %cst_38 = arith.constant 3.200000e+01 : f32
    %79 = vector.broadcast %cst_38 : f32 to vector<8x1xf32>
    %80 = arith.divf %78, %79 : vector<8x1xf32>
    %cst_39 = arith.constant 9.99999974E-6 : f32
    %81 = vector.broadcast %cst_39 : f32 to vector<8x1xf32>
    %82 = arith.addf %80, %81 : vector<8x1xf32>
    %83 = math.rsqrt %82 : vector<8x1xf32>
    %84 = vector.broadcast %83 : vector<8x1xf32> to vector<8x32xf32>
    %85 = arith.mulf %75, %84 : vector<8x32xf32>
    %c0_40 = arith.constant 0 : index
    %c0_41 = arith.constant 0 : index
    %86 = vector.load %arg9[%c0_40, %c0_41] : memref<1x32xf32, #tpu.memory_space<vmem>>, vector<1x32xf32>
    %87 = vector.broadcast %86 : vector<1x32xf32> to vector<8x32xf32>
    %88 = arith.mulf %85, %87 : vector<8x32xf32>
    %c0_42 = arith.constant 0 : index
    %c0_43 = arith.constant 0 : index
    %89 = vector.load %arg10[%c0_42, %c0_43] : memref<1x32xf32, #tpu.memory_space<vmem>>, vector<1x32xf32>
    %90 = vector.broadcast %89 : vector<1x32xf32> to vector<8x32xf32>
    %91 = arith.addf %88, %90 : vector<8x32xf32>
    %c0_44 = arith.constant 0 : index
    %c0_45 = arith.constant 0 : index
    %c0_46 = arith.constant 0 : index
    %92 = vector.load %arg11[%c0_44, %c0_45, %c0_46] : memref<1x8x32xf32, #tpu.memory_space<vmem>>, vector<1x8x32xf32>
    %93 = vector.shape_cast %92 : vector<1x8x32xf32> to vector<8x32xf32>
    %94 = vector.shape_cast %91 : vector<8x32xf32> to vector<1x8x32xf32>
    tpu.vector_store %arg11[%c0_44, %c0_45, %c0_46], %94 {strides = array<i32>} : memref<1x8x32xf32, #tpu.memory_space<vmem>>, vector<1x8x32xf32>,
    return
  }
  func.func @transform_0(%arg0: i32) -> (i32, i32, i32) {
    %c0_i32 = arith.constant 0 : i32
    %c0_i32_0 = arith.constant 0 : i32
    %c0_i32_1 = arith.constant 0 : i32
    return %arg0, %c0_i32, %c0_i32_0 : i32, i32, i32
  }
  func.func @transform_1(%arg0: i32) -> (i32, i32, i32) {
    %c0_i32 = arith.constant 0 : i32
    %c0_i32_0 = arith.constant 0 : i32
    %c0_i32_1 = arith.constant 0 : i32
    return %arg0, %c0_i32, %c0_i32_0 : i32, i32, i32
  }
  func.func @transform_2(%arg0: i32) -> (i32, i32, i32) {
    %c0_i32 = arith.constant 0 : i32
    %c0_i32_0 = arith.constant 0 : i32
    %c0_i32_1 = arith.constant 0 : i32
    return %arg0, %c0_i32, %c0_i32_0 : i32, i32, i32
  }
  func.func @transform_3(%arg0: i32) -> (i32, i32, i32) {
    %c0_i32 = arith.constant 0 : i32
    %c0_i32_0 = arith.constant 0 : i32
    %c0_i32_1 = arith.constant 0 : i32
    return %arg0, %c0_i32, %c0_i32_0 : i32, i32, i32
  }
  func.func @transform_4(%arg0: i32) -> (i32, i32, i32) {
    %c0_i32 = arith.constant 0 : i32
    %c0_i32_0 = arith.constant 0 : i32
    %c0_i32_1 = arith.constant 0 : i32
    return %arg0, %c0_i32, %c0_i32_0 : i32, i32, i32
  }
  func.func @transform_5(%arg0: i32) -> (i32, i32) {
    %c0_i32 = arith.constant 0 : i32
    %c0_i32_0 = arith.constant 0 : i32
    %c0_i32_1 = arith.constant 0 : i32
    return %c0_i32, %c0_i32_0 : i32, i32
  }
  func.func @transform_6(%arg0: i32) -> (i32, i32) {
    %c0_i32 = arith.constant 0 : i32
    %c0_i32_0 = arith.constant 0 : i32
    %c0_i32_1 = arith.constant 0 : i32
    return %c0_i32, %c0_i32_0 : i32, i32
  }
  func.func @transform_7(%arg0: i32) -> (i32, i32, i32) {
    %c0_i32 = arith.constant 0 : i32
    %c0_i32_0 = arith.constant 0 : i32
    %c0_i32_1 = arith.constant 0 : i32
    return %arg0, %c0_i32, %c0_i32_0 : i32, i32, i32
  }
  func.func @transform_8(%arg0: i32) -> (i32, i32) {
    %c0_i32 = arith.constant 0 : i32
    %c0_i32_0 = arith.constant 0 : i32
    %c0_i32_1 = arith.constant 0 : i32
    return %c0_i32, %c0_i32_0 : i32, i32
  }
  func.func @transform_9(%arg0: i32) -> (i32, i32) {
    %c0_i32 = arith.constant 0 : i32
    %c0_i32_0 = arith.constant 0 : i32
    %c0_i32_1 = arith.constant 0 : i32
    return %c0_i32, %c0_i32_0 : i32, i32
  }
  func.func @transform_10(%arg0: i32) -> (i32, i32, i32) {
    %c0_i32 = arith.constant 0 : i32
    %c0_i32_0 = arith.constant 0 : i32
    %c0_i32_1 = arith.constant 0 : i32
    return %arg0, %c0_i32, %c0_i32_0 : i32, i32, i32
  }
}

module attributes {stable_mosaic.version = 11 : i64} {
  func.func @_linear_kernel(%arg0: i32, %arg1: i32, %arg2: memref<8x32xf32, #tpu.memory_space<vmem>>, %arg3: memref<32x64xbf16, #tpu.memory_space<vmem>>, %arg4: memref<1x64xf32, #tpu.memory_space<vmem>>, %arg5: memref<8x64xf32, #tpu.memory_space<vmem>>) attributes {dimension_semantics = [#tpu.dimension_semantics<parallel>, #tpu.dimension_semantics<parallel>], iteration_bounds = array<i64: 2, 1>, scalar_prefetch = 0 : i64, scratch_operands = 0 : i64, tpu.core_type = #tpu.core_type<tc>, window_params = [{transform_indices = @transform_0, window_bounds = array<i64: 8, 32>}, {transform_indices = @transform_1, window_bounds = array<i64: 32, 64>}, {transform_indices = @transform_2, window_bounds = array<i64: 1, 64>}, {transform_indices = @transform_3, window_bounds = array<i64: 8, 64>}]} {
    %c0 = arith.constant 0 : index
    %c0_0 = arith.constant 0 : index
    %0 = vector.load %arg2[%c0, %c0_0] : memref<8x32xf32, #tpu.memory_space<vmem>>, vector<8x32xf32>
    %1 = arith.truncf %0 : vector<8x32xf32> to vector<8x32xbf16>
    %c0_1 = arith.constant 0 : index
    %c0_2 = arith.constant 0 : index
    %2 = vector.load %arg3[%c0_1, %c0_2] : memref<32x64xbf16, #tpu.memory_space<vmem>>, vector<32x64xbf16>
    %cst = arith.constant dense<0.000000e+00> : vector<8x64xf32>
    %3 = tpu.matmul %1, %2, %cst {dimension_numbers = #tpu.dot_dimension_numbers<[1], [0], [0], [1], [0, 0, 1, 1], [], []>} : vector<8x32xbf16>, vector<32x64xbf16>, vector<8x64xf32> -> vector<8x64xf32>
    %c0_3 = arith.constant 0 : index
    %c0_4 = arith.constant 0 : index
    %4 = vector.load %arg4[%c0_3, %c0_4] : memref<1x64xf32, #tpu.memory_space<vmem>>, vector<1x64xf32>
    %5 = vector.broadcast %4 : vector<1x64xf32> to vector<8x64xf32>
    %6 = arith.addf %3, %5 : vector<8x64xf32>
    %c0_5 = arith.constant 0 : index
    %c0_6 = arith.constant 0 : index
    %7 = vector.load %arg5[%c0_5, %c0_6] : memref<8x64xf32, #tpu.memory_space<vmem>>, vector<8x64xf32>
    tpu.vector_store %arg5[%c0_5, %c0_6], %6 {strides = array<i32>} : memref<8x64xf32, #tpu.memory_space<vmem>>, vector<8x64xf32>,
    return
  }
  func.func @transform_0(%arg0: i32, %arg1: i32) -> (i32, i32) {
    %c0_i32 = arith.constant 0 : i32
    %c0_i32_0 = arith.constant 0 : i32
    return %arg0, %c0_i32 : i32, i32
  }
  func.func @transform_1(%arg0: i32, %arg1: i32) -> (i32, i32) {
    %c0_i32 = arith.constant 0 : i32
    %c0_i32_0 = arith.constant 0 : i32
    return %c0_i32, %arg1 : i32, i32
  }
  func.func @transform_2(%arg0: i32, %arg1: i32) -> (i32, i32) {
    %c0_i32 = arith.constant 0 : i32
    %c0_i32_0 = arith.constant 0 : i32
    return %c0_i32, %arg1 : i32, i32
  }
  func.func @transform_3(%arg0: i32, %arg1: i32) -> (i32, i32) {
    %c0_i32 = arith.constant 0 : i32
    return %arg0, %arg1 : i32, i32
  }
}

</mosaic_0001>

<bundles_post_ra>
// kernel: _lambda_.39
= control target key start
LH: loop header
LB: loop body
LE: loop exit
PB: predicated region body
PF: predicated region fallthrough
CT: control target
= control target key end

     0   :  { %s448_s12 = smov 0   ;;  %s450_s13 = smov 0   ;;  %s487_s0 = inlined_call_operand.vmem [shape: f32[16,32], index: 0, kind: input, shape index: {}]   ;;  %s488_s1 = inlined_call_operand.vmem [shape: bf16[32,32], index: 1, kind: input, shape index: {}]   ;;  %s489_s2 = inlined_call_operand.vmem [shape: f32[1,32], index: 2, kind: input, shape index: {}]   ;;  %s490_s3 = inlined_call_operand.vmem [shape: f32[16,32], index: 3, kind: output, shape index: {}]  }
   0x1   :  { %s452_s14 = smov 0  }
   0x2 LB: > { %s25_s15 = sadd.s32 1, %s422_s13  ;;  %p363_p0 = scmp.ge.s32.totalorder %s426_s14, 1  ;;  %s426_s14 = sphi %s452_s14, %s13_s14   ;;  %s422_s13 = sphi %s450_s13, %s492_s13   ;;  %s418_s12 = sphi %s448_s12, %s491_s12  }
   0x3   : > { %p27_p1 = scmp.ge.s32.totalorder %s25_s15, 2  ;;  %p167_p2 = scmp.lt.s32.totalorder %s426_s14, 3 }
   0x5   : > { %s494_s15 = smov (%p27_p1, %s25_s15), 0  ;;  %p168_p3 = pnand %p363_p0, %p167_p2 }
   0x6   : > { %p199_p4 = scmp.lt.s32.totalorder (!%p168_p3), %s418_s12, 1 }
   0x7   : > { %171 = sbr.rel (%p168_p3) target bundleno = 154 (0x9a), region = 32 }
   0xc   : > { %v378_v0 = vld [vmem:[%s488_s1 + $0x8] sm:$0xff]  ;;  %v377_v1 = vld [vmem:[%s488_s1] sm:$0xff]  ;;  %s496_s12 = smov (!%p199_p4, %s418_s12), 1  ;;  %vm240_vm0 = vcmask 261120  }
   0xd   : > { %250 = vmatpush.bf16.msra.mxu0 %v378_v0  ;;  %s364_s20 = sshll.u32 %s496_s12, 3  ;;  %v403_v4 = vld [vmem:[%s489_s2] ss:$0 sm:$0xff] }
   0xe   : > { %s202_s23 = scalar_lea.vmem %s487_s0, %s364_s20  ;;  %s216_s28 = scalar_lea.vmem %s490_s3, %s364_s20 }
   0xf   : > { %v218_v2 = vld [vmem:[%s202_s23] sm:$0xff] }
  0x10   : > { %v219_v3 = vpack.c.bf16 %v218_v2, %v218_v2 }
  0x11   : > { %251 = vmatpush.bf16.msra.mxu0 %v377_v1 }
  0x14   : > { %374 = vmatmul.msk.bf16.vlgmr.msra.gmra.mxu0 %vm240_vm0, %v219_v3 }
  0x91   : > { %v253_v5 = vpop.f32.mrf.mxu0 }
  0x92   : > { %v254_v6 = vadd.f32 %v403_v4, %v253_v5 }
  0x94   : > { %257 = vst.msk [vmem:[%s216_s28] sm:$0xff] %vm240_vm0, %v254_v6 }
  0x99   : > { %v255_v7 = vpop.f32.mrf.mxu0 }
  0x9a PF: > { %s13_s14 = sadd.s32 1, %s426_s14   ;;  %s491_s12 = smov %s422_s13 }
  0x9b   : > { %p10_p5 = scmp.ge.s32.totalorder %s13_s14, 4   ;;  %s492_s13 = smov %s494_s15 }
  0x9d   :  { %12 = sbr.rel (!%p10_p5) target bundleno = 2 (0x2), region = 68 }

// kernel: _lambda_.42
= control target key start
LH: loop header
LB: loop body
LE: loop exit
PB: predicated region body
PF: predicated region fallthrough
CT: control target
= control target key end

     0   :  { %s904_s13 = smov 0   ;;  %s982_s0 = inlined_call_operand.vmem [shape: f32[2,8,32], index: 0, kind: input, shape index: {}]   ;;  %s983_s1 = inlined_call_operand.vmem [shape: f32[2,8,32], index: 1, kind: input, shape index: {}]   ;;  %s984_s2 = inlined_call_operand.vmem [shape: f32[2,8,32], index: 2, kind: input, shape index: {}]   ;;  %s985_s3 = inlined_call_operand.vmem [shape: f32[2,8,1], index: 3, kind: input, shape index: {}]   ;;  %s986_s4 = inlined_call_operand.vmem [shape: f32[2,1,8], index: 4, kind: input, shape index: {}]   ;;  %s987_s5 = inlined_call_operand.vmem [shape: bf16[32,32], index: 5, kind: input, shape index: {}]   ;;  %s988_s6 = inlined_call_operand.vmem [shape: f32[1,32], index: 6, kind: input, shape index: {}]   ;;  %s989_s7 = inlined_call_operand.vmem [shape: f32[2,8,32], index: 7, kind: input, shape index: {}]   ;;  %s990_s8 = inlined_call_operand.vmem [shape: f32[1,32], index: 8, kind: input, shape index: {}]   ;;  %s991_s9 = inlined_call_operand.vmem [shape: f32[1,32], index: 9, kind: input, shape index: {}]   ;;  %s992_s10 = inlined_call_operand.vmem [shape: f32[2,8,32], index: 10, kind: output, shape index: {}]  }
   0x1 LB: > { %s779_s14 = sadd.s32 4294967295, %s843_s13   ;;  %p783_p0 = scmp.ge.s32.totalorder %s843_s13, 1  ;;  %s843_s13 = sphi %s904_s13, %s20_s13  }
   0x2   : > { %p355_p1 = scmp.lt.s32.totalorder %s843_s13, 3 }
   0x4   : > { %p356_p2 = pnand %p783_p0, %p355_p1 }
   0x5   : > { %p410_p3 = scmp.lt.s32.totalorder (!%p356_p2), %s779_s14, 1  ;;  %s846_s11 = smov (!%p356_p2), 112  }
   0x6   : > { %359 = sbr.rel (%p356_p2) target bundleno = 1060 (0x424), region = 60 }
   0xb   : > { %v845_v0 = vmov 0   ;;  %s994_s14 = smov (!%p410_p3, %s779_s14), 1  ;;  %vm461_vm0 = vcmask 130048   ;;  %v449_v17 = vlaneseq  ;;  %vm484_vm3 = vcmask 64512   ;;  %v806_v52 = vld [vmem:[%s987_s5 + $0x8] sm:$0xff]  ;;  %v805_v53 = vld [vmem:[%s987_s5] sm:$0xff] }
   0xc   : > { %819 = vset.pattern.permute.xlu1 %v845_v0  ;;  %820 = vset.pattern.permute.xlu0 %v845_v0  ;;  %s915_s15 = sshll.u32 %s994_s14, 3  ;;  %s428_s30 = scalar_lea.vmem %s986_s4, %s994_s14  ;;  %vm498_vm4 = vcmask 1043456   ;;  %vm610_vm5 = vcmask 261120  }
   0xd   : > { %s417_s18 = scalar_lea.vmem %s983_s1, %s915_s15  ;;  %s413_s21 = scalar_lea.vmem %s982_s0, %s915_s15  ;;  %v821_v18 = vld [vmem:[%s428_s30] ss:$0 sm:$0xff]  ;;  %v450_v19 = vshrl.u32 %v449_v17, 7  ;;  %v452_v20 = vand.u32 127, %v449_v17 }
   0xe   : > { %v457_v1 = vld [vmem:[%s417_s18] sm:$0xff]  ;;  %s425_s24 = scalar_lea.vmem %s985_s3, %s915_s15  ;;  %s421_s27 = scalar_lea.vmem %s984_s2, %s915_s15 }
   0xf   : > { %v458_v2 = vpack.c.bf16 %v457_v1, %v457_v1  ;;  %v455_v3 = vld [vmem:[%s413_s21] sm:$0xff]  ;;  %vm453_vm1 = vcmp.ge.s32.totalorder %v450_v19, %v452_v20  ;;  %s847_s18 = smov 16   ;;  %s432_s23 = scalar_lea.vmem %s989_s7, %s915_s15 }
  0x10   : > { %v438_v4 = vld [vmem:[%s425_s24] sm:$0xff]  ;;  %v456_v8 = vpack.c.bf16 %v455_v3, %v455_v3  ;;  %s436_s30 = scalar_lea.vmem %s992_s10, %s915_s15 }
  0x11   : > { %442 = vperm.xlu1 %819, %v438_v4   ;;  %v459_v5 = vld [vmem:[%s421_s27] sm:$0xff]  ;;  %v466_v6 = vsel %vm461_vm0, %v458_v2, 0  ;;  %v523_v7 = vunpack.c.l.b16 %v458_v2 }
  0x12   : > { %v460_v9 = vpack.c.bf16 %v459_v5, %v459_v5  ;;  %475 = vmatpush.bf16.xpose.msra.mxu0 %v466_v6  ;;  %v518_v12 = vunpack.c.l.b16 %v456_v8  ;;  %v822_v1 = vld [vmem:[%s988_s6] ss:$0 sm:$0xff] }
  0x13   : > { %v524_v10 = vpack.c.b16 %v523_v7, %v523_v7  ;;  %v627_v3 = vld [vmem:[%s432_s23] sm:$0xff] }
  0x14   : > { %v559_v11 = vunpack.c.l.b16 %v460_v9  ;;  %v519_v14 = vpack.c.b16 %v518_v12, %v518_v12  ;;  %v500_v30 = vsel %vm498_vm4, %v460_v9, 0 }
  0x15   : > { %525 = vrot.lane.b32.xlu0 %v524_v10, %s846_s11  ;;  %509 = vmatpush.bf16.msra.mxu1 %v500_v30 }
  0x16   : > { %v560_v13 = vpack.c.b16 %v559_v11, %v559_v11 }
  0x18   : > { %561 = vrot.lane.b32.xlu2 %v560_v13, %s846_s11 }
  0x19   : > { %790 = vmatmul.msk.bf16.vlgmr.msra.gmra.mxu0 %vm461_vm0, %v456_v8  ;;  %620 = vmatpush.bf16.msrb.mxu1 %v806_v52  ;;  %v848_v8 = vmov 32.0  }
  0x1d   : > { %520 = vrot.lane.b32.xlu0 %v519_v14, %s846_s11  ;;  %621 = vmatpush.bf16.msrb.mxu1 %v805_v53 }
  0x72   : > { %v562_v31 = vpop.permute.xlu2 %561 }
  0x73   : > { %v567_v43 = vsel %vm498_vm4, %v562_v31, 0  ;;  %v824_v31 = vld [vmem:[%s991_s9] ss:$0 sm:$0xff] }
  0x74   : > { %576 = vmatpush.bf16.msra.mxu3 %v567_v43 }
  0x83   : > { %v443_v21 = vpop.permute.xlu1 %442 }
  0x84   : > { %v448_v23 = vmul.f32 %v821_v18, %v443_v21 }
  0x86   : > { %v454_v24 = vsel %vm453_vm1, %v448_v23, 0.0 }
  0x87   : > { %v526_v15 = vpop.permute.xlu0 %525  ;;  %vm482_vm2 = vcmp.gt.f32.partialorder %v454_v24, 0.0 }
  0x88   : > { %v531_v16 = vsel %vm461_vm0, %v526_v15, 0 }
  0x89   : > { %540 = vmatpush.bf16.xpose.msra.mxu2 %v531_v16 }
  0x8f   : > { %v521_v22 = vpop.permute.xlu0 %520 }
  0x90   : > { %792 = vmatmul.msk.bf16.vlgmr.msra.gmra.mxu2 %vm461_vm0, %v521_v22 }
  0x96   : > { %v477_v25 = vpop.f32.mrf.mxu0 }
  0x97   : > { %v481_v26 = vmul.f32 0.25, %v477_v25 }
  0x99   : > { %v483_v27 = vsel %vm482_vm2, %v481_v26, -1e+09 }
  0x9a   : > { %v485_v28 = vsel %vm484_vm3, %v483_v27, -inf }
  0x9b   : > { %486 = vmax.xlane.f32.xlu2 %v485_v28 }
  0x9e   : > { %v479_v29 = vpop.f32.mrf.mxu0 }
  0x9f   : > { %v823_v29 = vld [vmem:[%s990_s8] ss:$0 sm:$0xff] }
 0x10e   : > { %v487_v32 = vpop.xlane.xlu2 %486 }
 0x10f   : > { %v488_v33 = vsub.f32 %v483_v27, %v487_v32 }
 0x111   : > { %v489_v34 = vmul.f32 1.442695, %v488_v33 }
 0x113   : > { %825 = vpow2.f32 %v489_v34  ;;  %v542_v35 = vpop.f32.mrf.mxu2 }
 0x114   : > { %v546_v36 = vmul.f32 0.25, %v542_v35 }
 0x116   : > { %v547_v37 = vsel %vm482_vm2, %v546_v36, -1e+09 }
 0x117   : > { %v548_v38 = vsel %vm484_vm3, %v547_v37, -inf }
 0x118   : > { %549 = vmax.xlane.f32.xlu1 %v548_v38 }
 0x119   : > { %v826_v39 = vpop.eup %825 }
 0x11a   : > { %v494_v40 = vpack.c.bf16 %v826_v39, %v826_v39  ;;  %v491_v41 = vsel %vm484_vm3, %v826_v39, 0.0 }
 0x11b   : > { %v544_v42 = vpop.f32.mrf.mxu2  ;;  %492 = vadd.xlane.f32.xlu2 %v491_v41 }
 0x11c   : > { %791 = vmatmul.msk.bf16.vlgmr.msra.gmra.mxu1 %vm484_vm3, %v494_v40 }
 0x18b   : > { %v550_v44 = vpop.xlane.xlu1 %549 }
 0x18c   : > { %v551_v45 = vsub.f32 %v547_v37, %v550_v44 }
 0x18e   : > { %v552_v46 = vmul.f32 1.442695, %v551_v45  ;;  %v493_v59 = vpop.xlane.xlu2 %492 }
 0x190   : > { %827 = vpow2.f32 %v552_v46 }
 0x196   : > { %v828_v47 = vpop.eup %827 }
 0x197   : > { %v554_v48 = vsel %vm484_vm3, %v828_v47, 0.0  ;;  %v557_v49 = vpack.c.bf16 %v828_v47, %v828_v47 }
 0x198   : > { %555 = vadd.xlane.f32.xlu0 %v554_v48 }
 0x199   : > { %v511_v50 = vpop.f32.mrf.mxu1  ;;  %793 = vmatmul.msk.bf16.vlgmr.msra.gmra.mxu3 %vm484_vm3, %v557_v49 }
 0x1a1   : > { %v513_v51 = vpop.f32.mrf.mxu1 }
 0x20b   : > { %v556_v54 = vpop.xlane.xlu0 %555 }
 0x20c   : > { %829 = vrcp.f32 %v556_v54 }
 0x20d   : > { %831 = vrcp.f32 %v493_v59 }
 0x20e   : > { %833 = vrcp.f32 %v848_v8 }
 0x212   : > { %v830_v55 = vpop.eup %829 }
 0x213   : > { %v832_v60 = vpop.eup %831 }
 0x214   : > { %v516_v61 = vmul.f32 %v832_v60, %v511_v50  ;;  %v834_v9 = vpop.eup %833 }
 0x215   : > { %v633_v10 = vmul.f32 32.0, %v834_v9  ;;  %vm637_vm6 = vweird.f32 %v834_v9 }
 0x217   : > { %v634_v11 = vsub.f32 1.0, %v633_v10 }
 0x219   : > { %v635_v12 = vmul.f32 %v834_v9, %v634_v11 }
 0x21b   : > { %v636_v13 = vadd.f32 %v834_v9, %v635_v12 }
 0x21c   : > { %v578_v56 = vpop.f32.mrf.mxu3 }
 0x21d   : > { %v583_v57 = vmul.f32 %v830_v55, %v578_v56  ;;  %v638_v14 = vsel %vm637_vm6, %v834_v9, %v636_v13 }
 0x21f   : > { %585 = vrot.lane.b32.xlu1 %v583_v57, %s847_s18 }
 0x224   : > { %v580_v58 = vpop.f32.mrf.mxu3 }
 0x291   : > { %v586_v62 = vpop.permute.xlu1 %585 }
 0x292   : > { %v588_v63 = vsel %vm461_vm0, %v516_v61, %v586_v62 }
 0x293   : > { %v589_v0 = vpack.c.bf16 %v588_v63, %v588_v63 }
 0x295   : > { %802 = vmatmul.msk.bf16.vlgmr.msrb.gmra.mxu1 %vm610_vm5, %v589_v0 }
 0x312   : > { %v623_v2 = vpop.f32.mrf.mxu1 }
 0x313   : > { %v624_v4 = vadd.f32 %v822_v1, %v623_v2 }
 0x315   : > { %v628_v5 = vadd.f32 %v627_v3, %v624_v4 }
 0x317   : > { %v629_v6 = vsel %vm610_vm5, %v628_v5, 0.0 }
 0x318   : > { %630 = vadd.xlane.f32.xlu2 %v629_v6 }
 0x31a   : > { %v625_v7 = vpop.f32.mrf.mxu1 }
 0x38b   : > { %v631_v15 = vpop.xlane.xlu2 %630 }
 0x38c   : > { %v639_v16 = vmul.f32 %v638_v14, %v631_v15 }
 0x38e   : > { %v640_v17 = vsub.f32 %v628_v5, %v639_v16 }
 0x390   : > { %v641_v18 = vmul.f32 %v640_v17, %v640_v17 }
 0x392   : > { %v642_v19 = vsel %vm610_vm5, %v641_v18, 0.0 }
 0x393   : > { %643 = vadd.xlane.f32.xlu0 %v642_v19 }
 0x406   : > { %v644_v20 = vpop.xlane.xlu0 %643 }
 0x407   : > { %v645_v21 = vmul.f32 %v644_v20, %v638_v14 }
 0x409   : > { %v646_v22 = vadd.f32 1e-05, %v645_v21 }
 0x40b   : > { %835 = vrsqrt.f32 %v646_v22  ;;  %vm653_vm8 = vweird.f32 %v646_v22 }
 0x411   : > { %v836_v23 = vpop.eup %835 }
 0x412   : > { %v648_v24 = vmul.f32 %v836_v23, %v646_v22  ;;  %vm654_vm7 = vweird.f32 %v836_v23 }
 0x413   : > { %vm655_vm9 = vmor %vm653_vm8, %vm654_vm7 }
 0x414   : > { %v649_v25 = vmul.f32 %v836_v23, %v648_v24 }
 0x416   : > { %v650_v26 = vmul.f32 0.5, %v649_v25 }
 0x418   : > { %v651_v27 = vsub.f32 1.5, %v650_v26 }
 0x41a   : > { %v652_v28 = vmul.f32 %v836_v23, %v651_v27 }
 0x41c   : > { %v656_v30 = vsel %vm655_vm9, %v836_v23, %v652_v28 }
 0x41d   : > { %v657_v32 = vmul.f32 %v656_v30, %v640_v17 }
 0x41f   : > { %v662_v33 = vmul.f32 %v823_v29, %v657_v32 }
 0x421   : > { %v667_v34 = vadd.f32 %v824_v31, %v662_v33 }
 0x423   : > { %668 = vst.msk [vmem:[%s436_s30] sm:$0xff] %vm610_vm5, %v667_v34 }
 0x424 PF: > { %s20_s13 = sadd.s32 1, %s843_s13  }
 0x425   : > { %p17_p4 = scmp.ge.s32.totalorder %s20_s13, 4  }
 0x427   :  { %19 = sbr.rel (!%p17_p4) target bundleno = 1 (0x1), region = 105 }

// kernel: _lambda_.33
= control target key start
LH: loop header
LB: loop body
LE: loop exit
PB: predicated region body
PF: predicated region fallthrough
CT: control target
= control target key end

     0   :  { %s570_s24 = smov 0   ;;  %s628_s0 = inlined_call_operand.vmem [shape: f32[16,32], index: 0, kind: input, shape index: {}]   ;;  %s629_s1 = inlined_call_operand.vmem [shape: bf16[32,64], index: 1, kind: input, shape index: {}]   ;;  %s630_s2 = inlined_call_operand.vmem [shape: f32[1,64], index: 2, kind: input, shape index: {}]   ;;  %s631_s3 = inlined_call_operand.vmem [shape: bf16[64,32], index: 3, kind: input, shape index: {}]   ;;  %s632_s4 = inlined_call_operand.vmem [shape: f32[1,32], index: 4, kind: input, shape index: {}]   ;;  %s633_s5 = inlined_call_operand.vmem [shape: f32[1,32], index: 5, kind: input, shape index: {}]   ;;  %s634_s6 = inlined_call_operand.vmem [shape: f32[1,32], index: 6, kind: input, shape index: {}]   ;;  %s635_s7 = inlined_call_operand.vmem [shape: f32[16,32], index: 7, kind: output, shape index: {}]  }
   0x1 LB: > { %s463_s25 = sadd.s32 4294967295, %s527_s24   ;;  %p467_p0 = scmp.ge.s32.totalorder %s527_s24, 1  ;;  %s527_s24 = sphi %s570_s24, %s17_s24  }
   0x2   : > { %p236_p1 = scmp.lt.s32.totalorder %s527_s24, 3 }
   0x4   : > { %p237_p2 = pnand %p467_p0, %p236_p1 }
   0x5   : > { %p266_p3 = scmp.lt.s32.totalorder (!%p237_p2), %s463_s25, 1 }
   0x6   : > { %240 = sbr.rel (%p237_p2) target bundleno = 550 (0x226), region = 48 }
   0xb   : > { %v499_v0 = vld [vmem:[%s629_s1 + $0x8] sm:$0xff]  ;;  %v503_v1 = vld [vmem:[%s631_s3 + $0x18] sm:$0xff]  ;;  %v498_v2 = vld [vmem:[%s629_s1] sm:$0xff]  ;;  %s637_s25 = smov (!%p266_p3, %s463_s25), 1  ;;  %vm297_vm0 = vcmask 261120   ;;  %vm352_vm1 = vcmask 523264  }
   0xc   : > { %307 = vmatpush.bf16.msra.mxu0 %v499_v0  ;;  %360 = vmatpush.bf16.msra.mxu1 %v503_v1  ;;  %v502_v3 = vld [vmem:[%s631_s3 + $0x10] sm:$0xff]  ;;  %s468_s11 = sshll.u32 %s637_s25, 3  ;;  %v501_v6 = vld [vmem:[%s631_s3 + $0x8] sm:$0xff]  ;;  %v500_v7 = vld [vmem:[%s631_s3] sm:$0xff]  ;;  %v529_v20 = vmov 32.0  }
   0xd   : > { %s269_s14 = scalar_lea.vmem %s628_s0, %s468_s11  ;;  %v513_v8 = vld [vmem:[%s630_s2] ss:$0 sm:$0xff]  ;;  %517 = vrcp.f32 %v529_v20  ;;  %s273_s8 = scalar_lea.vmem %s635_s7, %s468_s11 }
   0xe   : > { %v275_v4 = vld [vmem:[%s269_s14] sm:$0xff] }
   0xf   : > { %v276_v5 = vpack.c.bf16 %v275_v4, %v275_v4  ;;  %v514_v14 = vld [vmem:[%s632_s4] ss:$0 sm:$0xff] }
  0x10   : > { %308 = vmatpush.bf16.msra.mxu0 %v498_v2  ;;  %361 = vmatpush.bf16.msra.mxu1 %v502_v3  ;;  %v515_v41 = vld [vmem:[%s633_s5] ss:$0 sm:$0xff] }
  0x11   : > { %v516_v43 = vld [vmem:[%s634_s6] ss:$0 sm:$0xff] }
  0x13   : > { %478 = vmatmul.msk.bf16.vlgmr.msra.gmra.mxu0 %vm297_vm0, %v276_v5  ;;  %v518_v21 = vpop.eup %517 }
  0x14   : > { %362 = vmatpush.bf16.msra.mxu1 %v501_v6  ;;  %v374_v22 = vmul.f32 32.0, %v518_v21  ;;  %vm378_vm2 = vweird.f32 %v518_v21 }
  0x16   : > { %v375_v23 = vsub.f32 1.0, %v374_v22 }
  0x18   : > { %363 = vmatpush.bf16.msra.mxu1 %v500_v7  ;;  %v376_v24 = vmul.f32 %v518_v21, %v375_v23 }
  0x1a   : > { %v377_v25 = vadd.f32 %v518_v21, %v376_v24 }
  0x1c   : > { %v379_v26 = vsel %vm378_vm2, %v518_v21, %v377_v25 }
  0x90   : > { %v310_v9 = vpop.f32.mrf.mxu0 }
  0x91   : > { %v311_v10 = vadd.f32 %v513_v8, %v310_v9 }
  0x93   : > { %v314_v11 = vmax.f32 %v311_v10, 0.0 }
  0x95   : > { %v315_v12 = vpack.c.bf16 %v314_v11, %v314_v11 }
  0x97   : > { %495 = vmatmul.msk.bf16.vlgmr.msra.gmra.mxu1 %vm352_vm1, %v315_v12 }
  0x98   : > { %v312_v13 = vpop.f32.mrf.mxu0 }
 0x114   : > { %v365_v15 = vpop.f32.mrf.mxu1 }
 0x115   : > { %v366_v16 = vadd.f32 %v514_v14, %v365_v15 }
 0x117   : > { %v369_v17 = vadd.f32 %v366_v16, %v275_v4 }
 0x119   : > { %v370_v18 = vsel %vm297_vm0, %v369_v17, 0.0 }
 0x11a   : > { %371 = vadd.xlane.f32.xlu0 %v370_v18 }
 0x11c   : > { %v367_v19 = vpop.f32.mrf.mxu1 }
 0x18d   : > { %v372_v27 = vpop.xlane.xlu0 %371 }
 0x18e   : > { %v380_v28 = vmul.f32 %v379_v26, %v372_v27 }
 0x190   : > { %v381_v29 = vsub.f32 %v369_v17, %v380_v28 }
 0x192   : > { %v382_v30 = vmul.f32 %v381_v29, %v381_v29 }
 0x194   : > { %v383_v31 = vsel %vm297_vm0, %v382_v30, 0.0 }
 0x195   : > { %384 = vadd.xlane.f32.xlu0 %v383_v31 }
 0x208   : > { %v385_v32 = vpop.xlane.xlu0 %384 }
 0x209   : > { %v386_v33 = vmul.f32 %v385_v32, %v379_v26 }
 0x20b   : > { %v387_v34 = vadd.f32 1e-05, %v386_v33 }
 0x20d   : > { %519 = vrsqrt.f32 %v387_v34  ;;  %vm394_vm4 = vweird.f32 %v387_v34 }
 0x213   : > { %v520_v35 = vpop.eup %519 }
 0x214   : > { %v389_v36 = vmul.f32 %v520_v35, %v387_v34  ;;  %vm395_vm3 = vweird.f32 %v520_v35 }
 0x215   : > { %vm396_vm5 = vmor %vm394_vm4, %vm395_vm3 }
 0x216   : > { %v390_v37 = vmul.f32 %v520_v35, %v389_v36 }
 0x218   : > { %v391_v38 = vmul.f32 0.5, %v390_v37 }
 0x21a   : > { %v392_v39 = vsub.f32 1.5, %v391_v38 }
 0x21c   : > { %v393_v40 = vmul.f32 %v520_v35, %v392_v39 }
 0x21e   : > { %v397_v42 = vsel %vm396_vm5, %v520_v35, %v393_v40 }
 0x21f   : > { %v398_v44 = vmul.f32 %v397_v42, %v381_v29 }
 0x221   : > { %v403_v45 = vmul.f32 %v515_v41, %v398_v44 }
 0x223   : > { %v408_v46 = vadd.f32 %v516_v43, %v403_v45 }
 0x225   : > { %409 = vst.msk [vmem:[%s273_s8] sm:$0xff] %vm297_vm0, %v408_v46 }
 0x226 PF: > { %s17_s24 = sadd.s32 1, %s527_s24  }
 0x227   : > { %p14_p4 = scmp.ge.s32.totalorder %s17_s24, 4  }
 0x229   :  { %16 = sbr.rel (!%p14_p4) target bundleno = 1 (0x1), region = 78 }

// kernel: _lambda_.32
= control target key start
LH: loop header
LB: loop body
LE: loop exit
PB: predicated region body
PF: predicated region fallthrough
CT: control target
= control target key end

     0   :  { %s898_s13 = smov 0   ;;  %s976_s0 = inlined_call_operand.vmem [shape: f32[2,8,32], index: 0, kind: input, shape index: {}]   ;;  %s977_s1 = inlined_call_operand.vmem [shape: f32[2,8,32], index: 1, kind: input, shape index: {}]   ;;  %s978_s2 = inlined_call_operand.vmem [shape: f32[2,8,32], index: 2, kind: input, shape index: {}]   ;;  %s979_s3 = inlined_call_operand.vmem [shape: f32[2,8,1], index: 3, kind: input, shape index: {}]   ;;  %s980_s4 = inlined_call_operand.vmem [shape: f32[2,1,8], index: 4, kind: input, shape index: {}]   ;;  %s981_s5 = inlined_call_operand.vmem [shape: bf16[32,32], index: 5, kind: input, shape index: {}]   ;;  %s982_s6 = inlined_call_operand.vmem [shape: f32[1,32], index: 6, kind: input, shape index: {}]   ;;  %s983_s7 = inlined_call_operand.vmem [shape: f32[2,8,32], index: 7, kind: input, shape index: {}]   ;;  %s984_s8 = inlined_call_operand.vmem [shape: f32[1,32], index: 8, kind: input, shape index: {}]   ;;  %s985_s9 = inlined_call_operand.vmem [shape: f32[1,32], index: 9, kind: input, shape index: {}]   ;;  %s986_s10 = inlined_call_operand.vmem [shape: f32[2,8,32], index: 10, kind: output, shape index: {}]  }
   0x1 LB: > { %s773_s14 = sadd.s32 4294967295, %s837_s13   ;;  %p777_p0 = scmp.ge.s32.totalorder %s837_s13, 1  ;;  %s837_s13 = sphi %s898_s13, %s20_s13  }
   0x2   : > { %p355_p1 = scmp.lt.s32.totalorder %s837_s13, 3 }
   0x4   : > { %p356_p2 = pnand %p777_p0, %p355_p1 }
   0x5   : > { %p410_p3 = scmp.lt.s32.totalorder (!%p356_p2), %s773_s14, 1  ;;  %s840_s11 = smov (!%p356_p2), 112  }
   0x6   : > { %359 = sbr.rel (%p356_p2) target bundleno = 1060 (0x424), region = 60 }
   0xb   : > { %v839_v0 = vmov 0   ;;  %s988_s14 = smov (!%p410_p3, %s773_s14), 1  ;;  %vm455_vm0 = vcmask 130048   ;;  %vm478_vm2 = vcmask 64512   ;;  %vm492_vm3 = vcmask 1043456   ;;  %v800_v48 = vld [vmem:[%s981_s5 + $0x8] sm:$0xff] }
   0xc   : > { %813 = vset.pattern.permute.xlu1 %v839_v0  ;;  %814 = vset.pattern.permute.xlu0 %v839_v0  ;;  %s909_s15 = sshll.u32 %s988_s14, 3  ;;  %s428_s30 = scalar_lea.vmem %s980_s4, %s988_s14  ;;  %v799_v49 = vld [vmem:[%s981_s5] sm:$0xff]  ;;  %vm604_vm4 = vcmask 261120  }
   0xd   : > { %s417_s18 = scalar_lea.vmem %s977_s1, %s909_s15  ;;  %s413_s21 = scalar_lea.vmem %s976_s0, %s909_s15  ;;  %v815_v17 = vld [vmem:[%s428_s30] ss:$0 sm:$0xff] }
   0xe   : > { %v451_v1 = vld [vmem:[%s417_s18] sm:$0xff]  ;;  %s425_s24 = scalar_lea.vmem %s979_s3, %s909_s15  ;;  %s421_s27 = scalar_lea.vmem %s978_s2, %s909_s15 }
   0xf   : > { %v452_v2 = vpack.c.bf16 %v451_v1, %v451_v1  ;;  %v449_v3 = vld [vmem:[%s413_s21] sm:$0xff]  ;;  %s841_s18 = smov 16   ;;  %s432_s23 = scalar_lea.vmem %s983_s7, %s909_s15 }
  0x10   : > { %v438_v4 = vld [vmem:[%s425_s24] sm:$0xff]  ;;  %v450_v8 = vpack.c.bf16 %v449_v3, %v449_v3  ;;  %s436_s30 = scalar_lea.vmem %s986_s10, %s909_s15 }
  0x11   : > { %442 = vperm.xlu1 %813, %v438_v4   ;;  %v453_v5 = vld [vmem:[%s421_s27] sm:$0xff]  ;;  %v460_v6 = vsel %vm455_vm0, %v452_v2, 0  ;;  %v517_v7 = vunpack.c.l.b16 %v452_v2  ;;  %v842_v4 = vmov 32.0  }
  0x12   : > { %v454_v9 = vpack.c.bf16 %v453_v5, %v453_v5  ;;  %469 = vmatpush.bf16.xpose.msra.mxu0 %v460_v6  ;;  %v512_v12 = vunpack.c.l.b16 %v450_v8  ;;  %v816_v61 = vld [vmem:[%s982_s6] ss:$0 sm:$0xff] }
  0x13   : > { %v518_v10 = vpack.c.b16 %v517_v7, %v517_v7  ;;  %v621_v63 = vld [vmem:[%s432_s23] sm:$0xff] }
  0x14   : > { %v553_v11 = vunpack.c.l.b16 %v454_v9  ;;  %v513_v14 = vpack.c.b16 %v512_v12, %v512_v12  ;;  %v494_v26 = vsel %vm492_vm3, %v454_v9, 0 }
  0x15   : > { %519 = vrot.lane.b32.xlu0 %v518_v10, %s840_s11  ;;  %503 = vmatpush.bf16.msra.mxu1 %v494_v26 }
  0x16   : > { %v554_v13 = vpack.c.b16 %v553_v11, %v553_v11 }
  0x18   : > { %555 = vrot.lane.b32.xlu2 %v554_v13, %s840_s11 }
  0x19   : > { %784 = vmatmul.msk.bf16.vlgmr.msra.gmra.mxu0 %vm455_vm0, %v450_v8  ;;  %614 = vmatpush.bf16.msrb.mxu1 %v800_v48 }
  0x1d   : > { %514 = vrot.lane.b32.xlu0 %v513_v14, %s840_s11  ;;  %615 = vmatpush.bf16.msrb.mxu1 %v799_v49 }
  0x72   : > { %v556_v27 = vpop.permute.xlu2 %555 }
  0x73   : > { %v561_v39 = vsel %vm492_vm3, %v556_v27, 0  ;;  %v818_v27 = vld [vmem:[%s985_s9] ss:$0 sm:$0xff] }
  0x74   : > { %570 = vmatpush.bf16.msra.mxu3 %v561_v39 }
  0x83   : > { %v443_v19 = vpop.permute.xlu1 %442 }
  0x84   : > { %v448_v20 = vmul.f32 %v815_v17, %v443_v19 }
  0x86   : > { %vm476_vm1 = vcmp.gt.f32.partialorder %v448_v20, 0.0 }
  0x87   : > { %v520_v15 = vpop.permute.xlu0 %519 }
  0x88   : > { %v525_v16 = vsel %vm455_vm0, %v520_v15, 0 }
  0x89   : > { %534 = vmatpush.bf16.xpose.msra.mxu2 %v525_v16 }
  0x8f   : > { %v515_v18 = vpop.permute.xlu0 %514 }
  0x90   : > { %786 = vmatmul.msk.bf16.vlgmr.msra.gmra.mxu2 %vm455_vm0, %v515_v18 }
  0x96   : > { %v471_v21 = vpop.f32.mrf.mxu0 }
  0x97   : > { %v475_v22 = vmul.f32 0.25, %v471_v21 }
  0x99   : > { %v477_v23 = vsel %vm476_vm1, %v475_v22, -1e+09 }
  0x9a   : > { %v479_v24 = vsel %vm478_vm2, %v477_v23, -inf }
  0x9b   : > { %480 = vmax.xlane.f32.xlu2 %v479_v24 }
  0x9e   : > { %v473_v25 = vpop.f32.mrf.mxu0 }
  0x9f   : > { %v817_v25 = vld [vmem:[%s984_s8] ss:$0 sm:$0xff] }
 0x10e   : > { %v481_v28 = vpop.xlane.xlu2 %480 }
 0x10f   : > { %v482_v29 = vsub.f32 %v477_v23, %v481_v28 }
 0x111   : > { %v483_v30 = vmul.f32 1.442695, %v482_v29 }
 0x113   : > { %819 = vpow2.f32 %v483_v30  ;;  %v536_v31 = vpop.f32.mrf.mxu2 }
 0x114   : > { %v540_v32 = vmul.f32 0.25, %v536_v31 }
 0x116   : > { %v541_v33 = vsel %vm476_vm1, %v540_v32, -1e+09 }
 0x117   : > { %v542_v34 = vsel %vm478_vm2, %v541_v33, -inf }
 0x118   : > { %543 = vmax.xlane.f32.xlu1 %v542_v34 }
 0x119   : > { %v820_v35 = vpop.eup %819 }
 0x11a   : > { %v488_v36 = vpack.c.bf16 %v820_v35, %v820_v35  ;;  %v485_v37 = vsel %vm478_vm2, %v820_v35, 0.0 }
 0x11b   : > { %v538_v38 = vpop.f32.mrf.mxu2  ;;  %486 = vadd.xlane.f32.xlu2 %v485_v37 }
 0x11c   : > { %785 = vmatmul.msk.bf16.vlgmr.msra.gmra.mxu1 %vm478_vm2, %v488_v36 }
 0x18b   : > { %v544_v40 = vpop.xlane.xlu1 %543 }
 0x18c   : > { %v545_v41 = vsub.f32 %v541_v33, %v544_v40 }
 0x18e   : > { %v546_v42 = vmul.f32 1.442695, %v545_v41  ;;  %v487_v55 = vpop.xlane.xlu2 %486 }
 0x190   : > { %821 = vpow2.f32 %v546_v42 }
 0x196   : > { %v822_v43 = vpop.eup %821 }
 0x197   : > { %v548_v44 = vsel %vm478_vm2, %v822_v43, 0.0  ;;  %v551_v45 = vpack.c.bf16 %v822_v43, %v822_v43 }
 0x198   : > { %549 = vadd.xlane.f32.xlu0 %v548_v44 }
 0x199   : > { %v505_v46 = vpop.f32.mrf.mxu1  ;;  %787 = vmatmul.msk.bf16.vlgmr.msra.gmra.mxu3 %vm478_vm2, %v551_v45 }
 0x1a1   : > { %v507_v47 = vpop.f32.mrf.mxu1 }
 0x20b   : > { %v550_v50 = vpop.xlane.xlu0 %549 }
 0x20c   : > { %823 = vrcp.f32 %v550_v50 }
 0x20d   : > { %825 = vrcp.f32 %v487_v55 }
 0x20e   : > { %827 = vrcp.f32 %v842_v4 }
 0x212   : > { %v824_v51 = vpop.eup %823 }
 0x213   : > { %v826_v56 = vpop.eup %825 }
 0x214   : > { %v510_v57 = vmul.f32 %v826_v56, %v505_v46  ;;  %v828_v5 = vpop.eup %827 }
 0x215   : > { %v627_v6 = vmul.f32 32.0, %v828_v5  ;;  %vm631_vm5 = vweird.f32 %v828_v5 }
 0x217   : > { %v628_v7 = vsub.f32 1.0, %v627_v6 }
 0x219   : > { %v629_v8 = vmul.f32 %v828_v5, %v628_v7 }
 0x21b   : > { %v630_v9 = vadd.f32 %v828_v5, %v629_v8 }
 0x21c   : > { %v572_v52 = vpop.f32.mrf.mxu3 }
 0x21d   : > { %v577_v53 = vmul.f32 %v824_v51, %v572_v52  ;;  %v632_v10 = vsel %vm631_vm5, %v828_v5, %v630_v9 }
 0x21f   : > { %579 = vrot.lane.b32.xlu1 %v577_v53, %s841_s18 }
 0x224   : > { %v574_v54 = vpop.f32.mrf.mxu3 }
 0x291   : > { %v580_v58 = vpop.permute.xlu1 %579 }
 0x292   : > { %v582_v59 = vsel %vm455_vm0, %v510_v57, %v580_v58 }
 0x293   : > { %v583_v60 = vpack.c.bf16 %v582_v59, %v582_v59 }
 0x295   : > { %796 = vmatmul.msk.bf16.vlgmr.msrb.gmra.mxu1 %vm604_vm4, %v583_v60 }
 0x312   : > { %v617_v62 = vpop.f32.mrf.mxu1 }
 0x313   : > { %v618_v0 = vadd.f32 %v816_v61, %v617_v62 }
 0x315   : > { %v622_v1 = vadd.f32 %v621_v63, %v618_v0 }
 0x317   : > { %v623_v2 = vsel %vm604_vm4, %v622_v1, 0.0 }
 0x318   : > { %624 = vadd.xlane.f32.xlu2 %v623_v2 }
 0x31a   : > { %v619_v3 = vpop.f32.mrf.mxu1 }
 0x38b   : > { %v625_v11 = vpop.xlane.xlu2 %624 }
 0x38c   : > { %v633_v12 = vmul.f32 %v632_v10, %v625_v11 }
 0x38e   : > { %v634_v13 = vsub.f32 %v622_v1, %v633_v12 }
 0x390   : > { %v635_v14 = vmul.f32 %v634_v13, %v634_v13 }
 0x392   : > { %v636_v15 = vsel %vm604_vm4, %v635_v14, 0.0 }
 0x393   : > { %637 = vadd.xlane.f32.xlu0 %v636_v15 }
 0x406   : > { %v638_v16 = vpop.xlane.xlu0 %637 }
 0x407   : > { %v639_v17 = vmul.f32 %v638_v16, %v632_v10 }
 0x409   : > { %v640_v18 = vadd.f32 1e-05, %v639_v17 }
 0x40b   : > { %829 = vrsqrt.f32 %v640_v18  ;;  %vm647_vm7 = vweird.f32 %v640_v18 }
 0x411   : > { %v830_v19 = vpop.eup %829 }
 0x412   : > { %v642_v20 = vmul.f32 %v830_v19, %v640_v18  ;;  %vm648_vm6 = vweird.f32 %v830_v19 }
 0x413   : > { %vm649_vm8 = vmor %vm647_vm7, %vm648_vm6 }
 0x414   : > { %v643_v21 = vmul.f32 %v830_v19, %v642_v20 }
 0x416   : > { %v644_v22 = vmul.f32 0.5, %v643_v21 }
 0x418   : > { %v645_v23 = vsub.f32 1.5, %v644_v22 }
 0x41a   : > { %v646_v24 = vmul.f32 %v830_v19, %v645_v23 }
 0x41c   : > { %v650_v26 = vsel %vm649_vm8, %v830_v19, %v646_v24 }
 0x41d   : > { %v651_v28 = vmul.f32 %v650_v26, %v634_v13 }
 0x41f   : > { %v656_v29 = vmul.f32 %v817_v25, %v651_v28 }
 0x421   : > { %v661_v30 = vadd.f32 %v818_v27, %v656_v29 }
 0x423   : > { %662 = vst.msk [vmem:[%s436_s30] sm:$0xff] %vm604_vm4, %v661_v30 }
 0x424 PF: > { %s20_s13 = sadd.s32 1, %s837_s13  }
 0x425   : > { %p17_p4 = scmp.ge.s32.totalorder %s20_s13, 4  }
 0x427   :  { %19 = sbr.rel (!%p17_p4) target bundleno = 1 (0x1), region = 105 }

// kernel: _lambda_.35
= control target key start
LH: loop header
LB: loop body
LE: loop exit
PB: predicated region body
PF: predicated region fallthrough
CT: control target
= control target key end

     0   :  { %8 = vsyncpa [#allocation3], 0  ;;  %s503_s12 = smov 0   ;;  %s505_s13 = smov 0   ;;  %s546_s0 = inlined_call_operand.vmem [shape: f32[16,32], index: 0, kind: input, shape index: {}]   ;;  %s547_s1 = inlined_call_operand.vmem [shape: bf16[32,32], index: 1, kind: input, shape index: {}]   ;;  %s548_s2 = inlined_call_operand.hbm [shape: f32[1,32], index: 2, kind: input, shape index: {}]   ;;  %s549_s3 = inlined_call_operand.vmem [shape: f32[16,32], index: 3, kind: output, shape index: {}]  }
   0x1   :  { %s507_s14 = smov 0  }
   0x2 LB: > { %s365_s15 = sadd.s32 4294967295, %s480_s14   ;;  %s26_s16 = sadd.s32 1, %s476_s13  ;;  %s480_s14 = sphi %s507_s14, %s14_s14   ;;  %s476_s13 = sphi %s505_s13, %s551_s13   ;;  %s472_s12 = sphi %s503_s12, %s550_s12  }
   0x3   : > { %p28_p0 = scmp.ge.s32.totalorder %s26_s16, 2  ;;  %p367_p1 = scmp.ge.s32.totalorder %s480_s14, 1 }
   0x4   : > { %p137_p2 = scmp.lt.s32.totalorder %s480_s14, 3  ;;  %p396_p4 = scmp.eq.s32.totalorder %s365_s15, 0 }
   0x5   : > { %s553_s16 = smov (%p28_p0, %s26_s16), 0  ;;  %s157_s19 = sshll.u32 %s548_s2, 4  ;;  %s158_s19 = int_to_ptr.hbm [resolvable:$true] %s157_s19 }
   0x6   : > { %p138_p3 = pnand %p367_p1, %p137_p2  ;;  %s482_s20 = smov [#allocation2]  }
   0x7   : > { %s159_s21 = sshll.u32 %s482_s20, 4  ;;  %s160_s21 = int_to_ptr.vmem [resolvable:$true] %s159_s21 }
   0x8   : > { %p392_p5 = pneg %p138_p3  ;;  %179 = sbr.rel (%p138_p3) target bundleno = 156 (0x9c), region = 32 }
   0xa   : > { %p393_p6 = pnand %p396_p4, %p392_p5 }
   0xc   : > { %395 = dma.hbm_to_vmem [thread:$0]  (!%p393_p6), %s158_s19, 16, %s160_s21, [#allocation3]  }
   0xd   : > { %467 = dma.done.wait (%p396_p4), [#allocation3], 16  }
   0xe   : > { %469 = vsyncadd (%p396_p4), [#allocation3], 4294967280  ;;  %p209_p7 = scmp.lt.s32.totalorder %s472_s12, 1  ;;  %v387_v0 = vld [vmem:[%s547_s1 + $0x8] sm:$0xff]  ;;  %v386_v1 = vld [vmem:[%s547_s1] sm:$0xff]  ;;  %vm247_vm0 = vcmask 261120  }
   0xf   : > { %257 = vmatpush.bf16.msra.mxu0 %v387_v0  ;;  %v423_v4 = vld [vmem:[#allocation2] ss:$0 sm:$0xff] }
  0x10   : > { %s555_s12 = smov (!%p209_p7, %s472_s12), 1 }
  0x11   : > { %s373_s22 = sshll.u32 %s555_s12, 3 }
  0x12   : > { %s212_s25 = scalar_lea.vmem %s546_s0, %s373_s22  ;;  %s223_s5 = scalar_lea.vmem %s549_s3, %s373_s22 }
  0x13   : > { %v225_v2 = vld [vmem:[%s212_s25] sm:$0xff]  ;;  %258 = vmatpush.bf16.msra.mxu0 %v386_v1 }
  0x14   : > { %v226_v3 = vpack.c.bf16 %v225_v2, %v225_v2 }
  0x16   : > { %383 = vmatmul.msk.bf16.vlgmr.msra.gmra.mxu0 %vm247_vm0, %v226_v3 }
  0x93   : > { %v260_v5 = vpop.f32.mrf.mxu0 }
  0x94   : > { %v261_v6 = vadd.f32 %v423_v4, %v260_v5 }
  0x96   : > { %264 = vst.msk [vmem:[%s223_s5] sm:$0xff] %vm247_vm0, %v261_v6 }
  0x9b   : > { %v262_v7 = vpop.f32.mrf.mxu0 }
  0x9c PF: > { %s14_s14 = sadd.s32 1, %s480_s14   ;;  %s550_s12 = smov %s476_s13 }
  0x9d   : > { %p11_p8 = scmp.ge.s32.totalorder %s14_s14, 4   ;;  %s551_s13 = smov %s553_s16 }
  0x9f   :  { %13 = sbr.rel (!%p11_p8) target bundleno = 2 (0x2), region = 71 }
  0xa4   :  { %290 = vsyncpa [#allocation3], 1 }
  0xa5   :  { %292 = vsyncpa [#allocation3 + $0x1], 1 }

// kernel: _lambda_.38
= control target key start
LH: loop header
LB: loop body
LE: loop exit
PB: predicated region body
PF: predicated region fallthrough
CT: control target
= control target key end

     0   :  { %12 = vsyncpa [#allocation3], 0  ;;  %s645_s24 = smov 0   ;;  %s703_s0 = inlined_call_operand.vmem [shape: f32[16,32], index: 0, kind: input, shape index: {}]   ;;  %s704_s1 = inlined_call_operand.vmem [shape: bf16[32,64], index: 1, kind: input, shape index: {}]   ;;  %s705_s2 = inlined_call_operand.vmem [shape: f32[1,64], index: 2, kind: input, shape index: {}]   ;;  %s706_s3 = inlined_call_operand.vmem [shape: bf16[64,32], index: 3, kind: input, shape index: {}]   ;;  %s707_s4 = inlined_call_operand.vmem [shape: f32[1,32], index: 4, kind: input, shape index: {}]   ;;  %s708_s5 = inlined_call_operand.vmem [shape: f32[1,32], index: 5, kind: input, shape index: {}]   ;;  %s709_s6 = inlined_call_operand.hbm [shape: f32[1,32], index: 6, kind: input, shape index: {}]   ;;  %s710_s7 = inlined_call_operand.vmem [shape: f32[16,32], index: 7, kind: output, shape index: {}]  }
   0x1 LB: > { %s490_s25 = sadd.s32 4294967295, %s601_s24   ;;  %p492_p0 = scmp.ge.s32.totalorder %s601_s24, 1  ;;  %s601_s24 = sphi %s645_s24, %s18_s24  }
   0x2   : > { %p201_p1 = scmp.lt.s32.totalorder %s601_s24, 3  ;;  %s228_s28 = sshll.u32 %s709_s6, 4  ;;  %s229_s28 = int_to_ptr.hbm [resolvable:$true] %s228_s28 }
   0x3   : > { %p541_p3 = scmp.eq.s32.totalorder %s490_s25, 0  ;;  %s603_s29 = smov [#allocation2]  }
   0x4   : > { %p202_p2 = pnand %p492_p0, %p201_p1  ;;  %s230_s30 = sshll.u32 %s603_s29, 4  ;;  %s231_s30 = int_to_ptr.vmem [resolvable:$true] %s230_s30 }
   0x6   : > { %p537_p4 = pneg %p202_p2  ;;  %250 = sbr.rel (%p202_p2) target bundleno = 551 (0x227), region = 48 }
   0x8   : > { %p538_p5 = pnand %p541_p3, %p537_p4 }
   0xa   : > { %540 = dma.hbm_to_vmem [thread:$0]  (!%p538_p5), %s229_s28, 16, %s231_s30, [#allocation3]  }
   0xb   : > { %596 = dma.done.wait (%p541_p3), [#allocation3], 16  }
   0xc   : > { %598 = vsyncadd (%p541_p3), [#allocation3], 4294967280  ;;  %p281_p6 = scmp.lt.s32.totalorder %s490_s25, 1  ;;  %v528_v0 = vld [vmem:[%s704_s1 + $0x8] sm:$0xff]  ;;  %v527_v1 = vld [vmem:[%s704_s1] sm:$0xff]  ;;  %vm312_vm0 = vcmask 261120  }
   0xd   : > { %v532_v2 = vld [vmem:[%s706_s3 + $0x18] sm:$0xff]  ;;  %322 = vmatpush.bf16.msra.mxu0 %v528_v0  ;;  %v531_v4 = vld [vmem:[%s706_s3 + $0x10] sm:$0xff]  ;;  %v530_v6 = vld [vmem:[%s706_s3 + $0x8] sm:$0xff]  ;;  %vm367_vm1 = vcmask 523264   ;;  %v604_v20 = vmov 32.0  }
   0xe   : > { %s712_s25 = smov (!%p281_p6, %s490_s25), 1  ;;  %375 = vmatpush.bf16.msra.mxu1 %v532_v2  ;;  %v529_v7 = vld [vmem:[%s706_s3] sm:$0xff]  ;;  %557 = vrcp.f32 %v604_v20 }
   0xf   : > { %s497_s8 = sshll.u32 %s712_s25, 3  ;;  %v553_v8 = vld [vmem:[%s705_s2] ss:$0 sm:$0xff] }
  0x10   : > { %s284_s11 = scalar_lea.vmem %s703_s0, %s497_s8  ;;  %v554_v14 = vld [vmem:[%s707_s4] ss:$0 sm:$0xff]  ;;  %s288_s12 = scalar_lea.vmem %s710_s7, %s497_s8 }
  0x11   : > { %v290_v3 = vld [vmem:[%s284_s11] sm:$0xff]  ;;  %323 = vmatpush.bf16.msra.mxu0 %v527_v1 }
  0x12   : > { %v291_v5 = vpack.c.bf16 %v290_v3, %v290_v3  ;;  %376 = vmatpush.bf16.msra.mxu1 %v531_v4  ;;  %v555_v41 = vld [vmem:[%s708_s5] ss:$0 sm:$0xff] }
  0x13   : > { %v556_v43 = vld [vmem:[#allocation2] ss:$0 sm:$0xff] }
  0x14   : > { %507 = vmatmul.msk.bf16.vlgmr.msra.gmra.mxu0 %vm312_vm0, %v291_v5  ;;  %v558_v21 = vpop.eup %557 }
  0x15   : > { %v389_v22 = vmul.f32 32.0, %v558_v21  ;;  %vm393_vm2 = vweird.f32 %v558_v21 }
  0x16   : > { %377 = vmatpush.bf16.msra.mxu1 %v530_v6 }
  0x17   : > { %v390_v23 = vsub.f32 1.0, %v389_v22 }
  0x19   : > { %v391_v24 = vmul.f32 %v558_v21, %v390_v23 }
  0x1a   : > { %378 = vmatpush.bf16.msra.mxu1 %v529_v7 }
  0x1b   : > { %v392_v25 = vadd.f32 %v558_v21, %v391_v24 }
  0x1d   : > { %v394_v26 = vsel %vm393_vm2, %v558_v21, %v392_v25 }
  0x91   : > { %v325_v9 = vpop.f32.mrf.mxu0 }
  0x92   : > { %v326_v10 = vadd.f32 %v553_v8, %v325_v9 }
  0x94   : > { %v329_v11 = vmax.f32 %v326_v10, 0.0 }
  0x96   : > { %v330_v12 = vpack.c.bf16 %v329_v11, %v329_v11 }
  0x98   : > { %524 = vmatmul.msk.bf16.vlgmr.msra.gmra.mxu1 %vm367_vm1, %v330_v12 }
  0x99   : > { %v327_v13 = vpop.f32.mrf.mxu0 }
 0x115   : > { %v380_v15 = vpop.f32.mrf.mxu1 }
 0x116   : > { %v381_v16 = vadd.f32 %v554_v14, %v380_v15 }
 0x118   : > { %v384_v17 = vadd.f32 %v381_v16, %v290_v3 }
 0x11a   : > { %v385_v18 = vsel %vm312_vm0, %v384_v17, 0.0 }
 0x11b   : > { %386 = vadd.xlane.f32.xlu0 %v385_v18 }
 0x11d   : > { %v382_v19 = vpop.f32.mrf.mxu1 }
 0x18e   : > { %v387_v27 = vpop.xlane.xlu0 %386 }
 0x18f   : > { %v395_v28 = vmul.f32 %v394_v26, %v387_v27 }
 0x191   : > { %v396_v29 = vsub.f32 %v384_v17, %v395_v28 }
 0x193   : > { %v397_v30 = vmul.f32 %v396_v29, %v396_v29 }
 0x195   : > { %v398_v31 = vsel %vm312_vm0, %v397_v30, 0.0 }
 0x196   : > { %399 = vadd.xlane.f32.xlu0 %v398_v31 }
 0x209   : > { %v400_v32 = vpop.xlane.xlu0 %399 }
 0x20a   : > { %v401_v33 = vmul.f32 %v400_v32, %v394_v26 }
 0x20c   : > { %v402_v34 = vadd.f32 1e-05, %v401_v33 }
 0x20e   : > { %559 = vrsqrt.f32 %v402_v34  ;;  %vm409_vm4 = vweird.f32 %v402_v34 }
 0x214   : > { %v560_v35 = vpop.eup %559 }
 0x215   : > { %v404_v36 = vmul.f32 %v560_v35, %v402_v34  ;;  %vm410_vm3 = vweird.f32 %v560_v35 }
 0x216   : > { %vm411_vm5 = vmor %vm409_vm4, %vm410_vm3 }
 0x217   : > { %v405_v37 = vmul.f32 %v560_v35, %v404_v36 }
 0x219   : > { %v406_v38 = vmul.f32 0.5, %v405_v37 }
 0x21b   : > { %v407_v39 = vsub.f32 1.5, %v406_v38 }
 0x21d   : > { %v408_v40 = vmul.f32 %v560_v35, %v407_v39 }
 0x21f   : > { %v412_v42 = vsel %vm411_vm5, %v560_v35, %v408_v40 }
 0x220   : > { %v413_v44 = vmul.f32 %v412_v42, %v396_v29 }
 0x222   : > { %v418_v45 = vmul.f32 %v555_v41, %v413_v44 }
 0x224   : > { %v423_v46 = vadd.f32 %v556_v43, %v418_v45 }
 0x226   : > { %424 = vst.msk [vmem:[%s288_s12] sm:$0xff] %vm312_vm0, %v423_v46 }
 0x227 PF: > { %s18_s24 = sadd.s32 1, %s601_s24  }
 0x228   : > { %p15_p7 = scmp.ge.s32.totalorder %s18_s24, 4  }
 0x22a   :  { %17 = sbr.rel (!%p15_p7) target bundleno = 1 (0x1), region = 83 }
 0x22f   :  { %444 = vsyncpa [#allocation3], 1 }
 0x230   :  { %446 = vsyncpa [#allocation3 + $0x1], 1 }

// kernel: _lambda_.37
= control target key start
LH: loop header
LB: loop body
LE: loop exit
PB: predicated region body
PF: predicated region fallthrough
CT: control target
= control target key end

     0   :  { %15 = vsyncpa [#allocation3], 0  ;;  %s1212_s0 = inlined_call_operand.vmem [shape: f32[2,8,32], index: 0, kind: input, shape index: {}]   ;;  %s1213_s1 = inlined_call_operand.vmem [shape: f32[2,8,32], index: 1, kind: input, shape index: {}]   ;;  %s1214_s2 = inlined_call_operand.vmem [shape: f32[2,8,32], index: 2, kind: input, shape index: {}]   ;;  %s1215_s3 = inlined_call_operand.vmem [shape: f32[2,8,1], index: 3, kind: input, shape index: {}]   ;;  %s1216_s4 = inlined_call_operand.vmem [shape: f32[2,1,8], index: 4, kind: input, shape index: {}]   ;;  %s1217_s5 = inlined_call_operand.vmem [shape: bf16[32,32], index: 5, kind: input, shape index: {}]   ;;  %s1218_s6 = inlined_call_operand.hbm [shape: f32[1,32], index: 6, kind: input, shape index: {}]   ;;  %s1219_s7 = inlined_call_operand.vmem [shape: f32[2,8,32], index: 7, kind: input, shape index: {}]   ;;  %s1220_s8 = inlined_call_operand.hbm [shape: f32[1,32], index: 8, kind: input, shape index: {}]   ;;  %s1221_s9 = inlined_call_operand.hbm [shape: f32[1,32], index: 9, kind: input, shape index: {}]   ;;  %s1222_s10 = inlined_call_operand.vmem [shape: f32[2,8,32], index: 10, kind: output, shape index: {}]  }
   0x1   :  { %16 = vsyncpa [#allocation5], 0  ;;  %s1111_s13 = smov 0  }
   0x2 LB: > { %s320_s16 = sshll.u32 %s1220_s8, 4  ;;  %s1120_s17 = sadd.s32 4294967295, %s1047_s13   ;;  %s1047_s13 = sphi %s1111_s13, %s22_s13   ;;  %s321_s16 = int_to_ptr.hbm [resolvable:$true] %s320_s16 }
   0x3   : > { %p850_p0 = scmp.ge.s32.totalorder %s1047_s13, 1  ;;  %p293_p1 = scmp.lt.s32.totalorder %s1047_s13, 3 }
   0x4   : > { %p904_p2 = scmp.eq.s32.totalorder %s1120_s17, 0  ;;  %s1049_s19 = smov [#allocation4]  }
   0x5   : > { %p1125_p3 = pnand %p850_p0, %p293_p1  ;;  %s322_s20 = sshll.u32 %s1049_s19, 4  ;;  %s323_s20 = int_to_ptr.vmem [resolvable:$true] %s322_s20 }
   0x6   : > { %s308_s23 = sshll.u32 %s1218_s6, 4  ;;  %s332_s26 = sshll.u32 %s1221_s9, 4  ;;  %s309_s23 = int_to_ptr.hbm [resolvable:$true] %s308_s23  ;;  %s333_s26 = int_to_ptr.hbm [resolvable:$true] %s332_s26 }
   0x7   : > { %p894_p4 = pneg %p1125_p3  ;;  %s1050_s27 = smov [#allocation2]  }
   0x8   : > { %s310_s28 = sshll.u32 %s1050_s27, 4  ;;  %s1051_s29 = smov [#allocation6]   ;;  %s311_s28 = int_to_ptr.vmem [resolvable:$true] %s310_s28 }
   0x9   : > { %p895_p5 = pnand %p904_p2, %p894_p4  ;;  %s334_s30 = sshll.u32 %s1051_s29, 4  ;;  %s335_s30 = int_to_ptr.vmem [resolvable:$true] %s334_s30 }
   0xa   : > { %388 = sbr.rel (%p1125_p3) target bundleno = 1069 (0x42d), region = 60 }
   0xb   : > { %900 = dma.hbm_to_vmem [thread:$0]  (!%p895_p5), %s321_s16, 16, %s323_s20, [#allocation5]  }
   0xc   : > { %897 = dma.hbm_to_vmem [thread:$0]  (!%p895_p5), %s309_s23, 16, %s311_s28, [#allocation3]  }
   0xd   : > { %903 = dma.hbm_to_vmem [thread:$0]  (!%p895_p5), %s333_s26, 16, %s335_s30, [#allocation5]  }
   0xf   : > { %1038 = dma.done.wait (%p904_p2), [#allocation3], 16  }
  0x10   : > { %1040 = vsyncadd (%p904_p2), [#allocation3], 4294967280 }
  0x11   : > { %1042 = dma.done.wait (%p904_p2), [#allocation5], 32  }
  0x12   : > { %1044 = vsyncadd (%p904_p2), [#allocation5], 4294967264  ;;  %p454_p6 = scmp.lt.s32.totalorder %s1120_s17, 1  ;;  %v1052_v0 = vmov 0   ;;  %vm499_vm0 = vcmask 130048   ;;  %s1053_s29 = smov 112  }
  0x13   : > { %925 = vset.pattern.permute.xlu1 %v1052_v0  ;;  %926 = vset.pattern.permute.xlu0 %v1052_v0  ;;  %vm522_vm2 = vcmask 64512   ;;  %vm536_vm3 = vcmask 1043456   ;;  %v881_v48 = vld [vmem:[%s1217_s5 + $0x8] sm:$0xff]  ;;  %v880_v49 = vld [vmem:[%s1217_s5] sm:$0xff]  ;;  %vm648_vm4 = vcmask 261120  }
  0x14   : > { %s1225_s17 = smov (!%p454_p6, %s1120_s17), 1  ;;  %v928_v61 = vld [vmem:[#allocation2] ss:$0 sm:$0xff] }
  0x15   : > { %s1154_s11 = sshll.u32 %s1225_s17, 3  ;;  %s472_s28 = scalar_lea.vmem %s1216_s4, %s1225_s17 }
  0x16   : > { %s461_s15 = scalar_lea.vmem %s1213_s1, %s1154_s11  ;;  %s457_s19 = scalar_lea.vmem %s1212_s0, %s1154_s11  ;;  %v927_v17 = vld [vmem:[%s472_s28] ss:$0 sm:$0xff] }
  0x17   : > { %s469_s22 = scalar_lea.vmem %s1215_s3, %s1154_s11  ;;  %v495_v1 = vld [vmem:[%s461_s15] sm:$0xff]  ;;  %s465_s25 = scalar_lea.vmem %s1214_s2, %s1154_s11 }
  0x18   : > { %v493_v2 = vld [vmem:[%s457_s19] sm:$0xff]  ;;  %v496_v4 = vpack.c.bf16 %v495_v1, %v495_v1  ;;  %s1054_s15 = smov 16   ;;  %s476_s19 = scalar_lea.vmem %s1219_s7, %s1154_s11 }
  0x19   : > { %v482_v3 = vld [vmem:[%s469_s22] sm:$0xff]  ;;  %v494_v9 = vpack.c.bf16 %v493_v2, %v493_v2  ;;  %s480_s22 = scalar_lea.vmem %s1222_s10, %s1154_s11 }
  0x1a   : > { %486 = vperm.xlu1 %925, %v482_v3   ;;  %v497_v5 = vld [vmem:[%s465_s25] sm:$0xff]  ;;  %v504_v7 = vsel %vm499_vm0, %v496_v4, 0  ;;  %v561_v8 = vunpack.c.l.b16 %v496_v4  ;;  %v1055_v4 = vmov 32.0  }
  0x1b   : > { %v498_v6 = vpack.c.bf16 %v497_v5, %v497_v5  ;;  %513 = vmatpush.bf16.xpose.msra.mxu0 %v504_v7  ;;  %v556_v13 = vunpack.c.l.b16 %v494_v9  ;;  %v665_v63 = vld [vmem:[%s476_s19] sm:$0xff] }
  0x1c   : > { %v562_v11 = vpack.c.b16 %v561_v8, %v561_v8 }
  0x1d   : > { %v597_v10 = vunpack.c.l.b16 %v498_v6  ;;  %v557_v14 = vpack.c.b16 %v556_v13, %v556_v13  ;;  %v538_v26 = vsel %vm536_vm3, %v498_v6, 0 }
  0x1e   : > { %563 = vrot.lane.b32.xlu0 %v562_v11, %s1053_s29  ;;  %547 = vmatpush.bf16.msra.mxu1 %v538_v26 }
  0x1f   : > { %v598_v12 = vpack.c.b16 %v597_v10, %v597_v10 }
  0x21   : > { %599 = vrot.lane.b32.xlu2 %v598_v12, %s1053_s29 }
  0x22   : > { %865 = vmatmul.msk.bf16.vlgmr.msra.gmra.mxu0 %vm499_vm0, %v494_v9  ;;  %658 = vmatpush.bf16.msrb.mxu1 %v881_v48 }
  0x26   : > { %558 = vrot.lane.b32.xlu0 %v557_v14, %s1053_s29  ;;  %659 = vmatpush.bf16.msrb.mxu1 %v880_v49 }
  0x7b   : > { %v600_v27 = vpop.permute.xlu2 %599 }
  0x7c   : > { %v605_v39 = vsel %vm536_vm3, %v600_v27, 0  ;;  %v930_v27 = vld [vmem:[#allocation6] ss:$0 sm:$0xff] }
  0x7d   : > { %614 = vmatpush.bf16.msra.mxu3 %v605_v39 }
  0x8c   : > { %v487_v19 = vpop.permute.xlu1 %486 }
  0x8d   : > { %v492_v20 = vmul.f32 %v927_v17, %v487_v19 }
  0x8f   : > { %vm520_vm1 = vcmp.gt.f32.partialorder %v492_v20, 0.0 }
  0x90   : > { %v564_v15 = vpop.permute.xlu0 %563 }
  0x91   : > { %v569_v16 = vsel %vm499_vm0, %v564_v15, 0 }
  0x92   : > { %578 = vmatpush.bf16.xpose.msra.mxu2 %v569_v16 }
  0x98   : > { %v559_v18 = vpop.permute.xlu0 %558 }
  0x99   : > { %867 = vmatmul.msk.bf16.vlgmr.msra.gmra.mxu2 %vm499_vm0, %v559_v18 }
  0x9f   : > { %v515_v21 = vpop.f32.mrf.mxu0 }
  0xa0   : > { %v519_v22 = vmul.f32 0.25, %v515_v21 }
  0xa2   : > { %v521_v23 = vsel %vm520_vm1, %v519_v22, -1e+09 }
  0xa3   : > { %v523_v24 = vsel %vm522_vm2, %v521_v23, -inf }
  0xa4   : > { %524 = vmax.xlane.f32.xlu2 %v523_v24 }
  0xa7   : > { %v517_v25 = vpop.f32.mrf.mxu0 }
  0xa8   : > { %v929_v25 = vld [vmem:[#allocation4] ss:$0 sm:$0xff] }
 0x117   : > { %v525_v28 = vpop.xlane.xlu2 %524 }
 0x118   : > { %v526_v29 = vsub.f32 %v521_v23, %v525_v28 }
 0x11a   : > { %v527_v30 = vmul.f32 1.442695, %v526_v29 }
 0x11c   : > { %931 = vpow2.f32 %v527_v30  ;;  %v580_v31 = vpop.f32.mrf.mxu2 }
 0x11d   : > { %v584_v32 = vmul.f32 0.25, %v580_v31 }
 0x11f   : > { %v585_v33 = vsel %vm520_vm1, %v584_v32, -1e+09 }
 0x120   : > { %v586_v34 = vsel %vm522_vm2, %v585_v33, -inf }
 0x121   : > { %587 = vmax.xlane.f32.xlu1 %v586_v34 }
 0x122   : > { %v932_v35 = vpop.eup %931 }
 0x123   : > { %v532_v36 = vpack.c.bf16 %v932_v35, %v932_v35  ;;  %v529_v37 = vsel %vm522_vm2, %v932_v35, 0.0 }
 0x124   : > { %v582_v38 = vpop.f32.mrf.mxu2  ;;  %530 = vadd.xlane.f32.xlu2 %v529_v37 }
 0x125   : > { %866 = vmatmul.msk.bf16.vlgmr.msra.gmra.mxu1 %vm522_vm2, %v532_v36 }
 0x194   : > { %v588_v40 = vpop.xlane.xlu1 %587 }
 0x195   : > { %v589_v41 = vsub.f32 %v585_v33, %v588_v40 }
 0x197   : > { %v590_v42 = vmul.f32 1.442695, %v589_v41  ;;  %v531_v55 = vpop.xlane.xlu2 %530 }
 0x199   : > { %933 = vpow2.f32 %v590_v42 }
 0x19f   : > { %v934_v43 = vpop.eup %933 }
 0x1a0   : > { %v592_v44 = vsel %vm522_vm2, %v934_v43, 0.0  ;;  %v595_v45 = vpack.c.bf16 %v934_v43, %v934_v43 }
 0x1a1   : > { %593 = vadd.xlane.f32.xlu0 %v592_v44 }
 0x1a2   : > { %v549_v46 = vpop.f32.mrf.mxu1  ;;  %868 = vmatmul.msk.bf16.vlgmr.msra.gmra.mxu3 %vm522_vm2, %v595_v45 }
 0x1aa   : > { %v551_v47 = vpop.f32.mrf.mxu1 }
 0x214   : > { %v594_v50 = vpop.xlane.xlu0 %593 }
 0x215   : > { %935 = vrcp.f32 %v594_v50 }
 0x216   : > { %937 = vrcp.f32 %v531_v55 }
 0x217   : > { %939 = vrcp.f32 %v1055_v4 }
 0x21b   : > { %v936_v51 = vpop.eup %935 }
 0x21c   : > { %v938_v56 = vpop.eup %937 }
 0x21d   : > { %v554_v57 = vmul.f32 %v938_v56, %v549_v46  ;;  %v940_v5 = vpop.eup %939 }
 0x21e   : > { %v671_v6 = vmul.f32 32.0, %v940_v5  ;;  %vm675_vm5 = vweird.f32 %v940_v5 }
 0x220   : > { %v672_v7 = vsub.f32 1.0, %v671_v6 }
 0x222   : > { %v673_v8 = vmul.f32 %v940_v5, %v672_v7 }
 0x224   : > { %v674_v9 = vadd.f32 %v940_v5, %v673_v8 }
 0x225   : > { %v616_v52 = vpop.f32.mrf.mxu3 }
 0x226   : > { %v621_v53 = vmul.f32 %v936_v51, %v616_v52  ;;  %v676_v10 = vsel %vm675_vm5, %v940_v5, %v674_v9 }
 0x228   : > { %623 = vrot.lane.b32.xlu1 %v621_v53, %s1054_s15 }
 0x22d   : > { %v618_v54 = vpop.f32.mrf.mxu3 }
 0x29a   : > { %v624_v58 = vpop.permute.xlu1 %623 }
 0x29b   : > { %v626_v59 = vsel %vm499_vm0, %v554_v57, %v624_v58 }
 0x29c   : > { %v627_v60 = vpack.c.bf16 %v626_v59, %v626_v59 }
 0x29e   : > { %877 = vmatmul.msk.bf16.vlgmr.msrb.gmra.mxu1 %vm648_vm4, %v627_v60 }
 0x31b   : > { %v661_v62 = vpop.f32.mrf.mxu1 }
 0x31c   : > { %v662_v0 = vadd.f32 %v928_v61, %v661_v62 }
 0x31e   : > { %v666_v1 = vadd.f32 %v665_v63, %v662_v0 }
 0x320   : > { %v667_v2 = vsel %vm648_vm4, %v666_v1, 0.0 }
 0x321   : > { %668 = vadd.xlane.f32.xlu2 %v667_v2 }
 0x323   : > { %v663_v3 = vpop.f32.mrf.mxu1 }
 0x394   : > { %v669_v11 = vpop.xlane.xlu2 %668 }
 0x395   : > { %v677_v12 = vmul.f32 %v676_v10, %v669_v11 }
 0x397   : > { %v678_v13 = vsub.f32 %v666_v1, %v677_v12 }
 0x399   : > { %v679_v14 = vmul.f32 %v678_v13, %v678_v13 }
 0x39b   : > { %v680_v15 = vsel %vm648_vm4, %v679_v14, 0.0 }
 0x39c   : > { %681 = vadd.xlane.f32.xlu0 %v680_v15 }
 0x40f   : > { %v682_v16 = vpop.xlane.xlu0 %681 }
 0x410   : > { %v683_v17 = vmul.f32 %v682_v16, %v676_v10 }
 0x412   : > { %v684_v18 = vadd.f32 1e-05, %v683_v17 }
 0x414   : > { %941 = vrsqrt.f32 %v684_v18  ;;  %vm691_vm7 = vweird.f32 %v684_v18 }
 0x41a   : > { %v942_v19 = vpop.eup %941 }
 0x41b   : > { %v686_v20 = vmul.f32 %v942_v19, %v684_v18  ;;  %vm692_vm6 = vweird.f32 %v942_v19 }
 0x41c   : > { %vm693_vm8 = vmor %vm691_vm7, %vm692_vm6 }
 0x41d   : > { %v687_v21 = vmul.f32 %v942_v19, %v686_v20 }
 0x41f   : > { %v688_v22 = vmul.f32 0.5, %v687_v21 }
 0x421   : > { %v689_v23 = vsub.f32 1.5, %v688_v22 }
 0x423   : > { %v690_v24 = vmul.f32 %v942_v19, %v689_v23 }
 0x425   : > { %v694_v26 = vsel %vm693_vm8, %v942_v19, %v690_v24 }
 0x426   : > { %v695_v28 = vmul.f32 %v694_v26, %v678_v13 }
 0x428   : > { %v700_v29 = vmul.f32 %v929_v25, %v695_v28 }
 0x42a   : > { %v705_v30 = vadd.f32 %v930_v27, %v700_v29 }
 0x42c   : > { %706 = vst.msk [vmem:[%s480_s22] sm:$0xff] %vm648_vm4, %v705_v30 }
 0x42d PF: > { %s22_s13 = sadd.s32 1, %s1047_s13  }
 0x42e   : > { %p19_p7 = scmp.ge.s32.totalorder %s22_s13, 4  }
 0x430   :  { %21 = sbr.rel (!%p19_p7) target bundleno = 2 (0x2), region = 118 }
 0x435   :  { %726 = vsyncpa [#allocation3], 1 }
 0x436   :  { %728 = vsyncpa [#allocation3 + $0x1], 1 }
 0x437   :  { %729 = vsyncpa [#allocation5], 1 }

// kernel: _lambda_.47
= control target key start
LH: loop header
LB: loop body
LE: loop exit
PB: predicated region body
PF: predicated region fallthrough
CT: control target
= control target key end

     0   :  { %12 = vsyncpa [#allocation3], 0  ;;  %s854_s0 = inlined_call_operand.vmem [shape: f32[16,32], index: 0, kind: input, shape index: {}]   ;;  %s855_s1 = inlined_call_operand.vmem [shape: bf16[32,64], index: 1, kind: input, shape index: {}]   ;;  %s856_s2 = inlined_call_operand.vmem [shape: f32[1,64], index: 2, kind: input, shape index: {}]   ;;  %s857_s3 = inlined_call_operand.vmem [shape: bf16[64,32], index: 3, kind: input, shape index: {}]   ;;  %s858_s4 = inlined_call_operand.hbm [shape: f32[1,32], index: 4, kind: input, shape index: {}]   ;;  %s859_s5 = inlined_call_operand.hbm [shape: f32[1,32], index: 5, kind: input, shape index: {}]   ;;  %s860_s6 = inlined_call_operand.hbm [shape: f32[1,32], index: 6, kind: input, shape index: {}]   ;;  %s861_s7 = inlined_call_operand.vmem [shape: f32[16,32], index: 7, kind: output, shape index: {}]  }
   0x1   :  { %13 = vsyncpa [#allocation5], 0  ;;  %s783_s24 = smov 0  }
   0x2 LB: > { %s235_s27 = sshll.u32 %s859_s5, 4  ;;  %s538_s28 = sadd.s32 4294967295, %s737_s24   ;;  %s737_s24 = sphi %s783_s24, %s19_s24   ;;  %s236_s27 = int_to_ptr.hbm [resolvable:$true] %s235_s27 }
   0x3   : > { %p540_p0 = scmp.ge.s32.totalorder %s737_s24, 1  ;;  %p202_p1 = scmp.lt.s32.totalorder %s737_s24, 3 }
   0x4   : > { %p607_p2 = scmp.eq.s32.totalorder %s538_s28, 0  ;;  %s739_s30 = smov [#allocation4]  }
   0x5   : > { %p794_p3 = pnand %p540_p0, %p202_p1  ;;  %s237_s8 = sshll.u32 %s739_s30, 4  ;;  %s238_s8 = int_to_ptr.vmem [resolvable:$true] %s237_s8 }
   0x6   : > { %s223_s11 = sshll.u32 %s858_s4, 4  ;;  %s247_s14 = sshll.u32 %s860_s6, 4  ;;  %s224_s11 = int_to_ptr.hbm [resolvable:$true] %s223_s11  ;;  %s248_s14 = int_to_ptr.hbm [resolvable:$true] %s247_s14 }
   0x7   : > { %p597_p4 = pneg %p794_p3  ;;  %s740_s15 = smov [#allocation2]  }
   0x8   : > { %s225_s16 = sshll.u32 %s740_s15, 4  ;;  %s741_s17 = smov [#allocation6]   ;;  %s226_s16 = int_to_ptr.vmem [resolvable:$true] %s225_s16 }
   0x9   : > { %p598_p5 = pnand %p607_p2, %p597_p4  ;;  %s249_s18 = sshll.u32 %s741_s17, 4  ;;  %s250_s18 = int_to_ptr.vmem [resolvable:$true] %s249_s18 }
   0xa   : > { %269 = sbr.rel (%p794_p3) target bundleno = 557 (0x22d), region = 48 }
   0xb   : > { %603 = dma.hbm_to_vmem [thread:$0]  (!%p598_p5), %s236_s27, 16, %s238_s8, [#allocation5]  }
   0xc   : > { %600 = dma.hbm_to_vmem [thread:$0]  (!%p598_p5), %s224_s11, 16, %s226_s16, [#allocation3]  }
   0xd   : > { %606 = dma.hbm_to_vmem [thread:$0]  (!%p598_p5), %s248_s14, 16, %s250_s18, [#allocation5]  }
   0xf   : > { %728 = dma.done.wait (%p607_p2), [#allocation3], 16  }
  0x10   : > { %730 = vsyncadd (%p607_p2), [#allocation3], 4294967280 }
  0x11   : > { %732 = dma.done.wait (%p607_p2), [#allocation5], 32  }
  0x12   : > { %734 = vsyncadd (%p607_p2), [#allocation5], 4294967264  ;;  %p310_p6 = scmp.lt.s32.totalorder %s538_s28, 1  ;;  %v580_v0 = vld [vmem:[%s855_s1 + $0x8] sm:$0xff]  ;;  %v579_v1 = vld [vmem:[%s855_s1] sm:$0xff]  ;;  %vm341_vm0 = vcmask 261120  }
  0x13   : > { %v584_v2 = vld [vmem:[%s857_s3 + $0x18] sm:$0xff]  ;;  %351 = vmatpush.bf16.msra.mxu0 %v580_v0  ;;  %v583_v4 = vld [vmem:[%s857_s3 + $0x10] sm:$0xff]  ;;  %v582_v6 = vld [vmem:[%s857_s3 + $0x8] sm:$0xff]  ;;  %vm396_vm1 = vcmask 523264   ;;  %v742_v20 = vmov 32.0  }
  0x14   : > { %s864_s28 = smov (!%p310_p6, %s538_s28), 1  ;;  %404 = vmatpush.bf16.msra.mxu1 %v584_v2  ;;  %v581_v7 = vld [vmem:[%s857_s3] sm:$0xff]  ;;  %629 = vrcp.f32 %v742_v20 }
  0x15   : > { %s549_s19 = sshll.u32 %s864_s28, 3  ;;  %v625_v8 = vld [vmem:[%s856_s2] ss:$0 sm:$0xff]  ;;  %v627_v41 = vld [vmem:[#allocation4] ss:$0 sm:$0xff] }
  0x16   : > { %s313_s22 = scalar_lea.vmem %s854_s0, %s549_s19  ;;  %v626_v14 = vld [vmem:[#allocation2] ss:$0 sm:$0xff]  ;;  %v628_v43 = vld [vmem:[#allocation6] ss:$0 sm:$0xff]  ;;  %s317_s18 = scalar_lea.vmem %s861_s7, %s549_s19 }
  0x17   : > { %v319_v3 = vld [vmem:[%s313_s22] sm:$0xff]  ;;  %352 = vmatpush.bf16.msra.mxu0 %v579_v1 }
  0x18   : > { %v320_v5 = vpack.c.bf16 %v319_v3, %v319_v3  ;;  %405 = vmatpush.bf16.msra.mxu1 %v583_v4 }
  0x1a   : > { %559 = vmatmul.msk.bf16.vlgmr.msra.gmra.mxu0 %vm341_vm0, %v320_v5  ;;  %v630_v21 = vpop.eup %629 }
  0x1b   : > { %v418_v22 = vmul.f32 32.0, %v630_v21  ;;  %vm422_vm2 = vweird.f32 %v630_v21 }
  0x1c   : > { %406 = vmatpush.bf16.msra.mxu1 %v582_v6 }
  0x1d   : > { %v419_v23 = vsub.f32 1.0, %v418_v22 }
  0x1f   : > { %v420_v24 = vmul.f32 %v630_v21, %v419_v23 }
  0x20   : > { %407 = vmatpush.bf16.msra.mxu1 %v581_v7 }
  0x21   : > { %v421_v25 = vadd.f32 %v630_v21, %v420_v24 }
  0x23   : > { %v423_v26 = vsel %vm422_vm2, %v630_v21, %v421_v25 }
  0x97   : > { %v354_v9 = vpop.f32.mrf.mxu0 }
  0x98   : > { %v355_v10 = vadd.f32 %v625_v8, %v354_v9 }
  0x9a   : > { %v358_v11 = vmax.f32 %v355_v10, 0.0 }
  0x9c   : > { %v359_v12 = vpack.c.bf16 %v358_v11, %v358_v11 }
  0x9e   : > { %576 = vmatmul.msk.bf16.vlgmr.msra.gmra.mxu1 %vm396_vm1, %v359_v12 }
  0x9f   : > { %v356_v13 = vpop.f32.mrf.mxu0 }
 0x11b   : > { %v409_v15 = vpop.f32.mrf.mxu1 }
 0x11c   : > { %v410_v16 = vadd.f32 %v626_v14, %v409_v15 }
 0x11e   : > { %v413_v17 = vadd.f32 %v410_v16, %v319_v3 }
 0x120   : > { %v414_v18 = vsel %vm341_vm0, %v413_v17, 0.0 }
 0x121   : > { %415 = vadd.xlane.f32.xlu0 %v414_v18 }
 0x123   : > { %v411_v19 = vpop.f32.mrf.mxu1 }
 0x194   : > { %v416_v27 = vpop.xlane.xlu0 %415 }
 0x195   : > { %v424_v28 = vmul.f32 %v423_v26, %v416_v27 }
 0x197   : > { %v425_v29 = vsub.f32 %v413_v17, %v424_v28 }
 0x199   : > { %v426_v30 = vmul.f32 %v425_v29, %v425_v29 }
 0x19b   : > { %v427_v31 = vsel %vm341_vm0, %v426_v30, 0.0 }
 0x19c   : > { %428 = vadd.xlane.f32.xlu0 %v427_v31 }
 0x20f   : > { %v429_v32 = vpop.xlane.xlu0 %428 }
 0x210   : > { %v430_v33 = vmul.f32 %v429_v32, %v423_v26 }
 0x212   : > { %v431_v34 = vadd.f32 1e-05, %v430_v33 }
 0x214   : > { %631 = vrsqrt.f32 %v431_v34  ;;  %vm438_vm4 = vweird.f32 %v431_v34 }
 0x21a   : > { %v632_v35 = vpop.eup %631 }
 0x21b   : > { %v433_v36 = vmul.f32 %v632_v35, %v431_v34  ;;  %vm439_vm3 = vweird.f32 %v632_v35 }
 0x21c   : > { %vm440_vm5 = vmor %vm438_vm4, %vm439_vm3 }
 0x21d   : > { %v434_v37 = vmul.f32 %v632_v35, %v433_v36 }
 0x21f   : > { %v435_v38 = vmul.f32 0.5, %v434_v37 }
 0x221   : > { %v436_v39 = vsub.f32 1.5, %v435_v38 }
 0x223   : > { %v437_v40 = vmul.f32 %v632_v35, %v436_v39 }
 0x225   : > { %v441_v42 = vsel %vm440_vm5, %v632_v35, %v437_v40 }
 0x226   : > { %v442_v44 = vmul.f32 %v441_v42, %v425_v29 }
 0x228   : > { %v447_v45 = vmul.f32 %v627_v41, %v442_v44 }
 0x22a   : > { %v452_v46 = vadd.f32 %v628_v43, %v447_v45 }
 0x22c   : > { %453 = vst.msk [vmem:[%s317_s18] sm:$0xff] %vm341_vm0, %v452_v46 }
 0x22d PF: > { %s19_s24 = sadd.s32 1, %s737_s24  }
 0x22e   : > { %p16_p7 = scmp.ge.s32.totalorder %s19_s24, 4  }
 0x230   :  { %18 = sbr.rel (!%p16_p7) target bundleno = 2 (0x2), region = 91 }
 0x235   :  { %473 = vsyncpa [#allocation3], 1 }
 0x236   :  { %475 = vsyncpa [#allocation3 + $0x1], 1 }
 0x237   :  { %476 = vsyncpa [#allocation5], 1 }

// kernel: _lambda_.46
= control target key start
LH: loop header
LB: loop body
LE: loop exit
PB: predicated region body
PF: predicated region fallthrough
CT: control target
= control target key end

     0   :  { %15 = vsyncpa [#allocation3], 0  ;;  %s1136_s0 = inlined_call_operand.vmem [shape: f32[2,8,32], index: 0, kind: input, shape index: {}]   ;;  %s1137_s1 = inlined_call_operand.vmem [shape: f32[2,8,32], index: 1, kind: input, shape index: {}]   ;;  %s1138_s2 = inlined_call_operand.vmem [shape: f32[2,8,32], index: 2, kind: input, shape index: {}]   ;;  %s1139_s3 = inlined_call_operand.vmem [shape: f32[2,8,1], index: 3, kind: input, shape index: {}]   ;;  %s1140_s4 = inlined_call_operand.vmem [shape: f32[2,1,8], index: 4, kind: input, shape index: {}]   ;;  %s1141_s5 = inlined_call_operand.vmem [shape: bf16[32,32], index: 5, kind: input, shape index: {}]   ;;  %s1142_s6 = inlined_call_operand.vmem [shape: f32[1,32], index: 6, kind: input, shape index: {}]   ;;  %s1143_s7 = inlined_call_operand.vmem [shape: f32[2,8,32], index: 7, kind: input, shape index: {}]   ;;  %s1144_s8 = inlined_call_operand.hbm [shape: f32[1,32], index: 8, kind: input, shape index: {}]   ;;  %s1145_s9 = inlined_call_operand.hbm [shape: f32[1,32], index: 9, kind: input, shape index: {}]   ;;  %s1146_s10 = inlined_call_operand.vmem [shape: f32[2,8,32], index: 10, kind: output, shape index: {}]  }
   0x1   :  { %16 = vsyncpa [#allocation5], 0  ;;  %s1045_s13 = smov 0  }
   0x2 LB: > { %s311_s16 = sshll.u32 %s1144_s8, 4  ;;  %s825_s17 = sadd.s32 4294967295, %s982_s13   ;;  %s982_s13 = sphi %s1045_s13, %s22_s13   ;;  %s312_s16 = int_to_ptr.hbm [resolvable:$true] %s311_s16 }
   0x3   : > { %p827_p0 = scmp.ge.s32.totalorder %s982_s13, 1  ;;  %p293_p1 = scmp.lt.s32.totalorder %s982_s13, 3 }
   0x4   : > { %p872_p2 = scmp.eq.s32.totalorder %s825_s17, 0  ;;  %s984_s19 = smov [#allocation2]  }
   0x5   : > { %p1056_p3 = pnand %p827_p0, %p293_p1  ;;  %s313_s20 = sshll.u32 %s984_s19, 4  ;;  %s314_s20 = int_to_ptr.vmem [resolvable:$true] %s313_s20 }
   0x6   : > { %s323_s23 = sshll.u32 %s1145_s9, 4  ;;  %s985_s24 = smov [#allocation4]   ;;  %s324_s23 = int_to_ptr.hbm [resolvable:$true] %s323_s23 }
   0x7   : > { %p865_p4 = pneg %p1056_p3  ;;  %s325_s25 = sshll.u32 %s985_s24, 4  ;;  %s326_s25 = int_to_ptr.vmem [resolvable:$true] %s325_s25 }
   0x8   : > { %379 = sbr.rel (%p1056_p3) target bundleno = 1067 (0x42b), region = 60 }
   0x9   : > { %p866_p5 = pnand %p872_p2, %p865_p4 }
   0xb   : > { %868 = dma.hbm_to_vmem [thread:$0]  (!%p866_p5), %s312_s16, 16, %s314_s20, [#allocation3]  }
   0xc   : > { %871 = dma.hbm_to_vmem [thread:$0]  (!%p866_p5), %s324_s23, 16, %s326_s25, [#allocation5]  }
   0xd   : > { %973 = dma.done.wait (%p872_p2), [#allocation3], 16  }
   0xe   : > { %975 = vsyncadd (%p872_p2), [#allocation3], 4294967280 }
   0xf   : > { %977 = dma.done.wait (%p872_p2), [#allocation5], 16  }
  0x10   : > { %979 = vsyncadd (%p872_p2), [#allocation5], 4294967280  ;;  %p440_p6 = scmp.lt.s32.totalorder %s825_s17, 1  ;;  %v986_v0 = vmov 0   ;;  %vm485_vm0 = vcmask 130048   ;;  %s987_s24 = smov 112  }
  0x11   : > { %890 = vset.pattern.permute.xlu1 %v986_v0  ;;  %891 = vset.pattern.permute.xlu0 %v986_v0  ;;  %vm508_vm2 = vcmask 64512   ;;  %vm522_vm3 = vcmask 1043456   ;;  %v856_v48 = vld [vmem:[%s1141_s5 + $0x8] sm:$0xff]  ;;  %v855_v49 = vld [vmem:[%s1141_s5] sm:$0xff]  ;;  %vm634_vm4 = vcmask 261120  }
  0x12   : > { %s1149_s17 = smov (!%p440_p6, %s825_s17), 1  ;;  %v893_v61 = vld [vmem:[%s1142_s6] ss:$0 sm:$0xff] }
  0x13   : > { %s1075_s26 = sshll.u32 %s1149_s17, 3  ;;  %s458_s23 = scalar_lea.vmem %s1140_s4, %s1149_s17 }
  0x14   : > { %s447_s29 = scalar_lea.vmem %s1137_s1, %s1075_s26  ;;  %s443_s12 = scalar_lea.vmem %s1136_s0, %s1075_s26  ;;  %v892_v17 = vld [vmem:[%s458_s23] ss:$0 sm:$0xff] }
  0x15   : > { %s455_s16 = scalar_lea.vmem %s1139_s3, %s1075_s26  ;;  %v481_v1 = vld [vmem:[%s447_s29] sm:$0xff]  ;;  %s451_s20 = scalar_lea.vmem %s1138_s2, %s1075_s26 }
  0x16   : > { %v479_v2 = vld [vmem:[%s443_s12] sm:$0xff]  ;;  %v482_v4 = vpack.c.bf16 %v481_v1, %v481_v1  ;;  %s988_s29 = smov 16   ;;  %s462_s15 = scalar_lea.vmem %s1143_s7, %s1075_s26 }
  0x17   : > { %v468_v3 = vld [vmem:[%s455_s16] sm:$0xff]  ;;  %v480_v9 = vpack.c.bf16 %v479_v2, %v479_v2  ;;  %s466_s19 = scalar_lea.vmem %s1146_s10, %s1075_s26 }
  0x18   : > { %472 = vperm.xlu1 %890, %v468_v3   ;;  %v483_v5 = vld [vmem:[%s451_s20] sm:$0xff]  ;;  %v490_v7 = vsel %vm485_vm0, %v482_v4, 0  ;;  %v547_v8 = vunpack.c.l.b16 %v482_v4  ;;  %v989_v4 = vmov 32.0  }
  0x19   : > { %v484_v6 = vpack.c.bf16 %v483_v5, %v483_v5  ;;  %499 = vmatpush.bf16.xpose.msra.mxu0 %v490_v7  ;;  %v542_v13 = vunpack.c.l.b16 %v480_v9  ;;  %v651_v63 = vld [vmem:[%s462_s15] sm:$0xff] }
  0x1a   : > { %v548_v11 = vpack.c.b16 %v547_v8, %v547_v8 }
  0x1b   : > { %v583_v10 = vunpack.c.l.b16 %v484_v6  ;;  %v543_v14 = vpack.c.b16 %v542_v13, %v542_v13  ;;  %v524_v26 = vsel %vm522_vm3, %v484_v6, 0 }
  0x1c   : > { %549 = vrot.lane.b32.xlu0 %v548_v11, %s987_s24  ;;  %533 = vmatpush.bf16.msra.mxu1 %v524_v26 }
  0x1d   : > { %v584_v12 = vpack.c.b16 %v583_v10, %v583_v10 }
  0x1f   : > { %585 = vrot.lane.b32.xlu2 %v584_v12, %s987_s24 }
  0x20   : > { %840 = vmatmul.msk.bf16.vlgmr.msra.gmra.mxu0 %vm485_vm0, %v480_v9  ;;  %644 = vmatpush.bf16.msrb.mxu1 %v856_v48 }
  0x24   : > { %544 = vrot.lane.b32.xlu0 %v543_v14, %s987_s24  ;;  %645 = vmatpush.bf16.msrb.mxu1 %v855_v49 }
  0x79   : > { %v586_v27 = vpop.permute.xlu2 %585 }
  0x7a   : > { %v591_v39 = vsel %vm522_vm3, %v586_v27, 0  ;;  %v895_v27 = vld [vmem:[#allocation4] ss:$0 sm:$0xff] }
  0x7b   : > { %600 = vmatpush.bf16.msra.mxu3 %v591_v39 }
  0x8a   : > { %v473_v19 = vpop.permute.xlu1 %472 }
  0x8b   : > { %v478_v20 = vmul.f32 %v892_v17, %v473_v19 }
  0x8d   : > { %vm506_vm1 = vcmp.gt.f32.partialorder %v478_v20, 0.0 }
  0x8e   : > { %v550_v15 = vpop.permute.xlu0 %549 }
  0x8f   : > { %v555_v16 = vsel %vm485_vm0, %v550_v15, 0 }
  0x90   : > { %564 = vmatpush.bf16.xpose.msra.mxu2 %v555_v16 }
  0x96   : > { %v545_v18 = vpop.permute.xlu0 %544 }
  0x97   : > { %842 = vmatmul.msk.bf16.vlgmr.msra.gmra.mxu2 %vm485_vm0, %v545_v18 }
  0x9d   : > { %v501_v21 = vpop.f32.mrf.mxu0 }
  0x9e   : > { %v505_v22 = vmul.f32 0.25, %v501_v21 }
  0xa0   : > { %v507_v23 = vsel %vm506_vm1, %v505_v22, -1e+09 }
  0xa1   : > { %v509_v24 = vsel %vm508_vm2, %v507_v23, -inf }
  0xa2   : > { %510 = vmax.xlane.f32.xlu2 %v509_v24 }
  0xa5   : > { %v503_v25 = vpop.f32.mrf.mxu0 }
  0xa6   : > { %v894_v25 = vld [vmem:[#allocation2] ss:$0 sm:$0xff] }
 0x115   : > { %v511_v28 = vpop.xlane.xlu2 %510 }
 0x116   : > { %v512_v29 = vsub.f32 %v507_v23, %v511_v28 }
 0x118   : > { %v513_v30 = vmul.f32 1.442695, %v512_v29 }
 0x11a   : > { %896 = vpow2.f32 %v513_v30  ;;  %v566_v31 = vpop.f32.mrf.mxu2 }
 0x11b   : > { %v570_v32 = vmul.f32 0.25, %v566_v31 }
 0x11d   : > { %v571_v33 = vsel %vm506_vm1, %v570_v32, -1e+09 }
 0x11e   : > { %v572_v34 = vsel %vm508_vm2, %v571_v33, -inf }
 0x11f   : > { %573 = vmax.xlane.f32.xlu1 %v572_v34 }
 0x120   : > { %v897_v35 = vpop.eup %896 }
 0x121   : > { %v518_v36 = vpack.c.bf16 %v897_v35, %v897_v35  ;;  %v515_v37 = vsel %vm508_vm2, %v897_v35, 0.0 }
 0x122   : > { %v568_v38 = vpop.f32.mrf.mxu2  ;;  %516 = vadd.xlane.f32.xlu2 %v515_v37 }
 0x123   : > { %841 = vmatmul.msk.bf16.vlgmr.msra.gmra.mxu1 %vm508_vm2, %v518_v36 }
 0x192   : > { %v574_v40 = vpop.xlane.xlu1 %573 }
 0x193   : > { %v575_v41 = vsub.f32 %v571_v33, %v574_v40 }
 0x195   : > { %v576_v42 = vmul.f32 1.442695, %v575_v41  ;;  %v517_v55 = vpop.xlane.xlu2 %516 }
 0x197   : > { %898 = vpow2.f32 %v576_v42 }
 0x19d   : > { %v899_v43 = vpop.eup %898 }
 0x19e   : > { %v578_v44 = vsel %vm508_vm2, %v899_v43, 0.0  ;;  %v581_v45 = vpack.c.bf16 %v899_v43, %v899_v43 }
 0x19f   : > { %579 = vadd.xlane.f32.xlu0 %v578_v44 }
 0x1a0   : > { %v535_v46 = vpop.f32.mrf.mxu1  ;;  %843 = vmatmul.msk.bf16.vlgmr.msra.gmra.mxu3 %vm508_vm2, %v581_v45 }
 0x1a8   : > { %v537_v47 = vpop.f32.mrf.mxu1 }
 0x212   : > { %v580_v50 = vpop.xlane.xlu0 %579 }
 0x213   : > { %900 = vrcp.f32 %v580_v50 }
 0x214   : > { %902 = vrcp.f32 %v517_v55 }
 0x215   : > { %904 = vrcp.f32 %v989_v4 }
 0x219   : > { %v901_v51 = vpop.eup %900 }
 0x21a   : > { %v903_v56 = vpop.eup %902 }
 0x21b   : > { %v540_v57 = vmul.f32 %v903_v56, %v535_v46  ;;  %v905_v5 = vpop.eup %904 }
 0x21c   : > { %v657_v6 = vmul.f32 32.0, %v905_v5  ;;  %vm661_vm5 = vweird.f32 %v905_v5 }
 0x21e   : > { %v658_v7 = vsub.f32 1.0, %v657_v6 }
 0x220   : > { %v659_v8 = vmul.f32 %v905_v5, %v658_v7 }
 0x222   : > { %v660_v9 = vadd.f32 %v905_v5, %v659_v8 }
 0x223   : > { %v602_v52 = vpop.f32.mrf.mxu3 }
 0x224   : > { %v607_v53 = vmul.f32 %v901_v51, %v602_v52  ;;  %v662_v10 = vsel %vm661_vm5, %v905_v5, %v660_v9 }
 0x226   : > { %609 = vrot.lane.b32.xlu1 %v607_v53, %s988_s29 }
 0x22b   : > { %v604_v54 = vpop.f32.mrf.mxu3 }
 0x298   : > { %v610_v58 = vpop.permute.xlu1 %609 }
 0x299   : > { %v612_v59 = vsel %vm485_vm0, %v540_v57, %v610_v58 }
 0x29a   : > { %v613_v60 = vpack.c.bf16 %v612_v59, %v612_v59 }
 0x29c   : > { %852 = vmatmul.msk.bf16.vlgmr.msrb.gmra.mxu1 %vm634_vm4, %v613_v60 }
 0x319   : > { %v647_v62 = vpop.f32.mrf.mxu1 }
 0x31a   : > { %v648_v0 = vadd.f32 %v893_v61, %v647_v62 }
 0x31c   : > { %v652_v1 = vadd.f32 %v651_v63, %v648_v0 }
 0x31e   : > { %v653_v2 = vsel %vm634_vm4, %v652_v1, 0.0 }
 0x31f   : > { %654 = vadd.xlane.f32.xlu2 %v653_v2 }
 0x321   : > { %v649_v3 = vpop.f32.mrf.mxu1 }
 0x392   : > { %v655_v11 = vpop.xlane.xlu2 %654 }
 0x393   : > { %v663_v12 = vmul.f32 %v662_v10, %v655_v11 }
 0x395   : > { %v664_v13 = vsub.f32 %v652_v1, %v663_v12 }
 0x397   : > { %v665_v14 = vmul.f32 %v664_v13, %v664_v13 }
 0x399   : > { %v666_v15 = vsel %vm634_vm4, %v665_v14, 0.0 }
 0x39a   : > { %667 = vadd.xlane.f32.xlu0 %v666_v15 }
 0x40d   : > { %v668_v16 = vpop.xlane.xlu0 %667 }
 0x40e   : > { %v669_v17 = vmul.f32 %v668_v16, %v662_v10 }
 0x410   : > { %v670_v18 = vadd.f32 1e-05, %v669_v17 }
 0x412   : > { %906 = vrsqrt.f32 %v670_v18  ;;  %vm677_vm7 = vweird.f32 %v670_v18 }
 0x418   : > { %v907_v19 = vpop.eup %906 }
 0x419   : > { %v672_v20 = vmul.f32 %v907_v19, %v670_v18  ;;  %vm678_vm6 = vweird.f32 %v907_v19 }
 0x41a   : > { %vm679_vm8 = vmor %vm677_vm7, %vm678_vm6 }
 0x41b   : > { %v673_v21 = vmul.f32 %v907_v19, %v672_v20 }
 0x41d   : > { %v674_v22 = vmul.f32 0.5, %v673_v21 }
 0x41f   : > { %v675_v23 = vsub.f32 1.5, %v674_v22 }
 0x421   : > { %v676_v24 = vmul.f32 %v907_v19, %v675_v23 }
 0x423   : > { %v680_v26 = vsel %vm679_vm8, %v907_v19, %v676_v24 }
 0x424   : > { %v681_v28 = vmul.f32 %v680_v26, %v664_v13 }
 0x426   : > { %v686_v29 = vmul.f32 %v894_v25, %v681_v28 }
 0x428   : > { %v691_v30 = vadd.f32 %v895_v27, %v686_v29 }
 0x42a   : > { %692 = vst.msk [vmem:[%s466_s19] sm:$0xff] %vm634_vm4, %v691_v30 }
 0x42b PF: > { %s22_s13 = sadd.s32 1, %s982_s13  }
 0x42c   : > { %p19_p7 = scmp.ge.s32.totalorder %s22_s13, 4  }
 0x42e   :  { %21 = sbr.rel (!%p19_p7) target bundleno = 2 (0x2), region = 114 }
 0x433   :  { %712 = vsyncpa [#allocation3], 1 }
 0x434   :  { %714 = vsyncpa [#allocation3 + $0x1], 1 }
 0x435   :  { %715 = vsyncpa [#allocation5], 1 }

// kernel: _lambda_.57
= control target key start
LH: loop header
LB: loop body
LE: loop exit
PB: predicated region body
PF: predicated region fallthrough
CT: control target
= control target key end

     0   :  { %8 = vsyncpa [#allocation3], 0  ;;  %s651_s0 = inlined_call_operand.vmem [shape: f32[16,32], index: 0, kind: input, shape index: {}]   ;;  %s652_s1 = inlined_call_operand.vmem [shape: bf16[32,64], index: 1, kind: input, shape index: {}]   ;;  %s653_s2 = inlined_call_operand.vmem [shape: f32[1,64], index: 2, kind: input, shape index: {}]   ;;  %s654_s3 = inlined_call_operand.hbm [shape: f32[16,64], index: 3, kind: output, shape index: {}]  }
   0x1   :  { %10 = vsyncpa [#allocation3 + $0x1], 0  ;;  %s545_s12 = smov 0   ;;  %s547_s13 = smov 0  }
   0x2   :  { %s549_s14 = smov 0   ;;  %s551_s15 = smov 0  }
   0x3   :  { %s553_s16 = smov 0   ;;  %s555_s17 = smov 0  }
   0x4 LB: > { %s365_s18 = sadd.s32 4294967295, %s523_s17   ;;  %s366_s19 = sadd.s32 4294967294, %s523_s17   ;;  %s523_s17 = sphi %s555_s17, %s16_s17   ;;  %s519_s16 = sphi %s553_s16, %s661_s16   ;;  %s515_s15 = sphi %s551_s15, %s660_s15   ;;  %s511_s14 = sphi %s549_s14, %s659_s14   ;;  %s507_s13 = sphi %s547_s13, %s658_s13   ;;  %s503_s12 = sphi %s545_s12, %s657_s12  }
   0x5   : > { %s28_s20 = sadd.s32 1, %s519_s16  ;;  %s115_s21 = sadd.s32 1, %s511_s14 }
   0x6   : > { %p30_p0 = scmp.ge.s32.totalorder %s28_s20, 2  ;;  %p125_p1 = scmp.ne.s32.totalorder %s511_s14, %s507_s13 }
   0x7   : > { %p126_p2 = scmp.eq.s32.totalorder %s365_s18, 1  ;;  %p131_p3 = scmp.ne.s32.totalorder %s507_s13, %s503_s12 }
   0x8   : > { %s663_s20 = smov (%p30_p0, %s28_s20), 0  ;;  %p132_p5 = scmp.eq.s32.totalorder %s366_s19, 1 }
   0x9   : > { %p585_p4 = por %p126_p2, %p125_p1  ;;  %s110_s23 = ssub.s32 %s519_s16, %s663_s20 }
   0xa   : > { %p371_p6 = scmp.ge.s32.totalorder %s523_s17, 1  ;;  %p113_p7 = scmp.eq.s32.totalorder %s110_s23, 0 }
   0xb   : > { %p592_p8 = por %p132_p5, %p131_p3  ;;  %p170_p9 = scmp.lt.s32.totalorder %s523_s17, 3 }
   0xc   : > { %s598_s25 = scalar_select %p113_p7, %s511_s14, %s115_s21  }
   0xd   : > { %p171_p10 = pnand %p371_p6, %p170_p9 }
   0xe   : > { %p200_p11 = scmp.lt.s32.totalorder (!%p171_p10), %s515_s15, 1  ;;  %s197_s8 = sand.u32 (!%p171_p10), 1, %s507_s13  }
   0xf   : > { %174 = sbr.rel (%p171_p10) target bundleno = 162 (0xa2), region = 32  ;;  %s384_s9 = sshll.u32 (!%p171_p10), %s515_s15, 3 }
  0x10   : > { %s372_s10 = sshll.u32 (!%p171_p10), %s197_s8, 3  ;;  %s265_s19 = scalar_lea.hbm (!%p171_p10), %s654_s3, %s384_s9 }
  0x11   : > { %s199_s26 = scalar_lea.vmem (!%p171_p10), [#allocation2], %s372_s10  ;;  %s269_s28 = sshll.u32 (!%p171_p10), %s265_s19, 4  ;;  %s270_s28 = int_to_ptr.hbm [resolvable:$true] %s269_s28 }
  0x12   : > { %s267_s27 = sshll.u32 (!%p171_p10), %s199_s26, 4  ;;  %s459_s29 = sshra.s32 (!%p171_p10), %s270_s28, 4  ;;  %s268_s27 = int_to_ptr.vmem [resolvable:$true] %s267_s27  ;;  %s460_s29 = int_to_ptr.hbm [resolvable:$true] %s459_s29 }
  0x13   : > { %s465_s6 = scalar_lea.hbm (!%p171_p10), %s654_s3, 16  ;;  %p466_p1 = scmp.lt.s32.totalorder (!%p171_p10), %s460_s29, %s654_s3 }
  0x14   : > { %v388_v0 = vld [vmem:[%s652_s1 + $0x8] sm:$0xff]  ;;  %v387_v1 = vld [vmem:[%s652_s1] sm:$0xff]  ;;  %s201_s30 = scalar_select %p200_p11, %s515_s15, 1  ;;  %vm234_vm0 = vcmask 261120   ;;  %vm251_vm1 = vcmask 523264  }
  0x15   : > { %244 = vmatpush.bf16.msra.mxu0 %v388_v0  ;;  %v444_v4 = vld [vmem:[%s653_s2] ss:$0 sm:$0xff]  ;;  %s254_s15 = scalar_lea.sflag [#allocation3], %s197_s8 }
  0x16   : > { %s373_s4 = sshll.u32 %s201_s30, 3  ;;  %s461_s30 = scalar_lea.hbm %s460_s29, 8 }
  0x17   : > { %s203_s7 = scalar_lea.vmem %s651_s0, %s373_s4  ;;  %p462_p12 = scmp.ne.s32.totalorder %s460_s29, %s461_s30 }
  0x18   : > { %v212_v2 = vld [vmem:[%s203_s7] sm:$0xff]  ;;  %p467_p2 = scmp.lt.s32.totalorder %s465_s6, %s461_s30 }
  0x19   : > { %245 = vmatpush.bf16.msra.mxu0 %v387_v1  ;;  %v213_v3 = vpack.c.bf16 %v212_v2, %v212_v2  ;;  %p463_p13 = pnand %p462_p12, %p585_p4 }
  0x1a   : > { %p468_p3 = por %p467_p2, %p466_p1 }
  0x1b   : > { %p464_p0 = pneg %p463_p13 }
  0x1c   : > { %382 = vmatmul.msk.bf16.vlgmr.msra.gmra.mxu0 %vm234_vm0, %v213_v3 }
  0x1d   : > { %p469_p5 = pnand %p468_p3, %p464_p0 }
  0x99   : > { %v247_v5 = vpop.f32.mrf.mxu0 }
  0x9a   : > { %v248_v6 = vadd.f32 %v444_v4, %v247_v5 }
  0x9c   : > { %252 = vst.msk [vmem:[%s199_s26] sm:$0xff] %vm251_vm1, %v248_v6 }
  0x9d   : > { %472 = shalt.err (!%p469_p5)
}
  0x9e   : > { %389 = dma.vmem_to_hbm [thread:$0]  (%p585_p4), %s268_s27, 128, %s270_s28, %s254_s15  }
  0xa1   : > { %v249_v7 = vpop.f32.mrf.mxu0 }
  0xa2 PF: > { %p395_p6 = scmp.ge.s32.totalorder %s523_s17, 2  ;;  %s281_s8 = sand.u32 1, %s503_s12  }
  0xa3   : > { %s282_s10 = scalar_lea.sflag [#allocation3], %s281_s8 }
  0xa4   : > { %p392_p7 = pnand %p395_p6, %p592_p8 }
  0xa6   : > { %p393_p9 = pneg %p392_p7 }
  0xa8   : > { %498 = dma.done.wait (%p393_p9), %s282_s10, 128  }
  0xa9   : > { %500 = vsyncadd (%p393_p9), %s282_s10, 4294967168  ;;  %s16_s17 = sadd.s32 1, %s523_s17   ;;  %s657_s12 = smov %s507_s13 }
  0xaa   : > { %p13_p10 = scmp.ge.s32.totalorder %s16_s17, 4   ;;  %s658_s13 = smov %s511_s14 }
  0xab   : > { %s659_s14 = smov %s598_s25  ;;  %s660_s15 = smov %s519_s16 }
  0xac   : > { %s661_s16 = smov %s663_s20  ;;  %15 = sbr.rel (!%p13_p10) target bundleno = 4 (0x4), region = 73 }
  0xb1   :  { %288 = vsyncpa [#allocation3], 1 }
  0xb2   :  { %290 = vsyncpa [#allocation3 + $0x1], 1 }

// kernel: _lambda_.55
= control target key start
LH: loop header
LB: loop body
LE: loop exit
PB: predicated region body
PF: predicated region fallthrough
CT: control target
= control target key end

     0   :  { %15 = vsyncpa [#allocation3], 0  ;;  %s973_s13 = smov 0   ;;  %s1051_s0 = inlined_call_operand.vmem [shape: f32[2,8,32], index: 0, kind: input, shape index: {}]   ;;  %s1052_s1 = inlined_call_operand.vmem [shape: f32[2,8,32], index: 1, kind: input, shape index: {}]   ;;  %s1053_s2 = inlined_call_operand.vmem [shape: f32[2,8,32], index: 2, kind: input, shape index: {}]   ;;  %s1054_s3 = inlined_call_operand.vmem [shape: f32[2,8,1], index: 3, kind: input, shape index: {}]   ;;  %s1055_s4 = inlined_call_operand.vmem [shape: f32[2,1,8], index: 4, kind: input, shape index: {}]   ;;  %s1056_s5 = inlined_call_operand.vmem [shape: bf16[32,32], index: 5, kind: input, shape index: {}]   ;;  %s1057_s6 = inlined_call_operand.vmem [shape: f32[1,32], index: 6, kind: input, shape index: {}]   ;;  %s1058_s7 = inlined_call_operand.vmem [shape: f32[2,8,32], index: 7, kind: input, shape index: {}]   ;;  %s1059_s8 = inlined_call_operand.vmem [shape: f32[1,32], index: 8, kind: input, shape index: {}]   ;;  %s1060_s9 = inlined_call_operand.hbm [shape: f32[1,32], index: 9, kind: input, shape index: {}]   ;;  %s1061_s10 = inlined_call_operand.vmem [shape: f32[2,8,32], index: 10, kind: output, shape index: {}]  }
   0x1 LB: > { %s800_s14 = sadd.s32 4294967295, %s911_s13   ;;  %p802_p0 = scmp.ge.s32.totalorder %s911_s13, 1  ;;  %s911_s13 = sphi %s973_s13, %s21_s13  }
   0x2   : > { %p292_p1 = scmp.lt.s32.totalorder %s911_s13, 3  ;;  %s313_s17 = sshll.u32 %s1060_s9, 4  ;;  %s314_s17 = int_to_ptr.hbm [resolvable:$true] %s313_s17 }
   0x3   : > { %p838_p3 = scmp.eq.s32.totalorder %s800_s14, 0  ;;  %s913_s18 = smov [#allocation2]  }
   0x4   : > { %p293_p2 = pnand %p802_p0, %p292_p1  ;;  %s315_s19 = sshll.u32 %s913_s18, 4  ;;  %s316_s19 = int_to_ptr.vmem [resolvable:$true] %s315_s19 }
   0x6   : > { %p834_p4 = pneg %p293_p2  ;;  %369 = sbr.rel (%p293_p2) target bundleno = 1063 (0x427), region = 60 }
   0x8   : > { %p835_p5 = pnand %p838_p3, %p834_p4 }
   0xa   : > { %837 = dma.hbm_to_vmem [thread:$0]  (!%p835_p5), %s314_s17, 16, %s316_s19, [#allocation3]  }
   0xb   : > { %906 = dma.done.wait (%p838_p3), [#allocation3], 16  }
   0xc   : > { %908 = vsyncadd (%p838_p3), [#allocation3], 4294967280  ;;  %p425_p6 = scmp.lt.s32.totalorder %s800_s14, 1  ;;  %v914_v0 = vmov 0   ;;  %vm470_vm0 = vcmask 130048   ;;  %s915_s18 = smov 112  }
   0xd   : > { %853 = vset.pattern.permute.xlu1 %v914_v0  ;;  %854 = vset.pattern.permute.xlu0 %v914_v0  ;;  %vm493_vm2 = vcmask 64512   ;;  %vm507_vm3 = vcmask 1043456   ;;  %v829_v48 = vld [vmem:[%s1056_s5 + $0x8] sm:$0xff]  ;;  %v828_v49 = vld [vmem:[%s1056_s5] sm:$0xff]  ;;  %vm619_vm4 = vcmask 261120  }
   0xe   : > { %s1063_s14 = smov (!%p425_p6, %s800_s14), 1  ;;  %v856_v61 = vld [vmem:[%s1057_s6] ss:$0 sm:$0xff] }
   0xf   : > { %s987_s20 = sshll.u32 %s1063_s14, 3  ;;  %s443_s17 = scalar_lea.vmem %s1055_s4, %s1063_s14 }
  0x10   : > { %s432_s23 = scalar_lea.vmem %s1052_s1, %s987_s20  ;;  %s428_s26 = scalar_lea.vmem %s1051_s0, %s987_s20  ;;  %v855_v17 = vld [vmem:[%s443_s17] ss:$0 sm:$0xff] }
  0x11   : > { %s440_s29 = scalar_lea.vmem %s1054_s3, %s987_s20  ;;  %v466_v1 = vld [vmem:[%s432_s23] sm:$0xff]  ;;  %s436_s12 = scalar_lea.vmem %s1053_s2, %s987_s20 }
  0x12   : > { %v464_v2 = vld [vmem:[%s428_s26] sm:$0xff]  ;;  %v467_v4 = vpack.c.bf16 %v466_v1, %v466_v1  ;;  %s916_s23 = smov 16   ;;  %s447_s28 = scalar_lea.vmem %s1058_s7, %s987_s20 }
  0x13   : > { %v453_v3 = vld [vmem:[%s440_s29] sm:$0xff]  ;;  %v465_v9 = vpack.c.bf16 %v464_v2, %v464_v2  ;;  %s451_s15 = scalar_lea.vmem %s1061_s10, %s987_s20 }
  0x14   : > { %457 = vperm.xlu1 %853, %v453_v3   ;;  %v468_v5 = vld [vmem:[%s436_s12] sm:$0xff]  ;;  %v475_v7 = vsel %vm470_vm0, %v467_v4, 0  ;;  %v532_v8 = vunpack.c.l.b16 %v467_v4  ;;  %v917_v4 = vmov 32.0  }
  0x15   : > { %v469_v6 = vpack.c.bf16 %v468_v5, %v468_v5  ;;  %484 = vmatpush.bf16.xpose.msra.mxu0 %v475_v7  ;;  %v527_v13 = vunpack.c.l.b16 %v465_v9  ;;  %v636_v63 = vld [vmem:[%s447_s28] sm:$0xff] }
  0x16   : > { %v533_v11 = vpack.c.b16 %v532_v8, %v532_v8 }
  0x17   : > { %v568_v10 = vunpack.c.l.b16 %v469_v6  ;;  %v528_v14 = vpack.c.b16 %v527_v13, %v527_v13  ;;  %v509_v26 = vsel %vm507_vm3, %v469_v6, 0 }
  0x18   : > { %534 = vrot.lane.b32.xlu0 %v533_v11, %s915_s18  ;;  %518 = vmatpush.bf16.msra.mxu1 %v509_v26 }
  0x19   : > { %v569_v12 = vpack.c.b16 %v568_v10, %v568_v10 }
  0x1b   : > { %570 = vrot.lane.b32.xlu2 %v569_v12, %s915_s18 }
  0x1c   : > { %813 = vmatmul.msk.bf16.vlgmr.msra.gmra.mxu0 %vm470_vm0, %v465_v9  ;;  %629 = vmatpush.bf16.msrb.mxu1 %v829_v48 }
  0x20   : > { %529 = vrot.lane.b32.xlu0 %v528_v14, %s915_s18  ;;  %630 = vmatpush.bf16.msrb.mxu1 %v828_v49 }
  0x75   : > { %v571_v27 = vpop.permute.xlu2 %570 }
  0x76   : > { %v576_v39 = vsel %vm507_vm3, %v571_v27, 0  ;;  %v858_v27 = vld [vmem:[#allocation2] ss:$0 sm:$0xff] }
  0x77   : > { %585 = vmatpush.bf16.msra.mxu3 %v576_v39 }
  0x86   : > { %v458_v19 = vpop.permute.xlu1 %457 }
  0x87   : > { %v463_v20 = vmul.f32 %v855_v17, %v458_v19 }
  0x89   : > { %vm491_vm1 = vcmp.gt.f32.partialorder %v463_v20, 0.0 }
  0x8a   : > { %v535_v15 = vpop.permute.xlu0 %534 }
  0x8b   : > { %v540_v16 = vsel %vm470_vm0, %v535_v15, 0 }
  0x8c   : > { %549 = vmatpush.bf16.xpose.msra.mxu2 %v540_v16 }
  0x92   : > { %v530_v18 = vpop.permute.xlu0 %529 }
  0x93   : > { %815 = vmatmul.msk.bf16.vlgmr.msra.gmra.mxu2 %vm470_vm0, %v530_v18 }
  0x99   : > { %v486_v21 = vpop.f32.mrf.mxu0 }
  0x9a   : > { %v490_v22 = vmul.f32 0.25, %v486_v21 }
  0x9c   : > { %v492_v23 = vsel %vm491_vm1, %v490_v22, -1e+09 }
  0x9d   : > { %v494_v24 = vsel %vm493_vm2, %v492_v23, -inf }
  0x9e   : > { %495 = vmax.xlane.f32.xlu2 %v494_v24 }
  0xa1   : > { %v488_v25 = vpop.f32.mrf.mxu0 }
  0xa2   : > { %v857_v25 = vld [vmem:[%s1059_s8] ss:$0 sm:$0xff] }
 0x111   : > { %v496_v28 = vpop.xlane.xlu2 %495 }
 0x112   : > { %v497_v29 = vsub.f32 %v492_v23, %v496_v28 }
 0x114   : > { %v498_v30 = vmul.f32 1.442695, %v497_v29 }
 0x116   : > { %859 = vpow2.f32 %v498_v30  ;;  %v551_v31 = vpop.f32.mrf.mxu2 }
 0x117   : > { %v555_v32 = vmul.f32 0.25, %v551_v31 }
 0x119   : > { %v556_v33 = vsel %vm491_vm1, %v555_v32, -1e+09 }
 0x11a   : > { %v557_v34 = vsel %vm493_vm2, %v556_v33, -inf }
 0x11b   : > { %558 = vmax.xlane.f32.xlu1 %v557_v34 }
 0x11c   : > { %v860_v35 = vpop.eup %859 }
 0x11d   : > { %v503_v36 = vpack.c.bf16 %v860_v35, %v860_v35  ;;  %v500_v37 = vsel %vm493_vm2, %v860_v35, 0.0 }
 0x11e   : > { %v553_v38 = vpop.f32.mrf.mxu2  ;;  %501 = vadd.xlane.f32.xlu2 %v500_v37 }
 0x11f   : > { %814 = vmatmul.msk.bf16.vlgmr.msra.gmra.mxu1 %vm493_vm2, %v503_v36 }
 0x18e   : > { %v559_v40 = vpop.xlane.xlu1 %558 }
 0x18f   : > { %v560_v41 = vsub.f32 %v556_v33, %v559_v40 }
 0x191   : > { %v561_v42 = vmul.f32 1.442695, %v560_v41  ;;  %v502_v55 = vpop.xlane.xlu2 %501 }
 0x193   : > { %861 = vpow2.f32 %v561_v42 }
 0x199   : > { %v862_v43 = vpop.eup %861 }
 0x19a   : > { %v563_v44 = vsel %vm493_vm2, %v862_v43, 0.0  ;;  %v566_v45 = vpack.c.bf16 %v862_v43, %v862_v43 }
 0x19b   : > { %564 = vadd.xlane.f32.xlu0 %v563_v44 }
 0x19c   : > { %v520_v46 = vpop.f32.mrf.mxu1  ;;  %816 = vmatmul.msk.bf16.vlgmr.msra.gmra.mxu3 %vm493_vm2, %v566_v45 }
 0x1a4   : > { %v522_v47 = vpop.f32.mrf.mxu1 }
 0x20e   : > { %v565_v50 = vpop.xlane.xlu0 %564 }
 0x20f   : > { %863 = vrcp.f32 %v565_v50 }
 0x210   : > { %865 = vrcp.f32 %v502_v55 }
 0x211   : > { %867 = vrcp.f32 %v917_v4 }
 0x215   : > { %v864_v51 = vpop.eup %863 }
 0x216   : > { %v866_v56 = vpop.eup %865 }
 0x217   : > { %v525_v57 = vmul.f32 %v866_v56, %v520_v46  ;;  %v868_v5 = vpop.eup %867 }
 0x218   : > { %v642_v6 = vmul.f32 32.0, %v868_v5  ;;  %vm646_vm5 = vweird.f32 %v868_v5 }
 0x21a   : > { %v643_v7 = vsub.f32 1.0, %v642_v6 }
 0x21c   : > { %v644_v8 = vmul.f32 %v868_v5, %v643_v7 }
 0x21e   : > { %v645_v9 = vadd.f32 %v868_v5, %v644_v8 }
 0x21f   : > { %v587_v52 = vpop.f32.mrf.mxu3 }
 0x220   : > { %v592_v53 = vmul.f32 %v864_v51, %v587_v52  ;;  %v647_v10 = vsel %vm646_vm5, %v868_v5, %v645_v9 }
 0x222   : > { %594 = vrot.lane.b32.xlu1 %v592_v53, %s916_s23 }
 0x227   : > { %v589_v54 = vpop.f32.mrf.mxu3 }
 0x294   : > { %v595_v58 = vpop.permute.xlu1 %594 }
 0x295   : > { %v597_v59 = vsel %vm470_vm0, %v525_v57, %v595_v58 }
 0x296   : > { %v598_v60 = vpack.c.bf16 %v597_v59, %v597_v59 }
 0x298   : > { %825 = vmatmul.msk.bf16.vlgmr.msrb.gmra.mxu1 %vm619_vm4, %v598_v60 }
 0x315   : > { %v632_v62 = vpop.f32.mrf.mxu1 }
 0x316   : > { %v633_v0 = vadd.f32 %v856_v61, %v632_v62 }
 0x318   : > { %v637_v1 = vadd.f32 %v636_v63, %v633_v0 }
 0x31a   : > { %v638_v2 = vsel %vm619_vm4, %v637_v1, 0.0 }
 0x31b   : > { %639 = vadd.xlane.f32.xlu2 %v638_v2 }
 0x31d   : > { %v634_v3 = vpop.f32.mrf.mxu1 }
 0x38e   : > { %v640_v11 = vpop.xlane.xlu2 %639 }
 0x38f   : > { %v648_v12 = vmul.f32 %v647_v10, %v640_v11 }
 0x391   : > { %v649_v13 = vsub.f32 %v637_v1, %v648_v12 }
 0x393   : > { %v650_v14 = vmul.f32 %v649_v13, %v649_v13 }
 0x395   : > { %v651_v15 = vsel %vm619_vm4, %v650_v14, 0.0 }
 0x396   : > { %652 = vadd.xlane.f32.xlu0 %v651_v15 }
 0x409   : > { %v653_v16 = vpop.xlane.xlu0 %652 }
 0x40a   : > { %v654_v17 = vmul.f32 %v653_v16, %v647_v10 }
 0x40c   : > { %v655_v18 = vadd.f32 1e-05, %v654_v17 }
 0x40e   : > { %869 = vrsqrt.f32 %v655_v18  ;;  %vm662_vm7 = vweird.f32 %v655_v18 }
 0x414   : > { %v870_v19 = vpop.eup %869 }
 0x415   : > { %v657_v20 = vmul.f32 %v870_v19, %v655_v18  ;;  %vm663_vm6 = vweird.f32 %v870_v19 }
 0x416   : > { %vm664_vm8 = vmor %vm662_vm7, %vm663_vm6 }
 0x417   : > { %v658_v21 = vmul.f32 %v870_v19, %v657_v20 }
 0x419   : > { %v659_v22 = vmul.f32 0.5, %v658_v21 }
 0x41b   : > { %v660_v23 = vsub.f32 1.5, %v659_v22 }
 0x41d   : > { %v661_v24 = vmul.f32 %v870_v19, %v660_v23 }
 0x41f   : > { %v665_v26 = vsel %vm664_vm8, %v870_v19, %v661_v24 }
 0x420   : > { %v666_v28 = vmul.f32 %v665_v26, %v649_v13 }
 0x422   : > { %v671_v29 = vmul.f32 %v857_v25, %v666_v28 }
 0x424   : > { %v676_v30 = vadd.f32 %v858_v27, %v671_v29 }
 0x426   : > { %677 = vst.msk [vmem:[%s451_s15] sm:$0xff] %vm619_vm4, %v676_v30 }
 0x427 PF: > { %s21_s13 = sadd.s32 1, %s911_s13  }
 0x428   : > { %p18_p7 = scmp.ge.s32.totalorder %s21_s13, 4  }
 0x42a   :  { %20 = sbr.rel (!%p18_p7) target bundleno = 1 (0x1), region = 110 }
 0x42f   :  { %697 = vsyncpa [#allocation3], 1 }
 0x430   :  { %699 = vsyncpa [#allocation3 + $0x1], 1 }

</bundles_post_ra>
